<compile_context>
chip_gen: v7x
topology: tpu7x:2x2x1
jax: 0.10.0
libtpu: 0.0.40
codegen_flags: <defaults>
</compile_context>

<pallas_src>
import jax
import jax.numpy as jnp
from jax.experimental import pallas as pl
from jax.experimental.pallas import tpu as pltpu


def _mlp_kernel(x_ref,
                w1_ref, b1_ref,
                w2_ref, b2_ref,
                w3_ref, b3_ref,
                w4_ref, b4_ref,
                o_ref):
    # ---- fc1: K = 2+2n is tiny, so do it as an exact f32 MXU matmul straight
    #      off the unpadded (TM, d_in) input tile (no 10->128 lane padding).
    h = jnp.dot(x_ref[...], w1_ref[...], preferred_element_type=jnp.float32)
    h = jnp.maximum(h + b1_ref[...], 0.0)                       # f32, (TM, 128)

    # ---- fc2: bf16 operands on the MXU with f32 accumulation, then a bf16
    #      epilogue (bias + ReLU) so the (TM, 1024) intermediate is half-width.
    h = jnp.dot(h.astype(w2_ref.dtype), w2_ref[...],
                preferred_element_type=jnp.float32)
    h = jnp.maximum(h.astype(jnp.bfloat16) + b2_ref[...], 0)    # bf16, (TM, 1024)

    # ---- fc3: same pattern.
    h = jnp.dot(h, w3_ref[...], preferred_element_type=jnp.float32)
    h = jnp.maximum(h.astype(jnp.bfloat16) + b3_ref[...], 0)    # bf16, (TM, 256)

    # ---- fc4 (256 -> 1): VPU multiply + lane reduction in f32 instead of a
    #      wasteful N=1 MXU pass.
    out = jnp.sum(h.astype(jnp.float32) * w4_ref[...], axis=-1, keepdims=True)
    o_ref[...] = (out + b4_ref[...]).astype(o_ref.dtype)


def _round_up(v, m):
    return (v + m - 1) // m * m


def _default_tm_max():
    # v5e/v6e have 128 MiB VMEM per core -> a 2048-row tile amortizes the
    # per-grid-step fixed cost better; v7x (64 MiB/TC) and anything unknown
    # stay at 1024.
    try:
        kind = jax.devices()[0].device_kind.lower()
        if "v5" in kind or "v6" in kind:
            return 2048
    except Exception:
        pass
    return 1024


def net_forward(x, params, *, tm_max=None, compute_dtype=jnp.bfloat16):
    """x: (B, 2+2n) float32. params: dict of (w1,b1,...,w4,b4), W as (in, out)."""
    B, d_in = x.shape
    if tm_max is None:
        tm_max = _default_tm_max()

    # Adaptive batch tile (see header): small batches -> small tile, medium
    # batches -> >=2 tiles for the v7x megacore, large batches -> tm_max.
    tm = min(tm_max, max(256, _round_up(-(-B // 2), 256)))
    b_pad = _round_up(B, tm)
    n_tiles = b_pad // tm

    # Only pad the batch dim (if needed); NO lane padding of the feature dim.
    x_p = x.astype(jnp.float32)
    if b_pad != B:
        x_p = jnp.pad(x_p, ((0, b_pad - B), (0, 0)))            # (b_pad, d_in)

    w1 = params["w1"].astype(jnp.float32)                       # (d_in, 128)
    b1 = params["b1"].reshape(1, 128).astype(jnp.float32)
    w2 = params["w2"].astype(compute_dtype)                     # (128, 1024)
    b2 = params["b2"].reshape(1, 1024).astype(compute_dtype)
    w3 = params["w3"].astype(compute_dtype)                     # (1024, 256)
    b3 = params["b3"].reshape(1, 256).astype(compute_dtype)
    w4 = params["w4"].reshape(1, 256).astype(jnp.float32)       # VPU row
    b4 = params["b4"].reshape(1, 1).astype(jnp.float32)

    # Right-size the VMEM request for this tile: double-buffered x/out tiles,
    # f32/bf16 intermediates, and the (default) double-buffered resident
    # weights, with ~2x headroom. Floor 16 MiB, cap 48 MiB (v7x uses TM<=1024
    # so its request stays ~22 MiB, well under the 64 MiB physical budget).
    act_bytes = tm * (2 * d_in * 4        # x tile, double-buffered (f32)
                      + 128 * 4           # fc1 activation (f32)
                      + 1024 * (4 + 2)    # fc2 f32 MXU result + bf16 activation
                      + 256 * (4 + 2)     # fc3 f32 MXU result + bf16 activation
                      + 2 * 128 * 4)      # out tile (lane-padded), double-buffered
    wgt_bytes = 2 * (2 * (d_in * 128 + 128 * 1024 + 1024 * 256)
                     + 4 * (128 + 1024 + 256 + 256 + 1))
    vmem_limit = int(min(max(2 * (act_bytes + wgt_bytes), 16 << 20), 48 << 20))

    # Advisory cost estimate so XLA overlaps neighbouring ops correctly.
    flops = 2 * b_pad * (d_in * 128 + 128 * 1024 + 1024 * 256 + 256)
    bytes_accessed = (b_pad * d_in * 4 + b_pad * 4
                      + d_in * 128 * 4
                      + (128 * 1024 + 1024 * 256) * 2
                      + (128 + 1024 + 256 + 256 + 1) * 4)

    out = pl.pallas_call(
        _mlp_kernel,
        out_shape=jax.ShapeDtypeStruct((b_pad, 1), jnp.float32),
        grid=(n_tiles,),
        in_specs=[
            pl.BlockSpec((tm, d_in), lambda i: (i, 0)),     # x tile (pipelined, unpadded lanes)
            pl.BlockSpec((d_in, 128), lambda i: (0, 0)),    # w1 (VMEM-resident)
            pl.BlockSpec((1, 128), lambda i: (0, 0)),       # b1
            pl.BlockSpec((128, 1024), lambda i: (0, 0)),    # w2 (resident)
            pl.BlockSpec((1, 1024), lambda i: (0, 0)),      # b2
            pl.BlockSpec((1024, 256), lambda i: (0, 0)),    # w3 (resident)
            pl.BlockSpec((1, 256), lambda i: (0, 0)),       # b3
            pl.BlockSpec((1, 256), lambda i: (0, 0)),       # w4 row
            pl.BlockSpec((1, 1), lambda i: (0, 0)),         # b4
        ],
        out_specs=pl.BlockSpec((tm, 1), lambda i: (i, 0)),
        compiler_params=pltpu.CompilerParams(
            dimension_semantics=("parallel",),   # v7x: shard batch tiles over 2 TCs
            vmem_limit_bytes=vmem_limit,
        ),
        cost_estimate=pl.CostEstimate(flops=flops, transcendentals=0,
                                      bytes_accessed=bytes_accessed),
    )(x_p, w1, b1, w2, b2, w3, b3, w4, b4)

    return out[:B]


def init_params(n, key):
    """Deterministic init mirroring torch.nn.Linear default
    (U(-1/sqrt(fan_in), 1/sqrt(fan_in))). Weights stored as (D_in, D_out)."""
    d_in = 2 + 2 * n
    dims = [(d_in, 128), (128, 1024), (1024, 256), (256, 1)]
    params = {}
    keys = jax.random.split(key, 2 * len(dims))
    for i, (fi, fo) in enumerate(dims):
        bound = 1.0 / jnp.sqrt(jnp.float32(fi))
        w = jax.random.uniform(keys[2 * i], (fi, fo), jnp.float32, -bound, bound)
        b = jax.random.uniform(keys[2 * i + 1], (1, fo), jnp.float32, -bound, bound)
        params[f"w{i + 1}"] = w
        params[f"b{i + 1}"] = b
    return params


def net_forward_ref(x, params):
    """Pure-JAX f32 reference matching the PyTorch module exactly."""
    h = jnp.maximum(x @ params["w1"] + params["b1"], 0.0)
    h = jnp.maximum(h @ params["w2"] + params["b2"], 0.0)
    h = jnp.maximum(h @ params["w3"] + params["b3"], 0.0)
    return h @ params["w4"] + params["b4"]


def net_forward_ref_mixed(x, params):
    """Pure-JAX reference with the SAME mixed precision as the kernel
    (f32 fc1, bf16 fc2/fc3 operands + bf16 epilogue, f32 fc4 reduction)."""
    bf = jnp.bfloat16
    h = jnp.maximum(x @ params["w1"] + params["b1"], 0.0)
    h = jnp.dot(h.astype(bf), params["w2"].astype(bf),
                preferred_element_type=jnp.float32)
    h = jnp.maximum(h.astype(bf) + params["b2"].astype(bf), 0)
    h = jnp.dot(h, params["w3"].astype(bf), preferred_element_type=jnp.float32)
    h = jnp.maximum(h.astype(bf) + params["b3"].astype(bf), 0)
    out = jnp.sum(h.astype(jnp.float32) * params["w4"].reshape(1, -1),
                  axis=-1, keepdims=True)
    return out + params["b4"].reshape(1, 1)


if __name__ == "__main__":
    n = 4                       # -> input feature dim = 2 + 2*n = 10
    batch = 8
    key = jax.random.PRNGKey(0)
    k_param, k_x, k_x2 = jax.random.split(key, 3)

    params = init_params(n, k_param)
    x = jax.random.normal(k_x, (batch, 2 + 2 * n), jnp.float32)

    fwd = jax.jit(net_forward)

    # Small-batch check (single 256-row tile, single grid step).
    out = jax.block_until_ready(fwd(x, params))
    assert out.shape == (batch, 1), out.shape
    ref_mp = net_forward_ref_mixed(x, params)
    ref_f32 = net_forward_ref(x, params)
    assert jnp.allclose(out, ref_mp, atol=1e-2, rtol=1e-2), \
        "mismatch vs mixed-precision reference"
    assert jnp.allclose(out, ref_f32, atol=3e-2, rtol=3e-2), \
        "mismatch vs f32 reference"

    # Multi-tile check: 700 rows -> TM=512, two grid steps, padded last tile.
    x2 = jax.random.normal(k_x2, (700, 2 + 2 * n), jnp.float32)
    out2 = jax.block_until_ready(fwd(x2, params))
    assert out2.shape == (700, 1), out2.shape
    assert jnp.allclose(out2, net_forward_ref_mixed(x2, params), atol=1e-2, rtol=1e-2), \
        "mismatch vs mixed-precision reference (multi-tile)"
    assert jnp.allclose(out2, net_forward_ref(x2, params), atol=3e-2, rtol=3e-2), \
        "mismatch vs f32 reference (multi-tile)"

    print("KERNEL_OK")
</pallas_src>

<mosaic_0001>
module attributes {stable_mosaic.version = 11 : i64} {
  func.func @_mlp_kernel(%arg0: i32, %arg1: memref<256x10xf32, #tpu.memory_space<vmem>>, %arg2: memref<10x128xf32, #tpu.memory_space<vmem>>, %arg3: memref<1x128xf32, #tpu.memory_space<vmem>>, %arg4: memref<128x1024xbf16, #tpu.memory_space<vmem>>, %arg5: memref<1x1024xbf16, #tpu.memory_space<vmem>>, %arg6: memref<1024x256xbf16, #tpu.memory_space<vmem>>, %arg7: memref<1x256xbf16, #tpu.memory_space<vmem>>, %arg8: memref<1x256xf32, #tpu.memory_space<vmem>>, %arg9: memref<1x1xf32, #tpu.memory_space<vmem>>, %arg10: memref<256x1xf32, #tpu.memory_space<vmem>>) attributes {dimension_semantics = [#tpu.dimension_semantics<parallel>], iteration_bounds = array<i64: 1>, scalar_prefetch = 0 : i64, scratch_operands = 0 : i64, tpu.core_type = #tpu.core_type<tc>, window_params = [{transform_indices = @transform_0, window_bounds = array<i64: 256, 10>}, {pipeline_mode = #tpu.pipeline_mode<synchronous>, transform_indices = @transform_1, window_bounds = array<i64: 10, 128>}, {pipeline_mode = #tpu.pipeline_mode<synchronous>, transform_indices = @transform_2, window_bounds = array<i64: 1, 128>}, {pipeline_mode = #tpu.pipeline_mode<synchronous>, transform_indices = @transform_3, window_bounds = array<i64: 128, 1024>}, {pipeline_mode = #tpu.pipeline_mode<synchronous>, transform_indices = @transform_4, window_bounds = array<i64: 1, 1024>}, {pipeline_mode = #tpu.pipeline_mode<synchronous>, transform_indices = @transform_5, window_bounds = array<i64: 1024, 256>}, {pipeline_mode = #tpu.pipeline_mode<synchronous>, transform_indices = @transform_6, window_bounds = array<i64: 1, 256>}, {pipeline_mode = #tpu.pipeline_mode<synchronous>, transform_indices = @transform_7, window_bounds = array<i64: 1, 256>}, {pipeline_mode = #tpu.pipeline_mode<synchronous>, transform_indices = @transform_8, window_bounds = array<i64: 1, 1>}, {transform_indices = @transform_9, window_bounds = array<i64: 256, 1>}]} {
    %c0 = arith.constant 0 : index
    %c0_0 = arith.constant 0 : index
    %0 = vector.load %arg1[%c0, %c0_0] : memref<256x10xf32, #tpu.memory_space<vmem>>, vector<256x10xf32>
    %c0_1 = arith.constant 0 : index
    %c0_2 = arith.constant 0 : index
    %1 = vector.load %arg2[%c0_1, %c0_2] : memref<10x128xf32, #tpu.memory_space<vmem>>, vector<10x128xf32>
    %cst = arith.constant dense<0.000000e+00> : vector<256x128xf32>
    %2 = tpu.matmul %0, %1, %cst {dimension_numbers = #tpu.dot_dimension_numbers<[1], [0], [0], [1], [0, 0, 1, 1], [], []>} : vector<256x10xf32>, vector<10x128xf32>, vector<256x128xf32> -> vector<256x128xf32>
    %c0_3 = arith.constant 0 : index
    %c0_4 = arith.constant 0 : index
    %3 = vector.load %arg3[%c0_3, %c0_4] : memref<1x128xf32, #tpu.memory_space<vmem>>, vector<1x128xf32>
    %4 = vector.broadcast %3 : vector<1x128xf32> to vector<256x128xf32>
    %5 = arith.addf %2, %4 : vector<256x128xf32>
    %cst_5 = arith.constant 0.000000e+00 : f32
    %6 = vector.broadcast %cst_5 : f32 to vector<256x128xf32>
    %7 = arith.maximumf %5, %6 : vector<256x128xf32>
    %8 = arith.truncf %7 : vector<256x128xf32> to vector<256x128xbf16>
    %c0_6 = arith.constant 0 : index
    %c0_7 = arith.constant 0 : index
    %9 = vector.load %arg4[%c0_6, %c0_7] : memref<128x1024xbf16, #tpu.memory_space<vmem>>, vector<128x1024xbf16>
    %cst_8 = arith.constant dense<0.000000e+00> : vector<256x1024xf32>
    %10 = tpu.matmul %8, %9, %cst_8 {dimension_numbers = #tpu.dot_dimension_numbers<[1], [0], [0], [1], [0, 0, 1, 1], [], []>} : vector<256x128xbf16>, vector<128x1024xbf16>, vector<256x1024xf32> -> vector<256x1024xf32>
    %11 = arith.truncf %10 : vector<256x1024xf32> to vector<256x1024xbf16>
    %c0_9 = arith.constant 0 : index
    %c0_10 = arith.constant 0 : index
    %12 = vector.load %arg5[%c0_9, %c0_10] : memref<1x1024xbf16, #tpu.memory_space<vmem>>, vector<1x1024xbf16>
    %13 = vector.broadcast %12 : vector<1x1024xbf16> to vector<256x1024xbf16>
    %14 = arith.addf %11, %13 : vector<256x1024xbf16>
    %cst_11 = arith.constant 0.000000e+00 : bf16
    %15 = vector.broadcast %cst_11 : bf16 to vector<256x1024xbf16>
    %16 = arith.maximumf %14, %15 : vector<256x1024xbf16>
    %c0_12 = arith.constant 0 : index
    %c0_13 = arith.constant 0 : index
    %17 = vector.load %arg6[%c0_12, %c0_13] : memref<1024x256xbf16, #tpu.memory_space<vmem>>, vector<1024x256xbf16>
    %cst_14 = arith.constant dense<0.000000e+00> : vector<256x256xf32>
    %18 = tpu.matmul %16, %17, %cst_14 {dimension_numbers = #tpu.dot_dimension_numbers<[1], [0], [0], [1], [0, 0, 1, 1], [], []>} : vector<256x1024xbf16>, vector<1024x256xbf16>, vector<256x256xf32> -> vector<256x256xf32>
    %19 = arith.truncf %18 : vector<256x256xf32> to vector<256x256xbf16>
    %c0_15 = arith.constant 0 : index
    %c0_16 = arith.constant 0 : index
    %20 = vector.load %arg7[%c0_15, %c0_16] : memref<1x256xbf16, #tpu.memory_space<vmem>>, vector<1x256xbf16>
    %21 = vector.broadcast %20 : vector<1x256xbf16> to vector<256x256xbf16>
    %22 = arith.addf %19, %21 : vector<256x256xbf16>
    %cst_17 = arith.constant 0.000000e+00 : bf16
    %23 = vector.broadcast %cst_17 : bf16 to vector<256x256xbf16>
    %24 = arith.maximumf %22, %23 : vector<256x256xbf16>
    %25 = arith.extf %24 : vector<256x256xbf16> to vector<256x256xf32>
    %c0_18 = arith.constant 0 : index
    %c0_19 = arith.constant 0 : index
    %26 = vector.load %arg8[%c0_18, %c0_19] : memref<1x256xf32, #tpu.memory_space<vmem>>, vector<1x256xf32>
    %27 = vector.broadcast %26 : vector<1x256xf32> to vector<256x256xf32>
    %28 = arith.mulf %25, %27 : vector<256x256xf32>
    %cst_20 = arith.constant dense<0.000000e+00> : vector<256xf32>
    %29 = vector.multi_reduction <add>, %28, %cst_20 [1] : vector<256x256xf32> to vector<256xf32>
    %30 = vector.shape_cast %29 : vector<256xf32> to vector<256x1xf32>
    %c0_21 = arith.constant 0 : index
    %c0_22 = arith.constant 0 : index
    %31 = vector.load %arg9[%c0_21, %c0_22] : memref<1x1xf32, #tpu.memory_space<vmem>>, vector<1x1xf32>
    %32 = vector.broadcast %31 : vector<1x1xf32> to vector<256x1xf32>
    %33 = arith.addf %30, %32 : vector<256x1xf32>
    %c0_23 = arith.constant 0 : index
    %c0_24 = arith.constant 0 : index
    %34 = vector.load %arg10[%c0_23, %c0_24] : memref<256x1xf32, #tpu.memory_space<vmem>>, vector<256x1xf32>
    tpu.vector_store %arg10[%c0_23, %c0_24], %33 {strides = array<i32>} : memref<256x1xf32, #tpu.memory_space<vmem>>, vector<256x1xf32>,
    return
  }
  func.func @transform_0(%arg0: i32) -> (i32, i32) {
    %c0_i32 = arith.constant 0 : i32
    %c0_i32_0 = arith.constant 0 : i32
    return %arg0, %c0_i32 : i32, i32
  }
  func.func @transform_1(%arg0: i32) -> (i32, i32) {
    %c0_i32 = arith.constant 0 : i32
    %c0_i32_0 = arith.constant 0 : i32
    %c0_i32_1 = arith.constant 0 : i32
    return %c0_i32, %c0_i32_0 : i32, i32
  }
  func.func @transform_2(%arg0: i32) -> (i32, i32) {
    %c0_i32 = arith.constant 0 : i32
    %c0_i32_0 = arith.constant 0 : i32
    %c0_i32_1 = arith.constant 0 : i32
    return %c0_i32, %c0_i32_0 : i32, i32
  }
  func.func @transform_3(%arg0: i32) -> (i32, i32) {
    %c0_i32 = arith.constant 0 : i32
    %c0_i32_0 = arith.constant 0 : i32
    %c0_i32_1 = arith.constant 0 : i32
    return %c0_i32, %c0_i32_0 : i32, i32
  }
  func.func @transform_4(%arg0: i32) -> (i32, i32) {
    %c0_i32 = arith.constant 0 : i32
    %c0_i32_0 = arith.constant 0 : i32
    %c0_i32_1 = arith.constant 0 : i32
    return %c0_i32, %c0_i32_0 : i32, i32
  }
  func.func @transform_5(%arg0: i32) -> (i32, i32) {
    %c0_i32 = arith.constant 0 : i32
    %c0_i32_0 = arith.constant 0 : i32
    %c0_i32_1 = arith.constant 0 : i32
    return %c0_i32, %c0_i32_0 : i32, i32
  }
  func.func @transform_6(%arg0: i32) -> (i32, i32) {
    %c0_i32 = arith.constant 0 : i32
    %c0_i32_0 = arith.constant 0 : i32
    %c0_i32_1 = arith.constant 0 : i32
    return %c0_i32, %c0_i32_0 : i32, i32
  }
  func.func @transform_7(%arg0: i32) -> (i32, i32) {
    %c0_i32 = arith.constant 0 : i32
    %c0_i32_0 = arith.constant 0 : i32
    %c0_i32_1 = arith.constant 0 : i32
    return %c0_i32, %c0_i32_0 : i32, i32
  }
  func.func @transform_8(%arg0: i32) -> (i32, i32) {
    %c0_i32 = arith.constant 0 : i32
    %c0_i32_0 = arith.constant 0 : i32
    %c0_i32_1 = arith.constant 0 : i32
    return %c0_i32, %c0_i32_0 : i32, i32
  }
  func.func @transform_9(%arg0: i32) -> (i32, i32) {
    %c0_i32 = arith.constant 0 : i32
    %c0_i32_0 = arith.constant 0 : i32
    return %arg0, %c0_i32 : i32, i32
  }
}

</mosaic_0001>

<bundles_post_ra>
// kernel: net_forward.1
= control target key start
LH: loop header
LB: loop body
LE: loop exit
PB: predicated region body
PF: predicated region fallthrough
CT: control target
= control target key end

     0   :  { %vm173_vm0 = vcmask 1041408   ;;  %vm76_vm1 = vcmask 80896   ;;  %vm4835_vm2 = vmmov 1   ;;  %vm4046_vm4 = vcmask 7168   ;;  %s6836_s1 = inlined_call_operand.vmem [shape: f32[10,128], index: 1, kind: input, shape index: {}]   ;;  %s6837_s0 = inlined_call_operand.vmem [shape: f32[256,10], index: 0, kind: input, shape index: {}]   ;;  %s6838_s3 = inlined_call_operand.vmem [shape: bf16[128,1024], index: 3, kind: input, shape index: {}]   ;;  %s6839_s5 = inlined_call_operand.vmem [shape: bf16[1024,256], index: 5, kind: input, shape index: {}]   ;;  %s6840_s2 = inlined_call_operand.vmem [shape: f32[1,128], index: 2, kind: input, shape index: {}]   ;;  %s6841_s4 = inlined_call_operand.vmem [shape: bf16[1,1024], index: 4, kind: input, shape index: {}]   ;;  %s6842_s6 = inlined_call_operand.vmem [shape: bf16[1,256], index: 6, kind: input, shape index: {}]   ;;  %s6843_s7 = inlined_call_operand.vmem [shape: f32[1,256], index: 7, kind: input, shape index: {}]   ;;  %s6844_s8 = inlined_call_operand.<no memory space> [shape: f32[1,1], index: 8, kind: input, shape index: {}]   ;;  %s6845_s9 = inlined_call_operand.vmem [shape: f32[256,1], index: 9, kind: output, shape index: {}]  }
   0x1   :  { %v67_v0 = vld [vmem:[%s6836_s1] sm:$0xff]  ;;  %v68_v1 = vld [vmem:[%s6836_s1 + $0x8] sm:$0x3]  ;;  %vm4398_vm3 = vmpackc.low %vm173_vm0, %vm4835_vm2 }
   0x2   :  { %v4397_v2 = vpack.c.bf16 %v68_v1, %v67_v0  ;;  %v35_v3 = vld [vmem:[%s6837_s0] sm:$0xff]  ;;  %v36_v4 = vld [vmem:[%s6837_s0 + $0x8] sm:$0xff]  ;;  %v37_v5 = vld [vmem:[%s6837_s0 + $0x10] sm:$0xff] }
   0x3   :  { %4349 = vmatprep.mubr.msk.f32.mxu0 %vm76_vm1, %v35_v3  ;;  %v38_v6 = vld [vmem:[%s6837_s0 + $0x18] sm:$0xff]  ;;  %v39_v7 = vld [vmem:[%s6837_s0 + $0x20] sm:$0xff]  ;;  %v40_v8 = vld [vmem:[%s6837_s0 + $0x28] sm:$0xff] }
   0x4   :  { %4399 = vmatprep.subr.msk.bf16.mxu0 %vm4398_vm3, %v4397_v2  ;;  %v450_v9 = vld [vmem:[%s6838_s3] sm:$0xff]  ;;  %v41_v13 = vld [vmem:[%s6837_s0 + $0x30] sm:$0xff]  ;;  %v42_v22 = vld [vmem:[%s6837_s0 + $0x38] sm:$0xff] }
   0x5   :  { %4402 = vmatpush3.bf16.msk.msra.mxu0 %vm4398_vm3, %v4397_v2  ;;  %v454_v10 = vld [vmem:[%s6838_s3 + $0x20] sm:$0xff]  ;;  %v452_v19 = vld [vmem:[%s6838_s3 + $0x10] sm:$0xff]  ;;  %v44_v35 = vld [vmem:[%s6837_s0 + $0x48] sm:$0xff] }
   0x6   :  { %v458_v11 = vld [vmem:[%s6838_s3 + $0x40] sm:$0xff]  ;;  %v4117_v14 = vcombine.low %v450_v9, %v454_v10  ;;  %v4118_v15 = vcombine.high %v450_v9, %v454_v10  ;;  %v456_v20 = vld [vmem:[%s6838_s3 + $0x30] sm:$0xff]  ;;  %v46_v45 = vld [vmem:[%s6837_s0 + $0x58] sm:$0xff] }
   0x7   :  { %v462_v12 = vld [vmem:[%s6838_s3 + $0x60] sm:$0xff]  ;;  %v460_v21 = vld [vmem:[%s6838_s3 + $0x50] sm:$0xff]  ;;  %v4122_v24 = vcombine.high %v452_v19, %v456_v20  ;;  %v4121_v25 = vcombine.low %v452_v19, %v456_v20  ;;  %v48_v55 = vld [vmem:[%s6837_s0 + $0x68] sm:$0xff] }
   0x8   :  { %4350 = vmatmul.mubr.msk.f32.vlgmr.msra.gmra.mrb[0].mxu0 %vm76_vm1, %v36_v4  ;;  %v4126_v16 = vcombine.high %v458_v11, %v462_v12  ;;  %v466_v17 = vld [vmem:[%s6838_s3 + $0x80] sm:$0xff]  ;;  %834 = vmatprep.subr.bf16.mxu0 %v4118_v15  ;;  %v4125_v23 = vcombine.low %v458_v11, %v462_v12  ;;  %v464_v26 = vld [vmem:[%s6838_s3 + $0x70] sm:$0xff]  ;;  %v50_v1 = vld [vmem:[%s6837_s0 + $0x78] sm:$0xff] }
   0x9   :  { %4352 = vmatprep.mubr.msk.f32.mxu0 %vm76_vm1, %v37_v5  ;;  %v470_v18 = vld [vmem:[%s6838_s3 + $0xa0] sm:$0xff]  ;;  %835 = vmatpush1.bf16.msra.mxu0 %v4117_v14  ;;  %v4130_v30 = vcombine.high %v460_v21, %v464_v26  ;;  %v468_v32 = vld [vmem:[%s6838_s3 + $0x90] sm:$0xff]  ;;  %v4129_v34 = vcombine.low %v460_v21, %v464_v26  ;;  %v52_v9 = vld [vmem:[%s6837_s0 + $0x88] sm:$0xff] }
   0xa   :  { %v43_v27 = vld [vmem:[%s6837_s0 + $0x40] sm:$0xff]  ;;  %836 = vmatprep.subr.bf16.mxu0 %v4126_v16  ;;  %v4134_v28 = vcombine.high %v466_v17, %v470_v18  ;;  %1220 = vmatprep.subr.bf16.mxu1 %v4122_v24  ;;  %v472_v33 = vld [vmem:[%s6838_s3 + $0xb0] sm:$0xff]  ;;  %v4133_v36 = vcombine.low %v466_v17, %v470_v18  ;;  %v56_v16 = vld [vmem:[%s6837_s0 + $0xa8] sm:$0xff] }
   0xb   :  { %v474_v29 = vld [vmem:[%s6838_s3 + $0xc0] sm:$0xff]  ;;  %1221 = vmatpush1.bf16.msra.mxu1 %v4121_v25  ;;  %v45_v37 = vld [vmem:[%s6837_s0 + $0x50] sm:$0xff]  ;;  %v4138_v40 = vcombine.high %v468_v32, %v472_v33  ;;  %v4137_v44 = vcombine.low %v468_v32, %v472_v33  ;;  %v58_v18 = vld [vmem:[%s6837_s0 + $0xb8] sm:$0xff] }
   0xc   :  { %4353 = vmatmul.mubr.msk.f32.gmra.mrb[2].mxu0 %vm76_vm1, %v38_v6  ;;  %v478_v31 = vld [vmem:[%s6838_s3 + $0xe0] sm:$0xff]  ;;  %1222 = vmatprep.subr.bf16.mxu1 %v4130_v30  ;;  %v476_v42 = vld [vmem:[%s6838_s3 + $0xd0] sm:$0xff]  ;;  %v60_v20 = vld [vmem:[%s6837_s0 + $0xc8] sm:$0xff] }
   0xd   :  { %4355 = vmatprep.mubr.msk.f32.mxu0 %vm76_vm1, %v39_v7  ;;  %837 = vmatpush1.bf16.msra.mxu0 %v4125_v23  ;;  %v4142_v38 = vcombine.high %v474_v29, %v478_v31  ;;  %v482_v39 = vld [vmem:[%s6838_s3 + $0x100] sm:$0xff]  ;;  %v480_v43 = vld [vmem:[%s6838_s3 + $0xf0] sm:$0xff]  ;;  %v4141_v46 = vcombine.low %v474_v29, %v478_v31  ;;  %v64_v24 = vld [vmem:[%s6837_s0 + $0xe8] sm:$0xff] }
   0xe   :  { %838 = vmatprep.subr.bf16.mxu0 %v4134_v28  ;;  %v486_v41 = vld [vmem:[%s6838_s3 + $0x120] sm:$0xff]  ;;  %v4146_v50 = vcombine.high %v476_v42, %v480_v43  ;;  %v484_v52 = vld [vmem:[%s6838_s3 + $0x110] sm:$0xff]  ;;  %v4145_v54 = vcombine.low %v476_v42, %v480_v43  ;;  %v66_v26 = vld [vmem:[%s6837_s0 + $0xf8] sm:$0xff] }
   0xf   :  { %1223 = vmatpush1.bf16.msra.mxu1 %v4129_v34  ;;  %v47_v47 = vld [vmem:[%s6837_s0 + $0x60] sm:$0xff]  ;;  %v4150_v48 = vcombine.high %v482_v39, %v486_v41  ;;  %v488_v53 = vld [vmem:[%s6838_s3 + $0x130] sm:$0xff]  ;;  %v4149_v56 = vcombine.low %v482_v39, %v486_v41 }
  0x10   :  { %4356 = vmatmul.mubr.msk.f32.gmra.mrb[4].mxu0 %vm76_vm1, %v40_v8  ;;  %v490_v49 = vld [vmem:[%s6838_s3 + $0x140] sm:$0xff]  ;;  %1224 = vmatprep.subr.bf16.mxu1 %v4138_v40  ;;  %v49_v57 = vld [vmem:[%s6837_s0 + $0x70] sm:$0xff]  ;;  %v4154_v60 = vcombine.high %v484_v52, %v488_v53  ;;  %v4153_v0 = vcombine.low %v484_v52, %v488_v53  ;;  %v467_v53 = vld [vmem:[%s6838_s3 + $0x88] sm:$0xff] }
  0x11   :  { %4358 = vmatprep.mubr.msk.f32.mxu0 %vm76_vm1, %v41_v13  ;;  %839 = vmatpush1.bf16.msra.mxu0 %v4133_v36  ;;  %v494_v51 = vld [vmem:[%s6838_s3 + $0x160] sm:$0xff]  ;;  %v492_v62 = vld [vmem:[%s6838_s3 + $0x150] sm:$0xff]  ;;  %v54_v13 = vld [vmem:[%s6837_s0 + $0x98] sm:$0xff] }
  0x12   :  { %840 = vmatprep.subr.bf16.mxu0 %v4142_v38  ;;  %v4158_v58 = vcombine.high %v490_v49, %v494_v51  ;;  %v498_v59 = vld [vmem:[%s6838_s3 + $0x180] sm:$0xff]  ;;  %v496_v63 = vld [vmem:[%s6838_s3 + $0x170] sm:$0xff]  ;;  %v4157_v2 = vcombine.low %v490_v49, %v494_v51  ;;  %v451_v36 = vld [vmem:[%s6838_s3 + $0x8] sm:$0xff] }
  0x13   :  { %1225 = vmatpush1.bf16.msra.mxu1 %v4137_v44  ;;  %v502_v61 = vld [vmem:[%s6838_s3 + $0x1a0] sm:$0xff]  ;;  %v4162_v5 = vcombine.high %v492_v62, %v496_v63  ;;  %v4161_v8 = vcombine.low %v492_v62, %v496_v63  ;;  %v53_v11 = vld [vmem:[%s6837_s0 + $0x90] sm:$0xff] }
  0x14   :  { %4359 = vmatmul.mubr.msk.f32.gmra.mrb[6].mxu0 %vm76_vm1, %v42_v22  ;;  %1226 = vmatprep.subr.bf16.mxu1 %v4146_v50  ;;  %v51_v3 = vld [vmem:[%s6837_s0 + $0x80] sm:$0xff]  ;;  %v4166_v4 = vcombine.high %v498_v59, %v502_v61  ;;  %v4165_v10 = vcombine.low %v498_v59, %v502_v61  ;;  %v57_v17 = vld [vmem:[%s6837_s0 + $0xb0] sm:$0xff]  ;;  %v62_v22 = vld [vmem:[%s6837_s0 + $0xd8] sm:$0xff] }
  0x15   :  { %4361 = vmatprep.mubr.msk.f32.mxu0 %vm76_vm1, %v43_v27  ;;  %841 = vmatpush1.bf16.msra.mxu0 %v4141_v46  ;;  %v506_v6 = vld [vmem:[%s6838_s3 + $0x1c0] sm:$0xff]  ;;  %v61_v21 = vld [vmem:[%s6837_s0 + $0xd0] sm:$0xff]  ;;  %v463_v46 = vld [vmem:[%s6838_s3 + $0x68] sm:$0xff] }
  0x16   :  { %842 = vmatprep.subr.bf16.mxu0 %v4150_v48  ;;  %v510_v7 = vld [vmem:[%s6838_s3 + $0x1e0] sm:$0xff]  ;;  %v65_v25 = vld [vmem:[%s6837_s0 + $0xf0] sm:$0xff] }
  0x17   :  { %1227 = vmatpush1.bf16.msra.mxu1 %v4145_v54  ;;  %v4174_v12 = vcombine.high %v506_v6, %v510_v7  ;;  %v4173_v14 = vcombine.low %v506_v6, %v510_v7  ;;  %v55_v15 = vld [vmem:[%s6837_s0 + $0xa0] sm:$0xff]  ;;  %v500_v27 = vld [vmem:[%s6838_s3 + $0x190] sm:$0xff]  ;;  %v471_v54 = vld [vmem:[%s6838_s3 + $0xa8] sm:$0xff] }
  0x18   :  { %4362 = vmatmul.mubr.msk.f32.gmra.mrb[8].mxu0 %vm76_vm1, %v44_v35  ;;  %1228 = vmatprep.subr.bf16.mxu1 %v4154_v60  ;;  %v59_v19 = vld [vmem:[%s6837_s0 + $0xc0] sm:$0xff]  ;;  %v504_v28 = vld [vmem:[%s6838_s3 + $0x1b0] sm:$0xff]  ;;  %v6870_v35 = vmov 0   ;;  %v475_v6 = vld [vmem:[%s6838_s3 + $0xc8] sm:$0xff] }
  0x19   :  { %4364 = vmatprep.mubr.msk.f32.mxu0 %vm76_vm1, %v45_v37  ;;  %843 = vmatpush1.bf16.msra.mxu0 %v4149_v56  ;;  %v63_v23 = vld [vmem:[%s6837_s0 + $0xe0] sm:$0xff]  ;;  %v4170_v29 = vcombine.high %v500_v27, %v504_v28  ;;  %v4169_v30 = vcombine.low %v500_v27, %v504_v28  ;;  %v508_v31 = vld [vmem:[%s6838_s3 + $0x1d0] sm:$0xff]  ;;  %v455_v37 = vld [vmem:[%s6838_s3 + $0x28] sm:$0xff] }
  0x1a   :  { %844 = vmatprep.subr.bf16.mxu0 %v4158_v58  ;;  %v512_v32 = vld [vmem:[%s6838_s3 + $0x1f0] sm:$0xff]  ;;  %1252 = vmatprep.mubr.bf16.mxu1 %v6870_v35  ;;  %v4119_v38 = vcombine.low %v451_v36, %v455_v37  ;;  %v4120_v39 = vcombine.high %v451_v36, %v455_v37  ;;  %v4632_v40 = vld [vmem:[%s6839_s5 + $0x4] ss:$8 sps:$4 sm:$0xff]   ;;  %v5132_v41 = vld [vmem:[%s6840_s2] ss:$0 sm:$0xff] }
  0x1b   :  { %1229 = vmatpush1.bf16.msra.mxu1 %v4153_v0  ;;  %v4178_v33 = vcombine.high %v508_v31, %v512_v32  ;;  %v4177_v34 = vcombine.low %v508_v31, %v512_v32  ;;  %v4635_v62 = vld [vmem:[%s6839_s5 + $0x14] ss:$8 sps:$4 sm:$0xff]   ;;  %v479_v7 = vld [vmem:[%s6838_s3 + $0xe8] sm:$0xff]  ;;  %v4639_v32 = vld [vmem:[%s6839_s5 + $0x30] ss:$8 sps:$4 sm:$0xff]  }
  0x1c   :  { %4365 = vmatmul.mubr.msk.f32.gmra.mrb[10].mxu0 %vm76_vm1, %v46_v45  ;;  %1230 = vmatprep.subr.bf16.mxu1 %v4162_v5  ;;  %v459_v45 = vld [vmem:[%s6838_s3 + $0x48] sm:$0xff]  ;;  %v4136_v5 = vcombine.high %v467_v53, %v471_v54 }
  0x1d   :  { %4367 = vmatprep.mubr.msk.f32.mxu0 %vm76_vm1, %v47_v47  ;;  %845 = vmatpush1.bf16.msra.mxu0 %v4157_v2  ;;  %v4128_v58 = vcombine.high %v459_v45, %v463_v46  ;;  %v4633_v2 = vld [vmem:[%s6839_s5 + $0x10] ss:$8 sps:$4 sm:$0xff]   ;;  %v491_v36 = vld [vmem:[%s6838_s3 + $0x148] sm:$0xff] }
  0x1e   :  { %846 = vmatprep.subr.bf16.mxu0 %v4166_v4  ;;  %v495_v37 = vld [vmem:[%s6838_s3 + $0x168] sm:$0xff] }
  0x1f   :  { %1231 = vmatpush1.bf16.msra.mxu1 %v4161_v8 }
  0x20   :  { %4368 = vmatmul.mubr.msk.f32.gmra.mrb[12].mxu0 %vm76_vm1, %v48_v55  ;;  %1232 = vmatprep.subr.bf16.mxu1 %v4170_v29  ;;  %v4630_v55 = vld [vmem:[%s6839_s5] ss:$8 sps:$4 sm:$0xff]   ;;  %v4143_v29 = vcombine.low %v475_v6, %v479_v7 }
  0x21   :  { %4370 = vmatprep.mubr.msk.f32.mxu0 %vm76_vm1, %v49_v57  ;;  %847 = vmatpush1.bf16.msra.mxu0 %v4165_v10 }
  0x22   :  { %848 = vmatprep.subr.bf16.mxu0 %v4174_v12 }
  0x23   :  { %1233 = vmatpush1.bf16.msra.mxu1 %v4169_v30 }
  0x24   :  { %4371 = vmatmul.mubr.msk.f32.gmra.mrb[14].mxu0 %vm76_vm1, %v50_v1  ;;  %1234 = vmatprep.subr.bf16.mxu1 %v4178_v33  ;;  %v4127_v1 = vcombine.low %v459_v45, %v463_v46  ;;  %v4160_v46 = vcombine.high %v491_v36, %v495_v37 }
  0x25   :  { %4373 = vmatprep.mubr.msk.f32.mxu0 %vm76_vm1, %v51_v3  ;;  %849 = vmatpush1.bf16.msra.mxu0 %v4173_v14  ;;  %v4636_v14 = vld [vmem:[%s6839_s5 + $0x20] ss:$8 sps:$4 sm:$0xff]  }
  0x26   :  { %1027 = vmatprep.subr.bf16.mxu0 %v4120_v39 }
  0x27   :  { %1235 = vmatpush1.bf16.msra.mxu1 %v4177_v34 }
  0x28   :  { %4374 = vmatmul.mubr.msk.f32.gmra.mrb[16].mxu0 %vm76_vm1, %v52_v9  ;;  %2865 = vmatprep.subr.bf16.mxu1 %v4632_v40 }
  0x29   :  { %4376 = vmatprep.mubr.msk.f32.mxu0 %vm76_vm1, %v53_v11  ;;  %v4638_v11 = vld [vmem:[%s6839_s5 + $0x24] ss:$8 sps:$4 sm:$0xff]  }
  0x2c   :  { %4377 = vmatmul.mubr.msk.f32.gmra.mrb[18].mxu0 %vm76_vm1, %v54_v13 }
  0x2d   :  { %4379 = vmatprep.mubr.msk.f32.mxu0 %vm76_vm1, %v55_v15 }
  0x30   :  { %4380 = vmatmul.mubr.msk.f32.gmra.mrb[20].mxu0 %vm76_vm1, %v56_v16 }
  0x31   :  { %4382 = vmatprep.mubr.msk.f32.mxu0 %vm76_vm1, %v57_v17  ;;  %v4135_v17 = vcombine.low %v467_v53, %v471_v54 }
  0x34   :  { %4383 = vmatmul.mubr.msk.f32.gmra.mrb[22].mxu0 %vm76_vm1, %v58_v18 }
  0x35   :  { %4385 = vmatprep.mubr.msk.f32.mxu0 %vm76_vm1, %v59_v19  ;;  %v4144_v19 = vcombine.high %v475_v6, %v479_v7 }
  0x38   :  { %4386 = vmatmul.mubr.msk.f32.gmra.mrb[24].mxu0 %vm76_vm1, %v60_v20 }
  0x39   :  { %4388 = vmatprep.mubr.msk.f32.mxu0 %vm76_vm1, %v61_v21 }
  0x3c   :  { %4389 = vmatmul.mubr.msk.f32.gmra.mrb[26].mxu0 %vm76_vm1, %v62_v22  ;;  %v483_v22 = vld [vmem:[%s6838_s3 + $0x108] sm:$0xff] }
  0x3d   :  { %4391 = vmatprep.mubr.msk.f32.mxu0 %vm76_vm1, %v63_v23  ;;  %v487_v23 = vld [vmem:[%s6838_s3 + $0x128] sm:$0xff] }
  0x3e   :  { %v4152_v31 = vcombine.high %v483_v22, %v487_v23 }
  0x40   :  { %4392 = vmatmul.mubr.msk.f32.gmra.mrb[28].mxu0 %vm76_vm1, %v64_v24  ;;  %v4641_v24 = vld [vmem:[%s6839_s5 + $0x34] ss:$8 sps:$4 sm:$0xff]  }
  0x41   :  { %4394 = vmatprep.mubr.msk.f32.mxu0 %vm76_vm1, %v65_v25 }
  0x44   :  { %4395 = vmatmul.mubr.msk.f32.gmra.mrb[30].mxu0 %vm76_vm1, %v66_v26 }
  0x45   :  { %866 = vmatprep.mubr.bf16.mxu0 %v6870_v35 }
  0xdb   :  { %v4351_v42 = vpop.f32.mrb[0].mxu0 }
  0xdc   :  { %v249_v43 = vadd.f32 %v4351_v42, %v5132_v41  ;;  %v243_v44 = vpop.f32.mrb[1].mxu0 }
  0xdd   :  { %v244_v47 = vadd.f32 %v5132_v41, %v243_v44  ;;  %v4644_v44 = vld [vmem:[%s6839_s5 + $0x44] ss:$8 sps:$4 sm:$0xff]  }
  0xde   :  { %v403_v48 = vmax.f32 %v249_v43, 0.0  ;;  %v4151_v43 = vcombine.low %v483_v22, %v487_v23 }
  0xdf   :  { %v402_v49 = vmax.f32 %v244_v47, 0.0  ;;  %v4354_v50 = vpop.f32.mrb[2].mxu0  ;;  %v4642_v47 = vld [vmem:[%s6839_s5 + $0x40] ss:$8 sps:$4 sm:$0xff]  }
  0xe0   :  { %v259_v51 = vadd.f32 %v4354_v50, %v5132_v41  ;;  %v253_v52 = vpop.f32.mrb[3].mxu0  ;;  %v499_v50 = vld [vmem:[%s6838_s3 + $0x188] sm:$0xff] }
  0xe1   :  { %v5152_v56 = vpack.c.bf16 %v403_v48, %v402_v49  ;;  %v254_v57 = vadd.f32 %v5132_v41, %v253_v52  ;;  %v4647_v52 = vld [vmem:[%s6839_s5 + $0x54] ss:$8 sps:$4 sm:$0xff]  }
  0xe2   :  { %v405_v59 = vmax.f32 %v259_v51, 0.0  ;;  %v503_v51 = vld [vmem:[%s6838_s3 + $0x1a8] sm:$0xff] }
  0xe3   :  { %v404_v60 = vmax.f32 %v254_v57, 0.0  ;;  %867 = vmatmul.mubr.bf16.vlgmr.msra.gmra.mrb[32].mxu0 %v5152_v56  ;;  %1253 = vmatmul.mubr.bf16.vlgmr.msra.gmra.mrb[0].mxu1 %v5152_v56  ;;  %v4357_v61 = vpop.f32.mrb[4].mxu0  ;;  %v5238_v57 = vld [vmem:[%s6838_s3 + $0x18] sm:$0xff] }
  0xe4   :  { %1028 = vmatpush1.bf16.msra.mxu0 %v4119_v38  ;;  %v269_v63 = vadd.f32 %v4357_v61, %v5132_v41  ;;  %876 = vmatprep.mubr.bf16.mxu0 %v6870_v35  ;;  %v263_v0 = vpop.f32.mrb[5].mxu0 }
  0xe5   :  { %v5165_v3 = vpack.c.bf16 %v405_v59, %v404_v60  ;;  %1262 = vmatprep.mubr.bf16.mxu1 %v6870_v35  ;;  %v264_v4 = vadd.f32 %v5132_v41, %v263_v0  ;;  %1029 = vmatprep.subr.bf16.mxu0 %v4128_v58  ;;  %v5243_v58 = vld [vmem:[%s6838_s3 + $0x38] sm:$0xff] }
  0xe6   :  { %v407_v8 = vmax.f32 %v269_v63, 0.0  ;;  %2866 = vmatpush1.bf16.msra.mxu1 %v4630_v55  ;;  %v4159_v55 = vcombine.low %v491_v36, %v495_v37  ;;  %v4123_v61 = vcombine.low %v5238_v57, %v5243_v58  ;;  %v4168_v63 = vcombine.high %v499_v50, %v503_v51  ;;  %v4645_v0 = vld [vmem:[%s6839_s5 + $0x50] ss:$8 sps:$4 sm:$0xff]   ;;  %v4654_v37 = vld [vmem:[%s6839_s5 + $0x80] ss:$8 sps:$4 sm:$0xff]  }
  0xe7   :  { %v406_v9 = vmax.f32 %v264_v4, 0.0  ;;  %v4360_v10 = vpop.f32.mrb[6].mxu0  ;;  %2867 = vmatprep.subr.bf16.mxu1 %v4635_v62  ;;  %v507_v4 = vld [vmem:[%s6838_s3 + $0x1c8] sm:$0xff] }
  0xe8   :  { %v279_v12 = vadd.f32 %v4360_v10, %v5132_v41  ;;  %v273_v13 = vpop.f32.mrb[7].mxu0  ;;  %1030 = vmatpush1.bf16.msra.mxu0 %v4127_v1  ;;  %v4167_v10 = vcombine.low %v499_v50, %v503_v51 }
  0xe9   :  { %v5182_v15 = vpack.c.bf16 %v407_v8, %v406_v9  ;;  %v274_v16 = vadd.f32 %v5132_v41, %v273_v13  ;;  %1031 = vmatprep.subr.bf16.mxu0 %v4136_v5  ;;  %v511_v5 = vld [vmem:[%s6838_s3 + $0x1e8] sm:$0xff] }
  0xea   :  { %v409_v18 = vmax.f32 %v279_v12, 0.0  ;;  %2868 = vmatpush1.bf16.msra.mxu1 %v4633_v2  ;;  %v4176_v13 = vcombine.high %v507_v4, %v511_v5  ;;  %v4175_v23 = vcombine.low %v507_v4, %v511_v5 }
  0xeb   :  { %877 = vmatmul.mubr.bf16.gmra.mrb[36].mxu0 %v5165_v3  ;;  %1263 = vmatmul.mubr.bf16.gmra.mrb[4].mxu1 %v5165_v3  ;;  %v408_v20 = vmax.f32 %v274_v16, 0.0  ;;  %v4363_v21 = vpop.f32.mrb[8].mxu0 }
  0xec   :  { %886 = vmatprep.mubr.bf16.mxu0 %v6870_v35  ;;  %1272 = vmatprep.mubr.bf16.mxu1 %v6870_v35  ;;  %v289_v25 = vadd.f32 %v4363_v21, %v5132_v41  ;;  %v283_v26 = vpop.f32.mrb[9].mxu0 }
  0xed   :  { %v5199_v27 = vpack.c.bf16 %v409_v18, %v408_v20  ;;  %v284_v28 = vadd.f32 %v5132_v41, %v283_v26  ;;  %1032 = vmatpush1.bf16.msra.mxu0 %v4135_v17  ;;  %2869 = vmatprep.subr.bf16.mxu1 %v4638_v11  ;;  %v4650_v11 = vld [vmem:[%s6839_s5 + $0x64] ss:$8 sps:$4 sm:$0xff]   ;;  %v4653_v18 = vld [vmem:[%s6839_s5 + $0x74] ss:$8 sps:$4 sm:$0xff]   ;;  %v4124_v26 = vcombine.high %v5238_v57, %v5243_v58 }
  0xee   :  { %v411_v30 = vmax.f32 %v289_v25, 0.0  ;;  %1033 = vmatprep.subr.bf16.mxu0 %v4144_v19  ;;  %2870 = vmatpush1.bf16.msra.mxu1 %v4636_v14  ;;  %v4648_v14 = vld [vmem:[%s6839_s5 + $0x60] ss:$8 sps:$4 sm:$0xff]   ;;  %v4651_v25 = vld [vmem:[%s6839_s5 + $0x70] ss:$8 sps:$4 sm:$0xff]  }
  0xef   :  { %v410_v33 = vmax.f32 %v284_v28, 0.0  ;;  %v4366_v34 = vpop.f32.mrb[10].mxu0  ;;  %2871 = vmatprep.subr.bf16.mxu1 %v4641_v24  ;;  %v485_v57 = vld [vmem:[%s6838_s3 + $0x118] sm:$0xff] }
  0xf0   :  { %v299_v38 = vadd.f32 %v4366_v34, %v5132_v41  ;;  %v293_v39 = vpop.f32.mrb[11].mxu0  ;;  %v4656_v34 = vld [vmem:[%s6839_s5 + $0x84] ss:$8 sps:$4 sm:$0xff]   ;;  %v489_v58 = vld [vmem:[%s6838_s3 + $0x138] sm:$0xff] }
  0xf1   :  { %v5212_v40 = vpack.c.bf16 %v411_v30, %v410_v33  ;;  %v294_v42 = vadd.f32 %v5132_v41, %v293_v39  ;;  %1034 = vmatpush1.bf16.msra.mxu0 %v4143_v29 }
  0xf2   :  { %v413_v45 = vmax.f32 %v299_v38, 0.0  ;;  %1035 = vmatprep.subr.bf16.mxu0 %v4152_v31  ;;  %2872 = vmatpush1.bf16.msra.mxu1 %v4639_v32 }
  0xf3   :  { %887 = vmatmul.mubr.bf16.gmra.mrb[40].mxu0 %v5182_v15  ;;  %1273 = vmatmul.mubr.bf16.gmra.mrb[8].mxu1 %v5182_v15  ;;  %v412_v48 = vmax.f32 %v294_v42, 0.0  ;;  %v4369_v49 = vpop.f32.mrb[12].mxu0  ;;  %v4659_v42 = vld [vmem:[%s6839_s5 + $0x94] ss:$8 sps:$4 sm:$0xff]  }
  0xf4   :  { %896 = vmatprep.mubr.bf16.mxu0 %v6870_v35  ;;  %1282 = vmatprep.mubr.bf16.mxu1 %v6870_v35  ;;  %v309_v53 = vadd.f32 %v4369_v49, %v5132_v41  ;;  %v303_v54 = vpop.f32.mrb[13].mxu0 }
  0xf5   :  { %v5245_v59 = vpack.c.bf16 %v413_v45, %v412_v48  ;;  %v304_v60 = vadd.f32 %v5132_v41, %v303_v54  ;;  %1036 = vmatpush1.bf16.msra.mxu0 %v4151_v43  ;;  %2873 = vmatprep.subr.bf16.mxu1 %v4644_v44  ;;  %v4657_v48 = vld [vmem:[%s6839_s5 + $0x90] ss:$8 sps:$4 sm:$0xff]  }
  0xf6   :  { %v415_v62 = vmax.f32 %v309_v53, 0.0  ;;  %1037 = vmatprep.subr.bf16.mxu0 %v4160_v46  ;;  %2874 = vmatpush1.bf16.msra.mxu1 %v4642_v47 }
  0xf7   :  { %v414_v1 = vmax.f32 %v304_v60, 0.0  ;;  %v4372_v2 = vpop.f32.mrb[14].mxu0  ;;  %2875 = vmatprep.subr.bf16.mxu1 %v4647_v52 }
  0xf8   :  { %v319_v6 = vadd.f32 %v4372_v2, %v5132_v41  ;;  %v313_v7 = vpop.f32.mrb[15].mxu0 }
  0xf9   :  { %v5260_v8 = vpack.c.bf16 %v415_v62, %v414_v1  ;;  %v314_v9 = vadd.f32 %v5132_v41, %v313_v7  ;;  %1038 = vmatpush1.bf16.msra.mxu0 %v4159_v55 }
  0xfa   :  { %v417_v12 = vmax.f32 %v319_v6, 0.0  ;;  %1039 = vmatprep.subr.bf16.mxu0 %v4168_v63  ;;  %2876 = vmatpush1.bf16.msra.mxu1 %v4645_v0  ;;  %v4660_v63 = vld [vmem:[%s6839_s5 + $0xa0] ss:$8 sps:$4 sm:$0xff]   ;;  %v4662_v0 = vld [vmem:[%s6839_s5 + $0xa4] ss:$8 sps:$4 sm:$0xff]  }
  0xfb   :  { %897 = vmatmul.mubr.bf16.gmra.mrb[44].mxu0 %v5199_v27  ;;  %1283 = vmatmul.mubr.bf16.gmra.mrb[12].mxu1 %v5199_v27  ;;  %v416_v16 = vmax.f32 %v314_v9, 0.0  ;;  %v4375_v17 = vpop.f32.mrb[16].mxu0 }
  0xfc   :  { %906 = vmatprep.mubr.bf16.mxu0 %v6870_v35  ;;  %1292 = vmatprep.mubr.bf16.mxu1 %v6870_v35  ;;  %v329_v19 = vadd.f32 %v4375_v17, %v5132_v41  ;;  %v323_v20 = vpop.f32.mrb[17].mxu0 }
  0xfd   :  { %v5277_v21 = vpack.c.bf16 %v417_v12, %v416_v16  ;;  %v324_v22 = vadd.f32 %v5132_v41, %v323_v20  ;;  %1040 = vmatpush1.bf16.msra.mxu0 %v4167_v10  ;;  %2877 = vmatprep.subr.bf16.mxu1 %v4650_v11 }
  0xfe   :  { %v419_v24 = vmax.f32 %v329_v19, 0.0  ;;  %1041 = vmatprep.subr.bf16.mxu0 %v4176_v13  ;;  %2878 = vmatpush1.bf16.msra.mxu1 %v4648_v14  ;;  %v4665_v19 = vld [vmem:[%s6839_s5 + $0xb4] ss:$8 sps:$4 sm:$0xff]  }
  0xff   :  { %v418_v28 = vmax.f32 %v324_v22, 0.0  ;;  %v4378_v29 = vpop.f32.mrb[18].mxu0  ;;  %2879 = vmatprep.subr.bf16.mxu1 %v4653_v18  ;;  %v4663_v18 = vld [vmem:[%s6839_s5 + $0xb0] ss:$8 sps:$4 sm:$0xff]  }
 0x100   :  { %v339_v30 = vadd.f32 %v4378_v29, %v5132_v41  ;;  %v333_v31 = vpop.f32.mrb[19].mxu0 }
 0x101   :  { %v5286_v32 = vpack.c.bf16 %v419_v24, %v418_v28  ;;  %v334_v33 = vadd.f32 %v5132_v41, %v333_v31  ;;  %1042 = vmatpush1.bf16.msra.mxu0 %v4175_v23 }
 0x102   :  { %v421_v36 = vmax.f32 %v339_v30, 0.0  ;;  %2880 = vmatpush1.bf16.msra.mxu1 %v4651_v25  ;;  %1413 = vmatprep.subr.bf16.mxu0 %v4124_v26 }
 0x103   :  { %907 = vmatmul.mubr.bf16.gmra.mrb[48].mxu0 %v5212_v40  ;;  %1293 = vmatmul.mubr.bf16.gmra.mrb[16].mxu1 %v5212_v40  ;;  %v420_v38 = vmax.f32 %v334_v33, 0.0  ;;  %v4381_v39 = vpop.f32.mrb[20].mxu0 }
 0x104   :  { %916 = vmatprep.mubr.bf16.mxu0 %v6870_v35  ;;  %1302 = vmatprep.mubr.bf16.mxu1 %v6870_v35  ;;  %v349_v43 = vadd.f32 %v4381_v39, %v5132_v41  ;;  %v343_v44 = vpop.f32.mrb[21].mxu0 }
 0x105   :  { %v5303_v45 = vpack.c.bf16 %v421_v36, %v420_v38  ;;  %v344_v46 = vadd.f32 %v5132_v41, %v343_v44  ;;  %2881 = vmatprep.subr.bf16.mxu1 %v4656_v34  ;;  %v4668_v38 = vld [vmem:[%s6839_s5 + $0xc4] ss:$8 sps:$4 sm:$0xff]  }
 0x106   :  { %v423_v47 = vmax.f32 %v349_v43, 0.0  ;;  %2882 = vmatpush1.bf16.msra.mxu1 %v4654_v37  ;;  %v4666_v37 = vld [vmem:[%s6839_s5 + $0xc0] ss:$8 sps:$4 sm:$0xff]   ;;  %v4674_v44 = vld [vmem:[%s6839_s5 + $0xe4] ss:$8 sps:$4 sm:$0xff]  }
 0x107   :  { %v422_v49 = vmax.f32 %v344_v46, 0.0  ;;  %v4384_v50 = vpop.f32.mrb[22].mxu0  ;;  %2883 = vmatprep.subr.bf16.mxu1 %v4659_v42  ;;  %v4671_v42 = vld [vmem:[%s6839_s5 + $0xd4] ss:$8 sps:$4 sm:$0xff]   ;;  %v4672_v43 = vld [vmem:[%s6839_s5 + $0xe0] ss:$8 sps:$4 sm:$0xff]  }
 0x108   :  { %v359_v51 = vadd.f32 %v4384_v50, %v5132_v41  ;;  %v353_v52 = vpop.f32.mrb[23].mxu0  ;;  %v4678_v46 = vld [vmem:[%s6839_s5 + $0xf4] ss:$8 sps:$4 sm:$0xff]  }
 0x109   :  { %v5310_v53 = vpack.c.bf16 %v423_v47, %v422_v49  ;;  %v354_v54 = vadd.f32 %v5132_v41, %v353_v52  ;;  %v4676_v47 = vld [vmem:[%s6839_s5 + $0xf0] ss:$8 sps:$4 sm:$0xff]  }
 0x10a   :  { %v425_v55 = vmax.f32 %v359_v51, 0.0  ;;  %2884 = vmatpush1.bf16.msra.mxu1 %v4657_v48  ;;  %v4681_v48 = vld [vmem:[%s6839_s5 + $0x104] ss:$8 sps:$4 sm:$0xff]   ;;  %v461_v49 = vld [vmem:[%s6838_s3 + $0x58] sm:$0xff] }
 0x10b   :  { %917 = vmatmul.mubr.bf16.gmra.mrb[52].mxu0 %v5245_v59  ;;  %1303 = vmatmul.mubr.bf16.gmra.mrb[20].mxu1 %v5245_v59  ;;  %v424_v60 = vmax.f32 %v354_v54, 0.0  ;;  %v4387_v62 = vpop.f32.mrb[24].mxu0  ;;  %v465_v50 = vld [vmem:[%s6838_s3 + $0x78] sm:$0xff] }
 0x10c   :  { %926 = vmatprep.mubr.bf16.mxu0 %v6870_v35  ;;  %1312 = vmatprep.mubr.bf16.mxu1 %v6870_v35  ;;  %v369_v1 = vadd.f32 %v4387_v62, %v5132_v41  ;;  %v363_v2 = vpop.f32.mrb[25].mxu0  ;;  %v4132_v51 = vcombine.high %v461_v49, %v465_v50  ;;  %v469_v52 = vld [vmem:[%s6838_s3 + $0x98] sm:$0xff] }
 0x10d   :  { %v5324_v4 = vpack.c.bf16 %v425_v55, %v424_v60  ;;  %v364_v5 = vadd.f32 %v5132_v41, %v363_v2  ;;  %2885 = vmatprep.subr.bf16.mxu1 %v4662_v0  ;;  %v473_v54 = vld [vmem:[%s6838_s3 + $0xb8] sm:$0xff]  ;;  %v4131_v55 = vcombine.low %v461_v49, %v465_v50  ;;  %v4156_v2 = vcombine.high %v485_v57, %v489_v58 }
 0x10e   :  { %v427_v6 = vmax.f32 %v369_v1, 0.0  ;;  %2886 = vmatpush1.bf16.msra.mxu1 %v4660_v63  ;;  %v4140_v60 = vcombine.high %v469_v52, %v473_v54  ;;  %v477_v62 = vld [vmem:[%s6838_s3 + $0xd8] sm:$0xff]  ;;  %v4139_v0 = vcombine.low %v469_v52, %v473_v54 }
 0x10f   :  { %v426_v7 = vmax.f32 %v364_v5, 0.0  ;;  %v4390_v9 = vpop.f32.mrb[26].mxu0  ;;  %2887 = vmatprep.subr.bf16.mxu1 %v4665_v19  ;;  %v481_v63 = vld [vmem:[%s6838_s3 + $0xf8] sm:$0xff] }
 0x110   :  { %v379_v10 = vadd.f32 %v4390_v9, %v5132_v41  ;;  %v373_v11 = vpop.f32.mrb[27].mxu0  ;;  %v4148_v1 = vcombine.high %v477_v62, %v481_v63  ;;  %v493_v5 = vld [vmem:[%s6838_s3 + $0x158] sm:$0xff] }
 0x111   :  { %v5328_v12 = vpack.c.bf16 %v427_v6, %v426_v7  ;;  %v374_v13 = vadd.f32 %v5132_v41, %v373_v11  ;;  %v497_v6 = vld [vmem:[%s6838_s3 + $0x178] sm:$0xff]  ;;  %v4155_v7 = vcombine.low %v485_v57, %v489_v58 }
 0x112   :  { %v429_v14 = vmax.f32 %v379_v10, 0.0  ;;  %2888 = vmatpush1.bf16.msra.mxu1 %v4663_v18  ;;  %v4164_v9 = vcombine.high %v493_v5, %v497_v6  ;;  %v501_v10 = vld [vmem:[%s6838_s3 + $0x198] sm:$0xff] }
 0x113   :  { %927 = vmatmul.mubr.bf16.gmra.mrb[56].mxu0 %v5260_v8  ;;  %1313 = vmatmul.mubr.bf16.gmra.mrb[24].mxu1 %v5260_v8  ;;  %v428_v16 = vmax.f32 %v374_v13, 0.0  ;;  %v4393_v17 = vpop.f32.mrb[28].mxu0  ;;  %v505_v11 = vld [vmem:[%s6838_s3 + $0x1b8] sm:$0xff]  ;;  %v4163_v13 = vcombine.low %v493_v5, %v497_v6 }
 0x114   :  { %936 = vmatprep.mubr.bf16.mxu0 %v6870_v35  ;;  %1322 = vmatprep.mubr.bf16.mxu1 %v6870_v35  ;;  %v389_v20 = vadd.f32 %v4393_v17, %v5132_v41  ;;  %v383_v22 = vpop.f32.mrb[29].mxu0  ;;  %v513_v17 = vld [vmem:[%s6838_s3 + $0x1f8] sm:$0xff]  ;;  %v4171_v18 = vcombine.low %v501_v10, %v505_v11 }
 0x115   :  { %v5342_v23 = vpack.c.bf16 %v429_v14, %v428_v16  ;;  %v384_v24 = vadd.f32 %v5132_v41, %v383_v22  ;;  %2889 = vmatprep.subr.bf16.mxu1 %v4668_v38  ;;  %v4172_v14 = vcombine.high %v501_v10, %v505_v11  ;;  %v509_v16 = vld [vmem:[%s6838_s3 + $0x1d8] sm:$0xff]  ;;  %v4837_v22 = vmov 1966171168  }
 0x116   :  { %v431_v25 = vmax.f32 %v389_v20, 0.0  ;;  %2890 = vmatpush1.bf16.msra.mxu1 %v4666_v37  ;;  %v4180_v19 = vcombine.high %v509_v16, %v513_v17  ;;  %v4179_v20 = vcombine.low %v509_v16, %v513_v17  ;;  %v4720_v52 = vld [vmem:[%s6839_s5 + $0x1d4] ss:$8 sps:$4 sm:$0xff]  }
 0x117   :  { %v430_v26 = vmax.f32 %v384_v24, 0.0  ;;  %v4396_v28 = vpop.f32.mrb[30].mxu0  ;;  %2891 = vmatprep.subr.bf16.mxu1 %v4671_v42  ;;  %v1738_v24 = vunpack.c.l.s4 %v4837_v22  ;;  %v4687_v22 = vld [vmem:[%s6839_s5 + $0x124] ss:$8 sps:$4 sm:$0xff]  }
 0x118   :  { %v399_v29 = vadd.f32 %v4396_v28, %v5132_v41  ;;  %v393_v30 = vpop.f32.mrb[31].mxu0 }
 0x119   :  { %v5346_v31 = vpack.c.bf16 %v431_v25, %v430_v26  ;;  %v394_v33 = vadd.f32 %v5132_v41, %v393_v30  ;;  %v4669_v41 = vld [vmem:[%s6839_s5 + $0xd0] ss:$8 sps:$4 sm:$0xff]   ;;  %v1740_v25 = vlaneseq  ;;  %v1739_v26 = vunpack.c.0.s8 %v1738_v24  ;;  %v4834_v30 = vld.sshfl [vmem:[%s6841_s4] sm:$0xff pattern:$0x75316420] }
 0x11a   :  { %v433_v34 = vmax.f32 %v399_v29, 0.0  ;;  %2892 = vmatpush1.bf16.msra.mxu1 %v4669_v41 }
 0x11b   :  { %937 = vmatmul.mubr.bf16.gmra.mrb[60].mxu0 %v5277_v21  ;;  %1323 = vmatmul.mubr.bf16.gmra.mrb[28].mxu1 %v5277_v21  ;;  %v432_v36 = vmax.f32 %v394_v33, 0.0  ;;  %v5474_v28 = vshrl.u32 %v1740_v25, 7  ;;  %v1751_v33 = vcombine.high %v4834_v30, %v4834_v30 }
 0x11c   :  { %946 = vmatprep.mubr.bf16.mxu0 %v6870_v35  ;;  %1332 = vmatprep.mubr.bf16.mxu1 %v6870_v35 }
 0x11d   :  { %v5359_v39 = vpack.c.bf16 %v433_v34, %v432_v36  ;;  %2893 = vmatprep.subr.bf16.mxu1 %v4674_v44  ;;  %6897 = vst [vmem:[#allocation3_spill] sm:$0xff] %v5474_v28  ;;  %v5479_v29 = vsub.s32 %v1739_v26, %v5474_v28  ;;  %v5496_v38 = vsub.s32 0, %v5474_v28 }
 0x11e   :  { %2894 = vmatpush1.bf16.msra.mxu1 %v4672_v43 }
 0x11f   :  { %2895 = vmatprep.subr.bf16.mxu1 %v4678_v46  ;;  %6898 = vst [vmem:[#allocation4_spill] sm:$0xff] %v5479_v29  ;;  %v5487_v34 = vrot.slane %v4834_v30, %v5479_v29  ;;  %v5490_v36 = vrot.slane %v1751_v33, %v5479_v29  ;;  %v4685_v33 = vld [vmem:[%s6839_s5 + $0x120] ss:$8 sps:$4 sm:$0xff]  }
 0x121   :  { %v1786_v37 = vpack.i.b16 %v5487_v34, %v5487_v34  ;;  %v1793_v41 = vpack.i.b16 %v5490_v36, %v5490_v36 }
 0x122   :  { %2896 = vmatpush1.bf16.msra.mxu1 %v4676_v47 }
 0x123   :  { %947 = vmatmul.mubr.bf16.gmra.mrb[64].mxu0 %v5286_v32  ;;  %1333 = vmatmul.mubr.bf16.gmra.mrb[32].mxu1 %v5286_v32  ;;  %v5506_v47 = vrot.slane %v1786_v37, %v5496_v38  ;;  %v5511_v50 = vrot.slane %v1793_v41, %v5496_v38 }
 0x124   :  { %956 = vmatprep.mubr.bf16.mxu0 %v6870_v35  ;;  %1342 = vmatprep.mubr.bf16.mxu1 %v6870_v35 }
 0x125   :  { %3058 = vmatprep.subr.bf16.mxu1 %v4681_v48 }
 0x12b   :  { %957 = vmatmul.mubr.bf16.gmra.mrb[68].mxu0 %v5303_v45  ;;  %1343 = vmatmul.mubr.bf16.gmra.mrb[36].mxu1 %v5303_v45 }
 0x12c   :  { %966 = vmatprep.mubr.bf16.mxu0 %v6870_v35  ;;  %1352 = vmatprep.mubr.bf16.mxu1 %v6870_v35 }
 0x133   :  { %967 = vmatmul.mubr.bf16.gmra.mrb[72].mxu0 %v5310_v53  ;;  %1353 = vmatmul.mubr.bf16.gmra.mrb[40].mxu1 %v5310_v53 }
 0x134   :  { %976 = vmatprep.mubr.bf16.mxu0 %v6870_v35  ;;  %1362 = vmatprep.mubr.bf16.mxu1 %v6870_v35 }
 0x13b   :  { %977 = vmatmul.mubr.bf16.gmra.mrb[76].mxu0 %v5324_v4  ;;  %1363 = vmatmul.mubr.bf16.gmra.mrb[44].mxu1 %v5324_v4 }
 0x13c   :  { %986 = vmatprep.mubr.bf16.mxu0 %v6870_v35  ;;  %1372 = vmatprep.mubr.bf16.mxu1 %v6870_v35 }
 0x143   :  { %987 = vmatmul.mubr.bf16.gmra.mrb[80].mxu0 %v5328_v12  ;;  %1373 = vmatmul.mubr.bf16.gmra.mrb[48].mxu1 %v5328_v12 }
 0x144   :  { %996 = vmatprep.mubr.bf16.mxu0 %v6870_v35  ;;  %1382 = vmatprep.mubr.bf16.mxu1 %v6870_v35 }
 0x14b   :  { %997 = vmatmul.mubr.bf16.gmra.mrb[84].mxu0 %v5342_v23  ;;  %1383 = vmatmul.mubr.bf16.gmra.mrb[52].mxu1 %v5342_v23 }
 0x14c   :  { %1006 = vmatprep.mubr.bf16.mxu0 %v6870_v35  ;;  %1392 = vmatprep.mubr.bf16.mxu1 %v6870_v35 }
 0x153   :  { %1007 = vmatmul.mubr.bf16.gmra.mrb[88].mxu0 %v5346_v31  ;;  %1393 = vmatmul.mubr.bf16.gmra.mrb[56].mxu1 %v5346_v31 }
 0x154   :  { %1016 = vmatprep.mubr.bf16.mxu0 %v6870_v35  ;;  %1402 = vmatprep.mubr.bf16.mxu1 %v6870_v35 }
 0x15b   :  { %1017 = vmatmul.mubr.bf16.gmra.mrb[92].mxu0 %v5359_v39  ;;  %1403 = vmatmul.mubr.bf16.gmra.mrb[60].mxu1 %v5359_v39 }
 0x15c   :  { %1059 = vmatprep.mubr.bf16.mxu0 %v6870_v35 }
 0x163   :  { %1060 = vmatmul.mubr.bf16.vlgmr.msra.gmra.mrb[96].mxu0 %v5152_v56 }
 0x164   :  { %1069 = vmatprep.mubr.bf16.mxu0 %v6870_v35  ;;  %1414 = vmatpush1.bf16.msra.mxu0 %v4123_v61  ;;  %v4147_v61 = vcombine.low %v477_v62, %v481_v63 }
 0x165   :  { %1415 = vmatprep.subr.bf16.mxu0 %v4132_v51 }
 0x168   :  { %1416 = vmatpush1.bf16.msra.mxu0 %v4131_v55 }
 0x169   :  { %1417 = vmatprep.subr.bf16.mxu0 %v4140_v60 }
 0x16b   :  { %1070 = vmatmul.mubr.bf16.gmra.mrb[100].mxu0 %v5165_v3 }
 0x16c   :  { %1079 = vmatprep.mubr.bf16.mxu0 %v6870_v35  ;;  %1418 = vmatpush1.bf16.msra.mxu0 %v4139_v0 }
 0x16d   :  { %1419 = vmatprep.subr.bf16.mxu0 %v4148_v1 }
 0x170   :  { %1420 = vmatpush1.bf16.msra.mxu0 %v4147_v61  ;;  %v4679_v61 = vld [vmem:[%s6839_s5 + $0x100] ss:$8 sps:$4 sm:$0xff]  }
 0x171   :  { %1421 = vmatprep.subr.bf16.mxu0 %v4156_v2 }
 0x173   :  { %1080 = vmatmul.mubr.bf16.gmra.mrb[104].mxu0 %v5182_v15 }
 0x174   :  { %1089 = vmatprep.mubr.bf16.mxu0 %v6870_v35  ;;  %1422 = vmatpush1.bf16.msra.mxu0 %v4155_v7  ;;  %v4684_v7 = vld [vmem:[%s6839_s5 + $0x114] ss:$8 sps:$4 sm:$0xff]  }
 0x175   :  { %1423 = vmatprep.subr.bf16.mxu0 %v4164_v9 }
 0x178   :  { %1424 = vmatpush1.bf16.msra.mxu0 %v4163_v13 }
 0x179   :  { %1425 = vmatprep.subr.bf16.mxu0 %v4172_v14 }
 0x17b   :  { %1090 = vmatmul.mubr.bf16.gmra.mrb[108].mxu0 %v5199_v27 }
 0x17c   :  { %1099 = vmatprep.mubr.bf16.mxu0 %v6870_v35  ;;  %1426 = vmatpush1.bf16.msra.mxu0 %v4171_v18 }
 0x17d   :  { %1427 = vmatprep.subr.bf16.mxu0 %v4180_v19  ;;  %v4682_v19 = vld [vmem:[%s6839_s5 + $0x110] ss:$8 sps:$4 sm:$0xff]  }
 0x180   :  { %1428 = vmatpush1.bf16.msra.mxu0 %v4179_v20 }
 0x183   :  { %1100 = vmatmul.mubr.bf16.gmra.mrb[112].mxu0 %v5212_v40 }
 0x184   :  { %1109 = vmatprep.mubr.bf16.mxu0 %v6870_v35 }
 0x18b   :  { %1110 = vmatmul.mubr.bf16.gmra.mrb[116].mxu0 %v5245_v59 }
 0x18c   :  { %1119 = vmatprep.mubr.bf16.mxu0 %v6870_v35 }
 0x193   :  { %1120 = vmatmul.mubr.bf16.gmra.mrb[120].mxu0 %v5260_v8 }
 0x194   :  { %1129 = vmatprep.mubr.bf16.mxu0 %v6870_v35 }
 0x19b   :  { %1130 = vmatmul.mubr.bf16.gmra.mrb[124].mxu0 %v5277_v21 }
 0x19c   :  { %1139 = vmatprep.mubr.bf16.mxu0 %v6870_v35 }
 0x1a3   :  { %1140 = vmatmul.mubr.bf16.gmra.mrb[128].mxu0 %v5286_v32 }
 0x1a4   :  { %1149 = vmatprep.mubr.bf16.mxu0 %v6870_v35 }
 0x1ab   :  { %1150 = vmatmul.mubr.bf16.gmra.mrb[132].mxu0 %v5303_v45 }
 0x1ac   :  { %1159 = vmatprep.mubr.bf16.mxu0 %v6870_v35 }
 0x1b3   :  { %1160 = vmatmul.mubr.bf16.gmra.mrb[136].mxu0 %v5310_v53 }
 0x1b4   :  { %1169 = vmatprep.mubr.bf16.mxu0 %v6870_v35 }
 0x1b6   :  { %v868_v42 = vpop.f32.mrb[32].mxu0  ;;  %v5501_v43 = vpop.f32.mrb[0].mxu1 }
 0x1b7   :  { %v870_v44 = vpop.f32.mrb[33].mxu0  ;;  %v5503_v46 = vpop.f32.mrb[1].mxu1 }
 0x1b8   :  { %v872_v48 = vpop.f32.mrb[34].mxu0  ;;  %v5508_v49 = vpop.f32.mrb[2].mxu1 }
 0x1b9   :  { %v1606_v51 = vpack.c.bf16 %v872_v48, %v868_v42  ;;  %v874_v54 = vpop.f32.mrb[35].mxu0  ;;  %v5515_v55 = vpop.f32.mrb[3].mxu1 }
 0x1ba   :  { %v1607_v60 = vpack.c.bf16 %v874_v54, %v870_v44  ;;  %v4690_v44 = vld [vmem:[%s6839_s5 + $0x134] ss:$8 sps:$4 sm:$0xff]  }
 0x1bb   :  { %v1841_v63 = vadd.bf16 %v5506_v47, %v1606_v51  ;;  %1170 = vmatmul.mubr.bf16.gmra.mrb[140].mxu0 %v5324_v4 }
 0x1bc   :  { %v1842_v0 = vadd.bf16 %v5511_v50, %v1607_v60  ;;  %1179 = vmatprep.mubr.bf16.mxu0 %v6870_v35 }
 0x1bd   :  { %v1969_v2 = vmax.bf16 %v6870_v35, %v1841_v63 }
 0x1be   :  { %v878_v1 = vpop.f32.mrb[36].mxu0  ;;  %v5523_v57 = vpop.f32.mrb[4].mxu1  ;;  %v1970_v58 = vmax.bf16 %v6870_v35, %v1842_v0 }
 0x1bf   :  { %v880_v5 = vpop.f32.mrb[37].mxu0  ;;  %v5530_v6 = vpop.f32.mrb[5].mxu1 }
 0x1c0   :  { %v882_v9 = vpop.f32.mrb[38].mxu0  ;;  %v5535_v10 = vpop.f32.mrb[6].mxu1  ;;  %2897 = vmatprep.mubr.bf16.mxu1 %v1970_v58 }
 0x1c1   :  { %v1614_v11 = vpack.c.bf16 %v882_v9, %v878_v1  ;;  %v884_v14 = vpop.f32.mrb[39].mxu0  ;;  %v5539_v16 = vpop.f32.mrb[7].mxu1  ;;  %2898 = vmatmul.mubr.bf16.vlgmr.msra.gmra.mrb[64].mxu1 %v1969_v2 }
 0x1c2   :  { %v1615_v17 = vpack.c.bf16 %v884_v14, %v880_v5  ;;  %3059 = vmatpush1.bf16.msra.mxu1 %v4679_v61  ;;  %v4688_v61 = vld [vmem:[%s6839_s5 + $0x130] ss:$8 sps:$4 sm:$0xff]   ;;  %v4693_v5 = vld [vmem:[%s6839_s5 + $0x144] ss:$8 sps:$4 sm:$0xff]  }
 0x1c3   :  { %v1849_v20 = vadd.bf16 %v5506_v47, %v1614_v11  ;;  %1180 = vmatmul.mubr.bf16.gmra.mrb[144].mxu0 %v5328_v12  ;;  %3060 = vmatprep.subr.bf16.mxu1 %v4684_v7 }
 0x1c4   :  { %v1850_v24 = vadd.bf16 %v5511_v50, %v1615_v17  ;;  %1189 = vmatprep.mubr.bf16.mxu0 %v6870_v35  ;;  %v4691_v17 = vld [vmem:[%s6839_s5 + $0x140] ss:$8 sps:$4 sm:$0xff]  }
 0x1c5   :  { %v1977_v42 = vmax.bf16 %v6870_v35, %v1849_v20 }
 0x1c6   :  { %v888_v25 = vpop.f32.mrb[40].mxu0  ;;  %v5553_v26 = vpop.f32.mrb[8].mxu1  ;;  %v1978_v30 = vmax.bf16 %v6870_v35, %v1850_v24  ;;  %3061 = vmatpush1.bf16.msra.mxu1 %v4682_v19  ;;  %v4696_v24 = vld [vmem:[%s6839_s5 + $0x154] ss:$8 sps:$4 sm:$0xff]  }
 0x1c7   :  { %v890_v37 = vpop.f32.mrb[41].mxu0  ;;  %v5559_v41 = vpop.f32.mrb[9].mxu1  ;;  %3062 = vmatprep.subr.bf16.mxu1 %v4687_v22 }
 0x1c8   :  { %v892_v48 = vpop.f32.mrb[42].mxu0  ;;  %v5565_v51 = vpop.f32.mrb[10].mxu1  ;;  %2907 = vmatprep.mubr.bf16.mxu1 %v1978_v30 }
 0x1c9   :  { %v1622_v54 = vpack.c.bf16 %v892_v48, %v888_v25  ;;  %v894_v63 = vpop.f32.mrb[43].mxu0  ;;  %v5569_v0 = vpop.f32.mrb[11].mxu1  ;;  %2908 = vmatmul.mubr.bf16.gmra.mrb[68].mxu1 %v1977_v42 }
 0x1ca   :  { %v1623_v1 = vpack.c.bf16 %v894_v63, %v890_v37  ;;  %3063 = vmatpush1.bf16.msra.mxu1 %v4685_v33  ;;  %v4694_v63 = vld [vmem:[%s6839_s5 + $0x150] ss:$8 sps:$4 sm:$0xff]  }
 0x1cb   :  { %v1857_v2 = vadd.bf16 %v5506_v47, %v1622_v54  ;;  %1190 = vmatmul.mubr.bf16.gmra.mrb[148].mxu0 %v5342_v23  ;;  %3064 = vmatprep.subr.bf16.mxu1 %v4690_v44 }
 0x1cc   :  { %v1858_v7 = vadd.bf16 %v5511_v50, %v1623_v1  ;;  %1199 = vmatprep.mubr.bf16.mxu0 %v6870_v35 }
 0x1cd   :  { %v1985_v22 = vmax.bf16 %v6870_v35, %v1857_v2 }
 0x1ce   :  { %v898_v9 = vpop.f32.mrb[44].mxu0  ;;  %v5583_v11 = vpop.f32.mrb[12].mxu1  ;;  %v1986_v14 = vmax.bf16 %v6870_v35, %v1858_v7  ;;  %3065 = vmatpush1.bf16.msra.mxu1 %v4688_v61  ;;  %v4699_v61 = vld [vmem:[%s6839_s5 + $0x164] ss:$8 sps:$4 sm:$0xff]  }
 0x1cf   :  { %v900_v19 = vpop.f32.mrb[45].mxu0  ;;  %v5589_v20 = vpop.f32.mrb[13].mxu1  ;;  %3066 = vmatprep.subr.bf16.mxu1 %v4693_v5 }
 0x1d0   :  { %v902_v25 = vpop.f32.mrb[46].mxu0  ;;  %v5595_v30 = vpop.f32.mrb[14].mxu1  ;;  %2917 = vmatprep.mubr.bf16.mxu1 %v1986_v14  ;;  %v4697_v14 = vld [vmem:[%s6839_s5 + $0x160] ss:$8 sps:$4 sm:$0xff]  }
 0x1d1   :  { %v1630_v33 = vpack.c.bf16 %v902_v25, %v898_v9  ;;  %v904_v42 = vpop.f32.mrb[47].mxu0  ;;  %v5599_v44 = vpop.f32.mrb[15].mxu1  ;;  %2918 = vmatmul.mubr.bf16.gmra.mrb[72].mxu1 %v1985_v22 }
 0x1d2   :  { %v1631_v48 = vpack.c.bf16 %v904_v42, %v900_v19  ;;  %3067 = vmatpush1.bf16.msra.mxu1 %v4691_v17 }
 0x1d3   :  { %v1865_v1 = vadd.bf16 %v5506_v47, %v1630_v33  ;;  %1200 = vmatmul.mubr.bf16.gmra.mrb[152].mxu0 %v5346_v31  ;;  %3068 = vmatprep.subr.bf16.mxu1 %v4696_v24  ;;  %v4702_v24 = vld [vmem:[%s6839_s5 + $0x174] ss:$8 sps:$4 sm:$0xff]  }
 0x1d4   :  { %v1866_v2 = vadd.bf16 %v5511_v50, %v1631_v48  ;;  %1209 = vmatprep.mubr.bf16.mxu0 %v6870_v35 }
 0x1d5   :  { %v1993_v22 = vmax.bf16 %v6870_v35, %v1865_v1 }
 0x1d6   :  { %v908_v5 = vpop.f32.mrb[48].mxu0  ;;  %v5613_v7 = vpop.f32.mrb[16].mxu1  ;;  %v1994_v9 = vmax.bf16 %v6870_v35, %v1866_v2  ;;  %3069 = vmatpush1.bf16.msra.mxu1 %v4694_v63 }
 0x1d7   :  { %v910_v17 = vpop.f32.mrb[49].mxu0  ;;  %v5619_v19 = vpop.f32.mrb[17].mxu1  ;;  %3070 = vmatprep.subr.bf16.mxu1 %v4699_v61  ;;  %v4700_v61 = vld [vmem:[%s6839_s5 + $0x170] ss:$8 sps:$4 sm:$0xff]  }
 0x1d8   :  { %v912_v25 = vpop.f32.mrb[50].mxu0  ;;  %v5625_v33 = vpop.f32.mrb[18].mxu1  ;;  %2927 = vmatprep.mubr.bf16.mxu1 %v1994_v9 }
 0x1d9   :  { %v1638_v42 = vpack.c.bf16 %v912_v25, %v908_v5  ;;  %v914_v63 = vpop.f32.mrb[51].mxu0  ;;  %v5629_v2 = vpop.f32.mrb[19].mxu1  ;;  %2928 = vmatmul.mubr.bf16.gmra.mrb[76].mxu1 %v1993_v22  ;;  %v4705_v5 = vld [vmem:[%s6839_s5 + $0x184] ss:$8 sps:$4 sm:$0xff]   ;;  %v4703_v25 = vld [vmem:[%s6839_s5 + $0x180] ss:$8 sps:$4 sm:$0xff]  }
 0x1da   :  { %v1639_v37 = vpack.c.bf16 %v914_v63, %v910_v17  ;;  %3071 = vmatpush1.bf16.msra.mxu1 %v4697_v14 }
 0x1db   :  { %v1873_v54 = vadd.bf16 %v5506_v47, %v1638_v42  ;;  %1210 = vmatmul.mubr.bf16.gmra.mrb[156].mxu0 %v5359_v39  ;;  %3072 = vmatprep.subr.bf16.mxu1 %v4702_v24 }
 0x1dc   :  { %v1874_v9 = vadd.bf16 %v5511_v50, %v1639_v37  ;;  %1445 = vmatprep.mubr.bf16.mxu0 %v6870_v35  ;;  %v4708_v37 = vld [vmem:[%s6839_s5 + $0x194] ss:$8 sps:$4 sm:$0xff]  }
 0x1dd   :  { %v2001_v63 = vmax.bf16 %v6870_v35, %v1873_v54 }
 0x1de   :  { %v918_v17 = vpop.f32.mrb[52].mxu0  ;;  %v5643_v22 = vpop.f32.mrb[20].mxu1  ;;  %v2002_v14 = vmax.bf16 %v6870_v35, %v1874_v9  ;;  %3073 = vmatpush1.bf16.msra.mxu1 %v4700_v61  ;;  %v4714_v61 = vld [vmem:[%s6839_s5 + $0x1b4] ss:$8 sps:$4 sm:$0xff]  }
 0x1df   :  { %6899 = vst [vmem:[#allocation5_spill] sm:$0xff] %v5643_v22  ;;  %v920_v42 = vpop.f32.mrb[53].mxu0  ;;  %v5649_v24 = vpop.f32.mrb[21].mxu1  ;;  %3074 = vmatprep.subr.bf16.mxu1 %v4705_v5  ;;  %v4706_v5 = vld [vmem:[%s6839_s5 + $0x190] ss:$8 sps:$4 sm:$0xff]  }
 0x1e0   :  { %v922_v48 = vpop.f32.mrb[54].mxu0  ;;  %v5655_v1 = vpop.f32.mrb[22].mxu1  ;;  %2937 = vmatprep.mubr.bf16.mxu1 %v2002_v14  ;;  %v5679_v14 = vld [vmem:[%s6839_s5 + $0x304] ss:$8 sps:$4 sm:$0xff]  }
 0x1e1   :  { %v1646_v9 = vpack.c.bf16 %v922_v48, %v918_v17  ;;  %v924_v60 = vpop.f32.mrb[55].mxu0  ;;  %v5659_v58 = vpop.f32.mrb[23].mxu1  ;;  %2938 = vmatmul.mubr.bf16.gmra.mrb[80].mxu1 %v2001_v63  ;;  %v4711_v48 = vld [vmem:[%s6839_s5 + $0x1a4] ss:$8 sps:$4 sm:$0xff]   ;;  %3444 = vmatprep.subr.bf16.mxu0 %v5679_v14 }
 0x1e2   :  { %v1647_v13 = vpack.c.bf16 %v924_v60, %v920_v42  ;;  %3075 = vmatpush1.bf16.msra.mxu1 %v4703_v25  ;;  %v4742_v60 = vld [vmem:[%s6839_s5 + $0x300] ss:$8 sps:$4 sm:$0xff]  }
 0x1e3   :  { %v1881_v18 = vadd.bf16 %v5506_v47, %v1646_v9  ;;  %1446 = vmatmul.mubr.bf16.vlgmr.msra.gmra.mrb[160].mxu0 %v5152_v56  ;;  %3076 = vmatprep.subr.bf16.mxu1 %v4708_v37 }
 0x1e4   :  { %v1882_v17 = vadd.bf16 %v5511_v50, %v1647_v13  ;;  %1455 = vmatprep.mubr.bf16.mxu0 %v6870_v35  ;;  %v4709_v13 = vld [vmem:[%s6839_s5 + $0x1a0] ss:$8 sps:$4 sm:$0xff]   ;;  %3445 = vmatpush1.bf16.msra.mxu0 %v4742_v60 }
 0x1e5   :  { %v2009_v9 = vmax.bf16 %v6870_v35, %v1881_v18 }
 0x1e6   :  { %v928_v25 = vpop.f32.mrb[56].mxu0  ;;  %v5681_v56 = vpop.f32.mrb[24].mxu1  ;;  %v2010_v42 = vmax.bf16 %v6870_v35, %v1882_v17  ;;  %3077 = vmatpush1.bf16.msra.mxu1 %v4706_v5 }
 0x1e7   :  { %6900 = vst [vmem:[#allocation6_spill] sm:$0xff] %v5681_v56  ;;  %v930_v63 = vpop.f32.mrb[57].mxu0  ;;  %v5688_v37 = vpop.f32.mrb[25].mxu1  ;;  %3078 = vmatprep.subr.bf16.mxu1 %v4711_v48  ;;  %v4712_v48 = vld [vmem:[%s6839_s5 + $0x1b0] ss:$8 sps:$4 sm:$0xff]  }
 0x1e8   :  { %6901 = vst [vmem:[#allocation7_spill] sm:$0xff] %v5688_v37  ;;  %v932_v54 = vpop.f32.mrb[58].mxu0  ;;  %v5694_v17 = vpop.f32.mrb[26].mxu1  ;;  %2947 = vmatprep.mubr.bf16.mxu1 %v2010_v42  ;;  %v4750_v42 = vld [vmem:[%s6839_s5 + $0x314] ss:$8 sps:$4 sm:$0xff]  }
 0x1e9   :  { %6902 = vst [vmem:[#allocation8_spill] sm:$0xff] %v5694_v17  ;;  %v1654_v5 = vpack.c.bf16 %v932_v54, %v928_v25  ;;  %v934_v62 = vpop.f32.mrb[59].mxu0  ;;  %v5698_v28 = vpop.f32.mrb[27].mxu1  ;;  %2948 = vmatmul.mubr.bf16.gmra.mrb[84].mxu1 %v2009_v9  ;;  %v4717_v54 = vld [vmem:[%s6839_s5 + $0x1c4] ss:$8 sps:$4 sm:$0xff]   ;;  %3446 = vmatprep.subr.bf16.mxu0 %v4750_v42 }
 0x1ea   :  { %v1655_v22 = vpack.c.bf16 %v934_v62, %v930_v63  ;;  %3079 = vmatpush1.bf16.msra.mxu1 %v4709_v13  ;;  %v4748_v62 = vld [vmem:[%s6839_s5 + $0x310] ss:$8 sps:$4 sm:$0xff]  }
 0x1eb   :  { %v1889_v60 = vadd.bf16 %v5506_v47, %v1654_v5  ;;  %1456 = vmatmul.mubr.bf16.gmra.mrb[164].mxu0 %v5165_v3  ;;  %3080 = vmatprep.subr.bf16.mxu1 %v4714_v61 }
 0x1ec   :  { %v1890_v25 = vadd.bf16 %v5511_v50, %v1655_v22  ;;  %1465 = vmatprep.mubr.bf16.mxu0 %v6870_v35  ;;  %v4715_v22 = vld [vmem:[%s6839_s5 + $0x1c0] ss:$8 sps:$4 sm:$0xff]   ;;  %3447 = vmatpush1.bf16.msra.mxu0 %v4748_v62 }
 0x1ed   :  { %v2017_v5 = vmax.bf16 %v6870_v35, %v1889_v60 }
 0x1ee   :  { %v938_v13 = vpop.f32.mrb[60].mxu0  ;;  %v5718_v63 = vpop.f32.mrb[28].mxu1  ;;  %v2018_v3 = vmax.bf16 %v6870_v35, %v1890_v25  ;;  %3081 = vmatpush1.bf16.msra.mxu1 %v4712_v48  ;;  %v4726_v25 = vld [vmem:[%s6839_s5 + $0x1f4] ss:$8 sps:$4 sm:$0xff]  }
 0x1ef   :  { %6903 = vst [vmem:[#allocation9_spill] sm:$0xff] %v5718_v63  ;;  %v940_v61 = vpop.f32.mrb[61].mxu0  ;;  %v5724_v9 = vpop.f32.mrb[29].mxu1  ;;  %3082 = vmatprep.subr.bf16.mxu1 %v4717_v54  ;;  %v4718_v54 = vld [vmem:[%s6839_s5 + $0x1d0] ss:$8 sps:$4 sm:$0xff]  }
 0x1f0   :  { %6904 = vst [vmem:[#allocation10_spill] sm:$0xff] %v5724_v9  ;;  %v942_v18 = vpop.f32.mrb[62].mxu0  ;;  %v5730_v56 = vpop.f32.mrb[30].mxu1  ;;  %2957 = vmatprep.mubr.bf16.mxu1 %v2018_v3  ;;  %v4754_v3 = vld [vmem:[%s6839_s5 + $0x320] ss:$8 sps:$4 sm:$0xff]  }
 0x1f1   :  { %6905 = vst [vmem:[#allocation11_spill] sm:$0xff] %v5730_v56  ;;  %v1662_v48 = vpack.c.bf16 %v942_v18, %v938_v13  ;;  %v944_v42 = vpop.f32.mrb[63].mxu0  ;;  %v5734_v17 = vpop.f32.mrb[31].mxu1  ;;  %2958 = vmatmul.mubr.bf16.gmra.mrb[88].mxu1 %v2017_v5  ;;  %v4723_v18 = vld [vmem:[%s6839_s5 + $0x1e4] ss:$8 sps:$4 sm:$0xff]  }
 0x1f2   :  { %6906 = vst [vmem:[#allocation12_spill] sm:$0xff] %v5734_v17  ;;  %v1663_v37 = vpack.c.bf16 %v944_v42, %v940_v61  ;;  %3083 = vmatpush1.bf16.msra.mxu1 %v4715_v22  ;;  %v4756_v22 = vld [vmem:[%s6839_s5 + $0x324] ss:$8 sps:$4 sm:$0xff]   ;;  %v1781_v17 = vcombine.high %v5487_v34, %v5487_v34 }
 0x1f3   :  { %v1897_v62 = vadd.bf16 %v5506_v47, %v1662_v48  ;;  %1466 = vmatmul.mubr.bf16.gmra.mrb[168].mxu0 %v5182_v15  ;;  %3084 = vmatprep.subr.bf16.mxu1 %v4720_v52  ;;  %v4721_v52 = vld [vmem:[%s6839_s5 + $0x1e0] ss:$8 sps:$4 sm:$0xff]  }
 0x1f4   :  { %v1898_v13 = vadd.bf16 %v5511_v50, %v1663_v37  ;;  %1475 = vmatprep.mubr.bf16.mxu0 %v6870_v35  ;;  %3448 = vmatprep.subr.bf16.mxu0 %v4756_v22 }
 0x1f5   :  { %v2025_v42 = vmax.bf16 %v6870_v35, %v1897_v62  ;;  %3449 = vmatpush1.bf16.msra.mxu0 %v4754_v3 }
 0x1f6   :  { %v948_v61 = vpop.f32.mrb[64].mxu0  ;;  %v5754_v5 = vpop.f32.mrb[32].mxu1  ;;  %v2026_v15 = vmax.bf16 %v6870_v35, %v1898_v13  ;;  %3085 = vmatpush1.bf16.msra.mxu1 %v4718_v54 }
 0x1f7   :  { %6907 = vst [vmem:[#allocation13_spill] sm:$0xff] %v5754_v5  ;;  %v950_v37 = vpop.f32.mrb[65].mxu0  ;;  %v5760_v48 = vpop.f32.mrb[33].mxu1  ;;  %3086 = vmatprep.subr.bf16.mxu1 %v4723_v18  ;;  %v4724_v18 = vld [vmem:[%s6839_s5 + $0x1f0] ss:$8 sps:$4 sm:$0xff]  }
 0x1f8   :  { %6908 = vst [vmem:[#allocation14_spill] sm:$0xff] %v5760_v48  ;;  %v952_v60 = vpop.f32.mrb[66].mxu0  ;;  %v5766_v63 = vpop.f32.mrb[34].mxu1  ;;  %2967 = vmatprep.mubr.bf16.mxu1 %v2026_v15  ;;  %v4760_v15 = vld [vmem:[%s6839_s5 + $0x330] ss:$8 sps:$4 sm:$0xff]  }
 0x1f9   :  { %6909 = vst [vmem:[#allocation15_spill] sm:$0xff] %v5766_v63  ;;  %v1670_v54 = vpack.c.bf16 %v952_v60, %v948_v61  ;;  %v954_v22 = vpop.f32.mrb[67].mxu0  ;;  %v5770_v56 = vpop.f32.mrb[35].mxu1  ;;  %2968 = vmatmul.mubr.bf16.gmra.mrb[92].mxu1 %v2025_v42  ;;  %v4729_v60 = vld [vmem:[%s6839_s5 + $0x204] ss:$8 sps:$4 sm:$0xff]  }
 0x1fa   :  { %6910 = vst [vmem:[#allocation16_spill] sm:$0xff] %v5770_v56  ;;  %v1671_v9 = vpack.c.bf16 %v954_v22, %v950_v37  ;;  %3087 = vmatpush1.bf16.msra.mxu1 %v4721_v52  ;;  %v4762_v52 = vld [vmem:[%s6839_s5 + $0x334] ss:$8 sps:$4 sm:$0xff]  }
 0x1fb   :  { %v1905_v3 = vadd.bf16 %v5506_v47, %v1670_v54  ;;  %1476 = vmatmul.mubr.bf16.gmra.mrb[172].mxu0 %v5199_v27  ;;  %3088 = vmatprep.subr.bf16.mxu1 %v4726_v25 }
 0x1fc   :  { %v1906_v61 = vadd.bf16 %v5511_v50, %v1671_v9  ;;  %1485 = vmatprep.mubr.bf16.mxu0 %v6870_v35  ;;  %3450 = vmatprep.subr.bf16.mxu0 %v4762_v52  ;;  %v4768_v52 = vld [vmem:[%s6839_s5 + $0x344] ss:$8 sps:$4 sm:$0xff]  }
 0x1fd   :  { %v2033_v9 = vmax.bf16 %v6870_v35, %v1905_v3  ;;  %3451 = vmatpush1.bf16.msra.mxu0 %v4760_v15  ;;  %v4766_v15 = vld [vmem:[%s6839_s5 + $0x340] ss:$8 sps:$4 sm:$0xff]  }
 0x1fe   :  { %v958_v37 = vpop.f32.mrb[68].mxu0  ;;  %v5790_v42 = vpop.f32.mrb[36].mxu1  ;;  %v2034_v27 = vmax.bf16 %v6870_v35, %v1906_v61  ;;  %3089 = vmatpush1.bf16.msra.mxu1 %v4724_v18  ;;  %3452 = vmatprep.subr.bf16.mxu0 %v4768_v52 }
 0x1ff   :  { %6911 = vst [vmem:[#allocation17_spill] sm:$0xff] %v5790_v42  ;;  %v960_v25 = vpop.f32.mrb[69].mxu0  ;;  %v5793_v54 = vpop.f32.mrb[37].mxu1  ;;  %3251 = vmatprep.subr.bf16.mxu1 %v4729_v60 }
 0x200   :  { %6912 = vst [vmem:[#allocation18_spill] sm:$0xff] %v5793_v54  ;;  %v962_v22 = vpop.f32.mrb[70].mxu0  ;;  %v5796_v13 = vpop.f32.mrb[38].mxu1  ;;  %2977 = vmatprep.mubr.bf16.mxu1 %v2034_v27 }
 0x201   :  { %6913 = vst [vmem:[#allocation19_spill] sm:$0xff] %v5796_v13  ;;  %v1678_v62 = vpack.c.bf16 %v962_v22, %v958_v37  ;;  %v964_v63 = vpop.f32.mrb[71].mxu0  ;;  %v5800_v48 = vpop.f32.mrb[39].mxu1  ;;  %2978 = vmatmul.mubr.bf16.gmra.mrb[96].mxu1 %v2033_v9  ;;  %3453 = vmatpush1.bf16.msra.mxu0 %v4766_v15  ;;  %v4772_v15 = vld [vmem:[%s6839_s5 + $0x350] ss:$8 sps:$4 sm:$0xff]  }
 0x202   :  { %6914 = vst [vmem:[#allocation20_spill] sm:$0xff] %v5800_v48  ;;  %v1679_v18 = vpack.c.bf16 %v964_v63, %v960_v25 }
 0x203   :  { %v1913_v3 = vadd.bf16 %v5506_v47, %v1678_v62  ;;  %1486 = vmatmul.mubr.bf16.gmra.mrb[176].mxu0 %v5212_v40 }
 0x204   :  { %v1914_v60 = vadd.bf16 %v5511_v50, %v1679_v18  ;;  %1495 = vmatprep.mubr.bf16.mxu0 %v6870_v35 }
 0x205   :  { %v2041_v25 = vmax.bf16 %v6870_v35, %v1913_v3 }
 0x206   :  { %v968_v63 = vpop.f32.mrb[72].mxu0  ;;  %v5814_v37 = vpop.f32.mrb[40].mxu1  ;;  %v2042_v27 = vmax.bf16 %v6870_v35, %v1914_v60 }
 0x207   :  { %6915 = vst [vmem:[#allocation21_spill] sm:$0xff] %v5814_v37  ;;  %v970_v62 = vpop.f32.mrb[73].mxu0  ;;  %v5817_v40 = vpop.f32.mrb[41].mxu1 }
 0x208   :  { %6916 = vst [vmem:[#allocation22_spill] sm:$0xff] %v5817_v40  ;;  %v972_v9 = vpop.f32.mrb[74].mxu0  ;;  %v5820_v22 = vpop.f32.mrb[42].mxu1  ;;  %2987 = vmatprep.mubr.bf16.mxu1 %v2042_v27  ;;  %v5910_v40 = vld [vmem:[%s6839_s5 + $0x384] ss:$8 sps:$4 sm:$0xff]  }
 0x209   :  { %6917 = vst [vmem:[#allocation23_spill] sm:$0xff] %v5820_v22  ;;  %v1686_v18 = vpack.c.bf16 %v972_v9, %v968_v63  ;;  %v974_v61 = vpop.f32.mrb[75].mxu0  ;;  %v5824_v42 = vpop.f32.mrb[43].mxu1  ;;  %2988 = vmatmul.mubr.bf16.gmra.mrb[100].mxu1 %v2041_v25  ;;  %v5838_v63 = vld [vmem:[%s6839_s5 + $0x354] ss:$8 sps:$4 sm:$0xff]  }
 0x20a   :  { %6918 = vst [vmem:[#allocation24_spill] sm:$0xff] %v5824_v42  ;;  %v1687_v60 = vpack.c.bf16 %v974_v61, %v970_v62  ;;  %3454 = vmatprep.subr.bf16.mxu0 %v5838_v63 }
 0x20b   :  { %v1921_v13 = vadd.bf16 %v5506_v47, %v1686_v18  ;;  %1496 = vmatmul.mubr.bf16.gmra.mrb[180].mxu0 %v5245_v59 }
 0x20c   :  { %v1922_v3 = vadd.bf16 %v5511_v50, %v1687_v60  ;;  %1505 = vmatprep.mubr.bf16.mxu0 %v6870_v35  ;;  %3455 = vmatpush1.bf16.msra.mxu0 %v4772_v15  ;;  %v5862_v15 = vld [vmem:[%s6839_s5 + $0x360] ss:$8 sps:$4 sm:$0xff]  }
 0x20d   :  { %v2049_v9 = vmax.bf16 %v6870_v35, %v1921_v13 }
 0x20e   :  { %v978_v61 = vpop.f32.mrb[76].mxu0  ;;  %v5840_v27 = vpop.f32.mrb[44].mxu1  ;;  %v2050_v62 = vmax.bf16 %v6870_v35, %v1922_v3 }
 0x20f   :  { %6919 = vst [vmem:[#allocation25_spill] sm:$0xff] %v5840_v27  ;;  %v980_v59 = vpop.f32.mrb[77].mxu0  ;;  %v5844_v25 = vpop.f32.mrb[45].mxu1 }
 0x210   :  { %6920 = vst [vmem:[#allocation26_spill] sm:$0xff] %v5844_v25  ;;  %v982_v18 = vpop.f32.mrb[78].mxu0  ;;  %v5847_v60 = vpop.f32.mrb[46].mxu1  ;;  %2997 = vmatprep.mubr.bf16.mxu1 %v2050_v62 }
 0x211   :  { %6921 = vst [vmem:[#allocation27_spill] sm:$0xff] %v5847_v60  ;;  %v1694_v5 = vpack.c.bf16 %v982_v18, %v978_v61  ;;  %v984_v37 = vpop.f32.mrb[79].mxu0  ;;  %v5851_v22 = vpop.f32.mrb[47].mxu1  ;;  %2998 = vmatmul.mubr.bf16.gmra.mrb[104].mxu1 %v2049_v9 }
 0x212   :  { %6922 = vst [vmem:[#allocation28_spill] sm:$0xff] %v5851_v22  ;;  %v1695_v3 = vpack.c.bf16 %v984_v37, %v980_v59  ;;  %v5867_v37 = vld [vmem:[%s6839_s5 + $0x364] ss:$8 sps:$4 sm:$0xff]  }
 0x213   :  { %v1929_v42 = vadd.bf16 %v5506_v47, %v1694_v5  ;;  %1506 = vmatmul.mubr.bf16.gmra.mrb[184].mxu0 %v5260_v8  ;;  %3456 = vmatprep.subr.bf16.mxu0 %v5867_v37 }
 0x214   :  { %v1930_v13 = vadd.bf16 %v5511_v50, %v1695_v3  ;;  %1515 = vmatprep.mubr.bf16.mxu0 %v6870_v35  ;;  %3457 = vmatpush1.bf16.msra.mxu0 %v5862_v15 }
 0x215   :  { %v2057_v9 = vmax.bf16 %v6870_v35, %v1929_v42 }
 0x216   :  { %v988_v61 = vpop.f32.mrb[80].mxu0  ;;  %v5869_v62 = vpop.f32.mrb[48].mxu1  ;;  %v2058_v5 = vmax.bf16 %v6870_v35, %v1930_v13 }
 0x217   :  { %6923 = vst [vmem:[#allocation29_spill] sm:$0xff] %v5869_v62  ;;  %v990_v8 = vpop.f32.mrb[81].mxu0  ;;  %v5873_v59 = vpop.f32.mrb[49].mxu1 }
 0x218   :  { %6924 = vst [vmem:[#allocation30_spill] sm:$0xff] %v5873_v59  ;;  %v992_v18 = vpop.f32.mrb[82].mxu0  ;;  %v5877_v3 = vpop.f32.mrb[50].mxu1  ;;  %3007 = vmatprep.mubr.bf16.mxu1 %v2058_v5  ;;  %v5890_v5 = vld [vmem:[%s6839_s5 + $0x374] ss:$8 sps:$4 sm:$0xff]  }
 0x219   :  { %6925 = vst [vmem:[#allocation31_spill] sm:$0xff] %v5877_v3  ;;  %v1702_v52 = vpack.c.bf16 %v992_v18, %v988_v61  ;;  %v994_v27 = vpop.f32.mrb[83].mxu0  ;;  %v5881_v60 = vpop.f32.mrb[51].mxu1  ;;  %3008 = vmatmul.mubr.bf16.gmra.mrb[108].mxu1 %v2057_v9  ;;  %3458 = vmatprep.subr.bf16.mxu0 %v5890_v5 }
 0x21a   :  { %6926 = vst [vmem:[#allocation32_spill] sm:$0xff] %v5881_v60  ;;  %v1703_v13 = vpack.c.bf16 %v994_v27, %v990_v8  ;;  %v5897_v27 = vld [vmem:[%s6839_s5 + $0x370] ss:$8 sps:$4 sm:$0xff]  }
 0x21b   :  { %v1937_v42 = vadd.bf16 %v5506_v47, %v1702_v52  ;;  %1516 = vmatmul.mubr.bf16.gmra.mrb[188].mxu0 %v5277_v21 }
 0x21c   :  { %v1938_v61 = vadd.bf16 %v5511_v50, %v1703_v13  ;;  %1525 = vmatprep.mubr.bf16.mxu0 %v6870_v35  ;;  %3459 = vmatpush1.bf16.msra.mxu0 %v5897_v27 }
 0x21d   :  { %v2065_v13 = vmax.bf16 %v6870_v35, %v1937_v42  ;;  %3460 = vmatprep.subr.bf16.mxu0 %v5910_v40 }
 0x21e   :  { %v998_v8 = vpop.f32.mrb[84].mxu0  ;;  %v5900_v52 = vpop.f32.mrb[52].mxu1  ;;  %v2066_v21 = vmax.bf16 %v6870_v35, %v1938_v61  ;;  %v5917_v61 = vld [vmem:[%s6839_s5 + $0x380] ss:$8 sps:$4 sm:$0xff]  }
 0x21f   :  { %6927 = vst [vmem:[#allocation33_spill] sm:$0xff] %v5900_v52  ;;  %v1000_v9 = vpop.f32.mrb[85].mxu0  ;;  %v5904_v18 = vpop.f32.mrb[53].mxu1  ;;  %v5952_v52 = vld [vmem:[%s6839_s5 + $0x3a4] ss:$8 sps:$4 sm:$0xff]  }
 0x220   :  { %6928 = vst [vmem:[#allocation34_spill] sm:$0xff] %v5904_v18  ;;  %v1002_v25 = vpop.f32.mrb[86].mxu0  ;;  %v5912_v62 = vpop.f32.mrb[54].mxu1  ;;  %3017 = vmatprep.mubr.bf16.mxu1 %v2066_v21  ;;  %3461 = vmatpush1.bf16.msra.mxu0 %v5917_v61 }
 0x221   :  { %6929 = vst [vmem:[#allocation35_spill] sm:$0xff] %v5912_v62  ;;  %v1710_v3 = vpack.c.bf16 %v1002_v25, %v998_v8  ;;  %v1004_v60 = vpop.f32.mrb[87].mxu0  ;;  %v5921_v42 = vpop.f32.mrb[55].mxu1  ;;  %3018 = vmatmul.mubr.bf16.gmra.mrb[112].mxu1 %v2065_v13  ;;  %v5932_v25 = vld [vmem:[%s6839_s5 + $0x394] ss:$8 sps:$4 sm:$0xff]   ;;  %v6931_v13 = vmov 0  }
 0x222   :  { %6930 = vst [vmem:[#allocation36_spill] sm:$0xff] %v5921_v42  ;;  %v1711_v35 = vpack.c.bf16 %v1004_v60, %v1000_v9  ;;  %v5939_v60 = vld [vmem:[%s6839_s5 + $0x390] ss:$8 sps:$4 sm:$0xff]   ;;  %3462 = vmatprep.subr.bf16.mxu0 %v5932_v25 }
 0x223   :  { %v1945_v21 = vadd.bf16 %v5506_v47, %v1710_v3  ;;  %1526 = vmatmul.mubr.bf16.gmra.mrb[192].mxu0 %v5286_v32 }
 0x224   :  { %v1946_v8 = vadd.bf16 %v5511_v50, %v1711_v35  ;;  %1535 = vmatprep.mubr.bf16.mxu0 %v6931_v13  ;;  %3463 = vmatpush1.bf16.msra.mxu0 %v5939_v60 }
 0x225   :  { %v2073_v35 = vmax.bf16 %v6931_v13, %v1945_v21  ;;  %3464 = vmatprep.subr.bf16.mxu0 %v5952_v52 }
 0x226   :  { %v1008_v9 = vpop.f32.mrb[88].mxu0  ;;  %v5942_v3 = vpop.f32.mrb[56].mxu1  ;;  %v2074_v32 = vmax.bf16 %v6931_v13, %v1946_v8  ;;  %v5959_v8 = vld [vmem:[%s6839_s5 + $0x3a0] ss:$8 sps:$4 sm:$0xff]  }
 0x227   :  { %6932 = vst [vmem:[#allocation37_spill] sm:$0xff] %v5942_v3  ;;  %v1010_v59 = vpop.f32.mrb[89].mxu0  ;;  %v5946_v22 = vpop.f32.mrb[57].mxu1  ;;  %6935 = vst [vmem:[#allocation40_spill] sm:$0xff] %v5959_v8  ;;  %v5996_v3 = vld [vmem:[%s6839_s5 + $0x3c4] ss:$8 sps:$4 sm:$0xff]  }
 0x228   :  { %6933 = vst [vmem:[#allocation38_spill] sm:$0xff] %v5946_v22  ;;  %v1012_v62 = vpop.f32.mrb[90].mxu0  ;;  %v5954_v18 = vpop.f32.mrb[58].mxu1  ;;  %3027 = vmatprep.mubr.bf16.mxu1 %v2074_v32  ;;  %3465 = vmatpush1.bf16.msra.mxu0 %v5959_v8 }
 0x229   :  { %6934 = vst [vmem:[#allocation39_spill] sm:$0xff] %v5954_v18  ;;  %v1718_v42 = vpack.c.bf16 %v1012_v62, %v1008_v9  ;;  %v1014_v48 = vpop.f32.mrb[91].mxu0  ;;  %v5963_v21 = vpop.f32.mrb[59].mxu1  ;;  %3028 = vmatmul.mubr.bf16.gmra.mrb[116].mxu1 %v2073_v35  ;;  %v5974_v62 = vld [vmem:[%s6839_s5 + $0x3b4] ss:$8 sps:$4 sm:$0xff]  }
 0x22a   :  { %6936 = vst [vmem:[#allocation41_spill] sm:$0xff] %v5963_v21  ;;  %v1719_v56 = vpack.c.bf16 %v1014_v48, %v1010_v59  ;;  %6937 = vst [vmem:[#allocation42_spill] sm:$0xff] %v5974_v62  ;;  %v5981_v48 = vld [vmem:[%s6839_s5 + $0x3b0] ss:$8 sps:$4 sm:$0xff]   ;;  %3466 = vmatprep.subr.bf16.mxu0 %v5974_v62  ;;  %v6005_v21 = vld [vmem:[%s6839_s5 + $0x3c0] ss:$8 sps:$4 sm:$0xff]  }
 0x22b   :  { %v1953_v32 = vadd.bf16 %v5506_v47, %v1718_v42  ;;  %1536 = vmatmul.mubr.bf16.gmra.mrb[196].mxu0 %v5303_v45  ;;  %6938 = vst [vmem:[#allocation43_spill] sm:$0xff] %v5981_v48 }
 0x22c   :  { %v1954_v9 = vadd.bf16 %v5511_v50, %v1719_v56  ;;  %1545 = vmatprep.mubr.bf16.mxu0 %v6931_v13  ;;  %3467 = vmatpush1.bf16.msra.mxu0 %v5981_v48 }
 0x22d   :  { %v2081_v56 = vmax.bf16 %v6931_v13, %v1953_v32  ;;  %3468 = vmatprep.subr.bf16.mxu0 %v5996_v3 }
 0x22e   :  { %v1018_v59 = vpop.f32.mrb[92].mxu0  ;;  %v5984_v42 = vpop.f32.mrb[60].mxu1  ;;  %v2082_v45 = vmax.bf16 %v6931_v13, %v1954_v9  ;;  %v1783_v9 = vcombine.high %v5490_v36, %v5490_v36 }
 0x22f   :  { %6939 = vst [vmem:[#allocation44_spill] sm:$0xff] %v5984_v42  ;;  %v1020_v35 = vpop.f32.mrb[93].mxu0  ;;  %v5988_v54 = vpop.f32.mrb[61].mxu1 }
 0x230   :  { %6940 = vst [vmem:[#allocation45_spill] sm:$0xff] %v5988_v54  ;;  %v1022_v18 = vpop.f32.mrb[94].mxu0  ;;  %v5998_v22 = vpop.f32.mrb[62].mxu1  ;;  %3037 = vmatprep.mubr.bf16.mxu1 %v2082_v45  ;;  %3469 = vmatpush1.bf16.msra.mxu0 %v6005_v21  ;;  %v1807_v34 = vpack.i.b16 %v1783_v9, %v1783_v9 }
 0x231   :  { %6941 = vst [vmem:[#allocation46_spill] sm:$0xff] %v5998_v22  ;;  %v1726_v32 = vpack.c.bf16 %v1022_v18, %v1018_v59  ;;  %v1024_v48 = vpop.f32.mrb[95].mxu0  ;;  %v6009_v62 = vpop.f32.mrb[63].mxu1  ;;  %3038 = vmatmul.mubr.bf16.gmra.mrb[120].mxu1 %v2081_v56  ;;  %v1800_v18 = vpack.i.b16 %v1781_v17, %v1781_v17  ;;  %v6020_v59 = vld [vmem:[%s6839_s5 + $0x3d4] ss:$8 sps:$4 sm:$0xff]  }
 0x232   :  { %6942 = vst [vmem:[#allocation47_spill] sm:$0xff] %v6009_v62  ;;  %v1727_v8 = vpack.c.bf16 %v1024_v48, %v1020_v35  ;;  %v6027_v48 = vld [vmem:[%s6839_s5 + $0x3d0] ss:$8 sps:$4 sm:$0xff]   ;;  %3470 = vmatprep.subr.bf16.mxu0 %v6020_v59 }
 0x233   :  { %v1961_v36 = vadd.bf16 %v5506_v47, %v1726_v32  ;;  %1546 = vmatmul.mubr.bf16.gmra.mrb[200].mxu0 %v5310_v53  ;;  %v6033_v35 = vrot.slane %v1800_v18, %v5496_v38  ;;  %v6042_v32 = vrot.slane %v1807_v34, %v5496_v38  ;;  %v6056_v34 = vld [vmem:[%s6839_s5 + $0x3f4] ss:$8 sps:$4 sm:$0xff]  }
 0x234   :  { %v1962_v56 = vadd.bf16 %v5511_v50, %v1727_v8  ;;  %1555 = vmatprep.mubr.bf16.mxu0 %v6931_v13  ;;  %3471 = vmatpush1.bf16.msra.mxu0 %v6027_v48  ;;  %v6039_v8 = vld [vmem:[%s6839_s5 + $0x3e4] ss:$8 sps:$4 sm:$0xff]   ;;  %6944 = vst [vmem:[#allocation49_spill] sm:$0xff] %v6056_v34 }
 0x235   :  { %v2089_v50 = vmax.bf16 %v6931_v13, %v1961_v36  ;;  %3472 = vmatprep.subr.bf16.mxu0 %v6039_v8 }
 0x236   :  { %v1061_v47 = vpop.f32.mrb[96].mxu0  ;;  %v2090_v53 = vmax.bf16 %v6931_v13, %v1962_v56  ;;  %v6047_v56 = vld [vmem:[%s6839_s5 + $0x3e0] ss:$8 sps:$4 sm:$0xff]  }
 0x237   :  { %v1063_v17 = vpop.f32.mrb[97].mxu0  ;;  %6943 = vst [vmem:[#allocation48_spill] sm:$0xff] %v6047_v56 }
 0x238   :  { %v1065_v9 = vpop.f32.mrb[98].mxu0  ;;  %3047 = vmatprep.mubr.bf16.mxu1 %v2090_v53  ;;  %3473 = vmatpush1.bf16.msra.mxu0 %v6047_v56 }
 0x239   :  { %v1608_v45 = vpack.c.bf16 %v1065_v9, %v1061_v47  ;;  %v1067_v18 = vpop.f32.mrb[99].mxu0  ;;  %3048 = vmatmul.mubr.bf16.gmra.mrb[124].mxu1 %v2089_v50  ;;  %v6063_v47 = vld [vmem:[%s6839_s5 + $0x3f0] ss:$8 sps:$4 sm:$0xff]   ;;  %3474 = vmatprep.subr.bf16.mxu0 %v6056_v34 }
 0x23a   :  { %v1609_v36 = vpack.c.bf16 %v1067_v18, %v1063_v17  ;;  %6945 = vst [vmem:[#allocation50_spill] sm:$0xff] %v6063_v47  ;;  %v4732_v18 = vld [vmem:[%s6839_s5 + $0x214] ss:$8 sps:$4 sm:$0xff]  }
 0x23b   :  { %v1843_v42 = vadd.bf16 %v6033_v35, %v1608_v45  ;;  %1556 = vmatmul.mubr.bf16.gmra.mrb[204].mxu0 %v5324_v4  ;;  %v4727_v4 = vld [vmem:[%s6839_s5 + $0x200] ss:$8 sps:$4 sm:$0xff]  }
 0x23c   :  { %v1844_v53 = vadd.bf16 %v6042_v32, %v1609_v36  ;;  %1565 = vmatprep.mubr.bf16.mxu0 %v6931_v13  ;;  %3475 = vmatpush1.bf16.msra.mxu0 %v6063_v47 }
 0x23d   :  { %v1971_v50 = vmax.bf16 %v6931_v13, %v1843_v42  ;;  %v4735_v42 = vld [vmem:[%s6839_s5 + $0x224] ss:$8 sps:$4 sm:$0xff]  }
 0x23e   :  { %v1071_v17 = vpop.f32.mrb[100].mxu0  ;;  %v1972_v45 = vmax.bf16 %v6931_v13, %v1844_v53  ;;  %v4730_v53 = vld [vmem:[%s6839_s5 + $0x210] ss:$8 sps:$4 sm:$0xff]  }
 0x23f   :  { %v1073_v9 = vpop.f32.mrb[101].mxu0 }
 0x240   :  { %v1075_v36 = vpop.f32.mrb[102].mxu0  ;;  %3090 = vmatprep.mubr.bf16.mxu1 %v1972_v45 }
 0x241   :  { %v1616_v22 = vpack.c.bf16 %v1075_v36, %v1071_v17  ;;  %v1077_v54 = vpop.f32.mrb[103].mxu0  ;;  %3091 = vmatmul.mubr.bf16.vlgmr.msra.gmra.mrb[64].mxu1 %v1971_v50  ;;  %v4738_v50 = vld [vmem:[%s6839_s5 + $0x234] ss:$8 sps:$4 sm:$0xff]  }
 0x242   :  { %v1617_v62 = vpack.c.bf16 %v1077_v54, %v1073_v9  ;;  %3252 = vmatpush1.bf16.msra.mxu1 %v4727_v4  ;;  %v4733_v4 = vld [vmem:[%s6839_s5 + $0x220] ss:$8 sps:$4 sm:$0xff]  }
 0x243   :  { %v1851_v47 = vadd.bf16 %v6033_v35, %v1616_v22  ;;  %1566 = vmatmul.mubr.bf16.gmra.mrb[208].mxu0 %v5328_v12  ;;  %3253 = vmatprep.subr.bf16.mxu1 %v4732_v18 }
 0x244   :  { %v1852_v45 = vadd.bf16 %v6042_v32, %v1617_v62  ;;  %1575 = vmatprep.mubr.bf16.mxu0 %v6931_v13 }
 0x245   :  { %v1979_v12 = vmax.bf16 %v6931_v13, %v1851_v47  ;;  %v4741_v47 = vld [vmem:[%s6839_s5 + $0x244] ss:$8 sps:$4 sm:$0xff]  }
 0x246   :  { %v1081_v17 = vpop.f32.mrb[104].mxu0  ;;  %v1980_v54 = vmax.bf16 %v6931_v13, %v1852_v45  ;;  %3254 = vmatpush1.bf16.msra.mxu1 %v4730_v53  ;;  %v4736_v53 = vld [vmem:[%s6839_s5 + $0x230] ss:$8 sps:$4 sm:$0xff]  }
 0x247   :  { %v1083_v22 = vpop.f32.mrb[105].mxu0  ;;  %3255 = vmatprep.subr.bf16.mxu1 %v4735_v42 }
 0x248   :  { %v1085_v9 = vpop.f32.mrb[106].mxu0  ;;  %3100 = vmatprep.mubr.bf16.mxu1 %v1980_v54 }
 0x249   :  { %v1624_v62 = vpack.c.bf16 %v1085_v9, %v1081_v17  ;;  %v1087_v18 = vpop.f32.mrb[107].mxu0  ;;  %3101 = vmatmul.mubr.bf16.gmra.mrb[68].mxu1 %v1979_v12  ;;  %v4747_v12 = vld [vmem:[%s6839_s5 + $0x254] ss:$8 sps:$4 sm:$0xff]  }
 0x24a   :  { %v1625_v36 = vpack.c.bf16 %v1087_v18, %v1083_v22  ;;  %3256 = vmatpush1.bf16.msra.mxu1 %v4733_v4  ;;  %v4739_v4 = vld [vmem:[%s6839_s5 + $0x240] ss:$8 sps:$4 sm:$0xff]  }
 0x24b   :  { %v1859_v45 = vadd.bf16 %v6033_v35, %v1624_v62  ;;  %1576 = vmatmul.mubr.bf16.gmra.mrb[212].mxu0 %v5342_v23  ;;  %3257 = vmatprep.subr.bf16.mxu1 %v4738_v50 }
 0x24c   :  { %v1860_v42 = vadd.bf16 %v6042_v32, %v1625_v36  ;;  %1585 = vmatprep.mubr.bf16.mxu0 %v6931_v13  ;;  %v4745_v36 = vld [vmem:[%s6839_s5 + $0x250] ss:$8 sps:$4 sm:$0xff]  }
 0x24d   :  { %v1987_v23 = vmax.bf16 %v6931_v13, %v1859_v45  ;;  %v4753_v45 = vld [vmem:[%s6839_s5 + $0x264] ss:$8 sps:$4 sm:$0xff]  }
 0x24e   :  { %v1091_v17 = vpop.f32.mrb[108].mxu0  ;;  %v1988_v54 = vmax.bf16 %v6931_v13, %v1860_v42  ;;  %3258 = vmatpush1.bf16.msra.mxu1 %v4736_v53 }
 0x24f   :  { %v1093_v22 = vpop.f32.mrb[109].mxu0  ;;  %3259 = vmatprep.subr.bf16.mxu1 %v4741_v47 }
 0x250   :  { %v1095_v50 = vpop.f32.mrb[110].mxu0  ;;  %3110 = vmatprep.mubr.bf16.mxu1 %v1988_v54  ;;  %v4751_v54 = vld [vmem:[%s6839_s5 + $0x260] ss:$8 sps:$4 sm:$0xff]  }
 0x251   :  { %v1632_v9 = vpack.c.bf16 %v1095_v50, %v1091_v17  ;;  %v1097_v62 = vpop.f32.mrb[111].mxu0  ;;  %3111 = vmatmul.mubr.bf16.gmra.mrb[72].mxu1 %v1987_v23 }
 0x252   :  { %v1633_v18 = vpack.c.bf16 %v1097_v62, %v1093_v22  ;;  %3260 = vmatpush1.bf16.msra.mxu1 %v4739_v4  ;;  %v4759_v22 = vld [vmem:[%s6839_s5 + $0x274] ss:$8 sps:$4 sm:$0xff]   ;;  %v4757_v62 = vld [vmem:[%s6839_s5 + $0x270] ss:$8 sps:$4 sm:$0xff]  }
 0x253   :  { %v1867_v53 = vadd.bf16 %v6033_v35, %v1632_v9  ;;  %1586 = vmatmul.mubr.bf16.gmra.mrb[216].mxu0 %v5346_v31  ;;  %3261 = vmatprep.subr.bf16.mxu1 %v4747_v12 }
 0x254   :  { %v1868_v47 = vadd.bf16 %v6042_v32, %v1633_v18  ;;  %1595 = vmatprep.mubr.bf16.mxu0 %v6931_v13 }
 0x255   :  { %v1995_v31 = vmax.bf16 %v6931_v13, %v1867_v53 }
 0x256   :  { %v1101_v42 = vpop.f32.mrb[112].mxu0  ;;  %v1996_v17 = vmax.bf16 %v6931_v13, %v1868_v47  ;;  %3262 = vmatpush1.bf16.msra.mxu1 %v4745_v36  ;;  %v4765_v36 = vld [vmem:[%s6839_s5 + $0x284] ss:$8 sps:$4 sm:$0xff]  }
 0x257   :  { %v1103_v4 = vpop.f32.mrb[113].mxu0  ;;  %3263 = vmatprep.subr.bf16.mxu1 %v4753_v45 }
 0x258   :  { %v1105_v23 = vpop.f32.mrb[114].mxu0  ;;  %3120 = vmatprep.mubr.bf16.mxu1 %v1996_v17 }
 0x259   :  { %v1640_v12 = vpack.c.bf16 %v1105_v23, %v1101_v42  ;;  %v1107_v50 = vpop.f32.mrb[115].mxu0  ;;  %3121 = vmatmul.mubr.bf16.gmra.mrb[76].mxu1 %v1995_v31  ;;  %v4763_v42 = vld [vmem:[%s6839_s5 + $0x280] ss:$8 sps:$4 sm:$0xff]  }
 0x25a   :  { %v1641_v9 = vpack.c.bf16 %v1107_v50, %v1103_v4  ;;  %3264 = vmatpush1.bf16.msra.mxu1 %v4751_v54 }
 0x25b   :  { %v1875_v18 = vadd.bf16 %v6033_v35, %v1640_v12  ;;  %1596 = vmatmul.mubr.bf16.gmra.mrb[220].mxu0 %v5359_v39  ;;  %3265 = vmatprep.subr.bf16.mxu1 %v4759_v22  ;;  %v4771_v39 = vld [vmem:[%s6839_s5 + $0x294] ss:$8 sps:$4 sm:$0xff]   ;;  %v4769_v12 = vld [vmem:[%s6839_s5 + $0x290] ss:$8 sps:$4 sm:$0xff]  }
 0x25c   :  { %v1876_v53 = vadd.bf16 %v6042_v32, %v1641_v9  ;;  %v4777_v9 = vld [vmem:[%s6839_s5 + $0x2a4] ss:$8 sps:$4 sm:$0xff]  }
 0x25d   :  { %v2003_v54 = vmax.bf16 %v6931_v13, %v1875_v18 }
 0x25e   :  { %v1111_v45 = vpop.f32.mrb[116].mxu0  ;;  %v2004_v47 = vmax.bf16 %v6931_v13, %v1876_v53  ;;  %3266 = vmatpush1.bf16.msra.mxu1 %v4757_v62  ;;  %v4775_v53 = vld [vmem:[%s6839_s5 + $0x2a0] ss:$8 sps:$4 sm:$0xff]  }
 0x25f   :  { %v1113_v17 = vpop.f32.mrb[117].mxu0  ;;  %3267 = vmatprep.subr.bf16.mxu1 %v4765_v36 }
 0x260   :  { %v1115_v4 = vpop.f32.mrb[118].mxu0  ;;  %3130 = vmatprep.mubr.bf16.mxu1 %v2004_v47 }
 0x261   :  { %v1648_v31 = vpack.c.bf16 %v1115_v4, %v1111_v45  ;;  %v1117_v22 = vpop.f32.mrb[119].mxu0  ;;  %3131 = vmatmul.mubr.bf16.gmra.mrb[80].mxu1 %v2003_v54 }
 0x262   :  { %v1649_v23 = vpack.c.bf16 %v1117_v22, %v1113_v17  ;;  %3268 = vmatpush1.bf16.msra.mxu1 %v4763_v42  ;;  %v4783_v42 = vld [vmem:[%s6839_s5 + $0x2b4] ss:$8 sps:$4 sm:$0xff]  }
 0x263   :  { %v1883_v50 = vadd.bf16 %v6033_v35, %v1648_v31  ;;  %3269 = vmatprep.subr.bf16.mxu1 %v4771_v39  ;;  %v4781_v31 = vld [vmem:[%s6839_s5 + $0x2b0] ss:$8 sps:$4 sm:$0xff]  }
 0x264   :  { %v1884_v62 = vadd.bf16 %v6042_v32, %v1649_v23  ;;  %v4789_v23 = vld [vmem:[%s6839_s5 + $0x2c4] ss:$8 sps:$4 sm:$0xff]  }
 0x265   :  { %v2011_v47 = vmax.bf16 %v6931_v13, %v1883_v50 }
 0x266   :  { %v1121_v18 = vpop.f32.mrb[120].mxu0  ;;  %v2012_v36 = vmax.bf16 %v6931_v13, %v1884_v62  ;;  %3270 = vmatpush1.bf16.msra.mxu1 %v4769_v12  ;;  %v4787_v62 = vld [vmem:[%s6839_s5 + $0x2c0] ss:$8 sps:$4 sm:$0xff]  }
 0x267   :  { %v1123_v45 = vpop.f32.mrb[121].mxu0  ;;  %3271 = vmatprep.subr.bf16.mxu1 %v4777_v9 }
 0x268   :  { %v1125_v17 = vpop.f32.mrb[122].mxu0  ;;  %3140 = vmatprep.mubr.bf16.mxu1 %v2012_v36 }
 0x269   :  { %v1656_v54 = vpack.c.bf16 %v1125_v17, %v1121_v18  ;;  %v1127_v39 = vpop.f32.mrb[123].mxu0  ;;  %3141 = vmatmul.mubr.bf16.gmra.mrb[84].mxu1 %v2011_v47 }
 0x26a   :  { %v1657_v4 = vpack.c.bf16 %v1127_v39, %v1123_v45  ;;  %3272 = vmatpush1.bf16.msra.mxu1 %v4775_v53  ;;  %v4798_v53 = vld [vmem:[%s6839_s5 + $0x2d4] ss:$8 sps:$4 sm:$0xff]  }
 0x26b   :  { %v1891_v22 = vadd.bf16 %v6033_v35, %v1656_v54  ;;  %3273 = vmatprep.subr.bf16.mxu1 %v4783_v42  ;;  %v4796_v54 = vld [vmem:[%s6839_s5 + $0x2d0] ss:$8 sps:$4 sm:$0xff]  }
 0x26c   :  { %v1892_v12 = vadd.bf16 %v6042_v32, %v1657_v4  ;;  %v4807_v4 = vld [vmem:[%s6839_s5 + $0x2e4] ss:$8 sps:$4 sm:$0xff]  }
 0x26d   :  { %v2019_v36 = vmax.bf16 %v6931_v13, %v1891_v22 }
 0x26e   :  { %v1131_v50 = vpop.f32.mrb[124].mxu0  ;;  %v2020_v9 = vmax.bf16 %v6931_v13, %v1892_v12  ;;  %3274 = vmatpush1.bf16.msra.mxu1 %v4781_v31  ;;  %v4805_v12 = vld [vmem:[%s6839_s5 + $0x2e0] ss:$8 sps:$4 sm:$0xff]  }
 0x26f   :  { %v1133_v18 = vpop.f32.mrb[125].mxu0  ;;  %3275 = vmatprep.subr.bf16.mxu1 %v4789_v23 }
 0x270   :  { %v1135_v45 = vpop.f32.mrb[126].mxu0  ;;  %3150 = vmatprep.mubr.bf16.mxu1 %v2020_v9 }
 0x271   :  { %v1664_v47 = vpack.c.bf16 %v1135_v45, %v1131_v50  ;;  %v1137_v42 = vpop.f32.mrb[127].mxu0  ;;  %3151 = vmatmul.mubr.bf16.gmra.mrb[88].mxu1 %v2019_v36 }
 0x272   :  { %v1665_v17 = vpack.c.bf16 %v1137_v42, %v1133_v18  ;;  %3276 = vmatpush1.bf16.msra.mxu1 %v4787_v62  ;;  %v4816_v62 = vld [vmem:[%s6839_s5 + $0x2f4] ss:$8 sps:$4 sm:$0xff]  }
 0x273   :  { %v1899_v39 = vadd.bf16 %v6033_v35, %v1664_v47  ;;  %3277 = vmatprep.subr.bf16.mxu1 %v4798_v53  ;;  %v4814_v47 = vld [vmem:[%s6839_s5 + $0x2f0] ss:$8 sps:$4 sm:$0xff]  }
 0x274   :  { %v1900_v31 = vadd.bf16 %v6042_v32, %v1665_v17 }
 0x275   :  { %v2027_v9 = vmax.bf16 %v6931_v13, %v1899_v39 }
 0x276   :  { %v1141_v22 = vpop.f32.mrb[128].mxu0  ;;  %v2028_v23 = vmax.bf16 %v6931_v13, %v1900_v31  ;;  %3278 = vmatpush1.bf16.msra.mxu1 %v4796_v54 }
 0x277   :  { %v1143_v50 = vpop.f32.mrb[129].mxu0  ;;  %3279 = vmatprep.subr.bf16.mxu1 %v4807_v4 }
 0x278   :  { %v1145_v18 = vpop.f32.mrb[130].mxu0  ;;  %3160 = vmatprep.mubr.bf16.mxu1 %v2028_v23 }
 0x279   :  { %v1672_v36 = vpack.c.bf16 %v1145_v18, %v1141_v22  ;;  %v1147_v53 = vpop.f32.mrb[131].mxu0  ;;  %3161 = vmatmul.mubr.bf16.gmra.mrb[92].mxu1 %v2027_v9 }
 0x27a   :  { %v1673_v45 = vpack.c.bf16 %v1147_v53, %v1143_v50  ;;  %3280 = vmatpush1.bf16.msra.mxu1 %v4805_v12 }
 0x27b   :  { %v1907_v42 = vadd.bf16 %v6033_v35, %v1672_v36  ;;  %3281 = vmatprep.subr.bf16.mxu1 %v4816_v62 }
 0x27c   :  { %v1908_v17 = vadd.bf16 %v6042_v32, %v1673_v45 }
 0x27d   :  { %v2035_v31 = vmax.bf16 %v6931_v13, %v1907_v42 }
 0x27e   :  { %v1151_v54 = vpop.f32.mrb[132].mxu0  ;;  %v2036_v39 = vmax.bf16 %v6931_v13, %v1908_v17  ;;  %3282 = vmatpush1.bf16.msra.mxu1 %v4814_v47 }
 0x27f   :  { %v1153_v4 = vpop.f32.mrb[133].mxu0  ;;  %4403 = vmatprep.subr.bf16.mxu1 %v5679_v14 }
 0x280   :  { %v1155_v22 = vpop.f32.mrb[134].mxu0  ;;  %3170 = vmatprep.mubr.bf16.mxu1 %v2036_v39 }
 0x281   :  { %v1680_v23 = vpack.c.bf16 %v1155_v22, %v1151_v54  ;;  %v1157_v12 = vpop.f32.mrb[135].mxu0  ;;  %3171 = vmatmul.mubr.bf16.gmra.mrb[96].mxu1 %v2035_v31 }
 0x282   :  { %v1681_v50 = vpack.c.bf16 %v1157_v12, %v1153_v4 }
 0x283   :  { %v1915_v9 = vadd.bf16 %v6033_v35, %v1680_v23 }
 0x284   :  { %v1916_v62 = vadd.bf16 %v6042_v32, %v1681_v50 }
 0x285   :  { %v2043_v45 = vmax.bf16 %v6931_v13, %v1915_v9 }
 0x286   :  { %v1161_v18 = vpop.f32.mrb[136].mxu0  ;;  %v2044_v36 = vmax.bf16 %v6931_v13, %v1916_v62 }
 0x287   :  { %v1163_v53 = vpop.f32.mrb[137].mxu0 }
 0x288   :  { %v1165_v47 = vpop.f32.mrb[138].mxu0  ;;  %3180 = vmatprep.mubr.bf16.mxu1 %v2044_v36 }
 0x289   :  { %v1688_v42 = vpack.c.bf16 %v1165_v47, %v1161_v18  ;;  %v1167_v14 = vpop.f32.mrb[139].mxu0  ;;  %3181 = vmatmul.mubr.bf16.gmra.mrb[100].mxu1 %v2043_v45 }
 0x28a   :  { %v1689_v17 = vpack.c.bf16 %v1167_v14, %v1163_v53 }
 0x28b   :  { %v1923_v54 = vadd.bf16 %v6033_v35, %v1688_v42 }
 0x28c   :  { %v1924_v39 = vadd.bf16 %v6042_v32, %v1689_v17 }
 0x28d   :  { %v2051_v23 = vmax.bf16 %v6931_v13, %v1923_v54 }
 0x28e   :  { %v1171_v4 = vpop.f32.mrb[140].mxu0  ;;  %v2052_v31 = vmax.bf16 %v6931_v13, %v1924_v39 }
 0x28f   :  { %v1173_v22 = vpop.f32.mrb[141].mxu0 }
 0x290   :  { %v1175_v12 = vpop.f32.mrb[142].mxu0  ;;  %3190 = vmatprep.mubr.bf16.mxu1 %v2052_v31  ;;  %v4823_v31 = vld [vmem:[%s6841_s4] sm:$0xff] }
 0x291   :  { %v1696_v50 = vpack.c.bf16 %v1175_v12, %v1171_v4  ;;  %v1177_v9 = vpop.f32.mrb[143].mxu0  ;;  %3191 = vmatmul.mubr.bf16.gmra.mrb[104].mxu1 %v2051_v23 }
 0x292   :  { %v1697_v62 = vpack.c.bf16 %v1177_v9, %v1173_v22  ;;  %v1736_v22 = vcombine.high %v4823_v31, %v4823_v31 }
 0x293   :  { %v1931_v18 = vadd.bf16 %v6033_v35, %v1696_v50 }
 0x294   :  { %v1932_v36 = vadd.bf16 %v6042_v32, %v1697_v62 }
 0x295   :  { %v2059_v42 = vmax.bf16 %v6931_v13, %v1931_v18  ;;  %v1750_v18 = vrot.slane %v1736_v22, %v5479_v29 }
 0x296   :  { %v1181_v53 = vpop.f32.mrb[144].mxu0  ;;  %v2060_v45 = vmax.bf16 %v6931_v13, %v1932_v36 }
 0x297   :  { %v1183_v47 = vpop.f32.mrb[145].mxu0 }
 0x298   :  { %v1185_v14 = vpop.f32.mrb[146].mxu0  ;;  %3200 = vmatprep.mubr.bf16.mxu1 %v2060_v45 }
 0x299   :  { %v1704_v17 = vpack.c.bf16 %v1185_v14, %v1181_v53  ;;  %v1187_v54 = vpop.f32.mrb[147].mxu0  ;;  %3201 = vmatmul.mubr.bf16.gmra.mrb[108].mxu1 %v2059_v42  ;;  %v1752_v14 = vcombine.high %v1750_v18, %v1750_v18 }
 0x29a   :  { %v1705_v39 = vpack.c.bf16 %v1187_v54, %v1183_v47 }
 0x29b   :  { %v1939_v4 = vadd.bf16 %v6033_v35, %v1704_v17 }
 0x29c   :  { %v1940_v23 = vadd.bf16 %v6042_v32, %v1705_v39 }
 0x29d   :  { %v2067_v62 = vmax.bf16 %v6931_v13, %v1939_v4  ;;  %v1780_v4 = vrot.slane %v1752_v14, %v5479_v29 }
 0x29e   :  { %v1191_v12 = vpop.f32.mrb[148].mxu0  ;;  %v2068_v50 = vmax.bf16 %v6931_v13, %v1940_v23 }
 0x29f   :  { %v1193_v9 = vpop.f32.mrb[149].mxu0 }
 0x2a0   :  { %v1195_v36 = vpop.f32.mrb[150].mxu0  ;;  %3210 = vmatprep.mubr.bf16.mxu1 %v2068_v50 }
 0x2a1   :  { %v1712_v53 = vpack.c.bf16 %v1195_v36, %v1191_v12  ;;  %v1197_v45 = vpop.f32.mrb[151].mxu0  ;;  %3211 = vmatmul.mubr.bf16.gmra.mrb[112].mxu1 %v2067_v62  ;;  %v1821_v36 = vpack.i.b16 %v1780_v4, %v1780_v4 }
 0x2a2   :  { %v1713_v47 = vpack.c.bf16 %v1197_v45, %v1193_v9  ;;  %v1766_v45 = vrot.slane %v1750_v18, %v5479_v29 }
 0x2a3   :  { %v1947_v42 = vadd.bf16 %v6033_v35, %v1712_v53 }
 0x2a4   :  { %v1948_v17 = vadd.bf16 %v6042_v32, %v1713_v47  ;;  %v1782_v14 = vcombine.high %v1766_v45, %v1766_v45 }
 0x2a5   :  { %v2075_v23 = vmax.bf16 %v6931_v13, %v1947_v42 }
 0x2a6   :  { %v1201_v54 = vpop.f32.mrb[152].mxu0  ;;  %v2076_v39 = vmax.bf16 %v6931_v13, %v1948_v17 }
 0x2a7   :  { %v1203_v31 = vpop.f32.mrb[153].mxu0 }
 0x2a8   :  { %v1205_v22 = vpop.f32.mrb[154].mxu0  ;;  %3220 = vmatprep.mubr.bf16.mxu1 %v2076_v39  ;;  %v6233_v39 = vrot.slane %v1821_v36, %v5496_v38 }
 0x2a9   :  { %v1720_v50 = vpack.c.bf16 %v1205_v22, %v1201_v54  ;;  %v1207_v12 = vpop.f32.mrb[155].mxu0  ;;  %3221 = vmatmul.mubr.bf16.gmra.mrb[116].mxu1 %v2075_v23 }
 0x2aa   :  { %v1721_v62 = vpack.c.bf16 %v1207_v12, %v1203_v31  ;;  %v1784_v31 = vcombine.high %v1780_v4, %v1780_v4  ;;  %v1814_v12 = vpack.i.b16 %v1766_v45, %v1766_v45 }
 0x2ab   :  { %v1955_v9 = vadd.bf16 %v6033_v35, %v1720_v50 }
 0x2ac   :  { %v1956_v53 = vadd.bf16 %v6042_v32, %v1721_v62  ;;  %v1828_v62 = vpack.i.b16 %v1782_v14, %v1782_v14  ;;  %v1835_v36 = vpack.i.b16 %v1784_v31, %v1784_v31  ;;  %v6243_v4 = vrot.slane %v1814_v12, %v5496_v38 }
 0x2ad   :  { %v2083_v42 = vmax.bf16 %v6931_v13, %v1955_v9  ;;  %v6947_v14 = vpack.c.bf16 %v5508_v49, %v5501_v43 }
 0x2ae   :  { %v1211_v47 = vpop.f32.mrb[156].mxu0  ;;  %v2084_v17 = vmax.bf16 %v6931_v13, %v1956_v53  ;;  %v6946_v53 = vpack.c.bf16 %v5515_v55, %v5503_v46  ;;  %v6250_v46 = vrot.slane %v1835_v36, %v5496_v38 }
 0x2af   :  { %v1213_v34 = vpop.f32.mrb[157].mxu0 }
 0x2b0   :  { %v1215_v54 = vpop.f32.mrb[158].mxu0  ;;  %3230 = vmatprep.mubr.bf16.mxu1 %v2084_v17  ;;  %v1846_v9 = vadd.bf16 %v6233_v39, %v6946_v53 }
 0x2b1   :  { %v1728_v23 = vpack.c.bf16 %v1215_v54, %v1211_v47  ;;  %v1217_v22 = vpop.f32.mrb[159].mxu0  ;;  %3231 = vmatmul.mubr.bf16.gmra.mrb[120].mxu1 %v2083_v42  ;;  %v1845_v54 = vadd.bf16 %v6243_v4, %v6947_v14 }
 0x2b2   :  { %v1729_v50 = vpack.c.bf16 %v1217_v22, %v1213_v34  ;;  %v6246_v34 = vrot.slane %v1828_v62, %v5496_v38  ;;  %v1974_v55 = vmax.bf16 %v6931_v13, %v1846_v9 }
 0x2b3   :  { %v1963_v18 = vadd.bf16 %v6033_v35, %v1728_v23  ;;  %v6948_v23 = vpack.c.bf16 %v5539_v16, %v5530_v6  ;;  %v4824_v16 = vld [vmem:[%s6839_s5 + $0x300] ss:$8 sps:$4 sm:$0xff]  }
 0x2b4   :  { %v1964_v29 = vadd.bf16 %v6042_v32, %v1729_v50 }
 0x2b5   :  { %v2091_v35 = vmax.bf16 %v6931_v13, %v1963_v18  ;;  %v1854_v22 = vadd.bf16 %v6233_v39, %v6948_v23  ;;  %v1973_v18 = vmax.bf16 %v6931_v13, %v1845_v54 }
 0x2b6   :  { %v1447_v56 = vpop.f32.mrb[160].mxu0  ;;  %v2092_v17 = vmax.bf16 %v6931_v13, %v1964_v29 }
 0x2b7   :  { %v1449_v47 = vpop.f32.mrb[161].mxu0  ;;  %v1982_v49 = vmax.bf16 %v6931_v13, %v1854_v22 }
 0x2b8   :  { %v1451_v45 = vpop.f32.mrb[162].mxu0  ;;  %3240 = vmatprep.mubr.bf16.mxu1 %v2092_v17  ;;  %v6949_v17 = vpack.c.bf16 %v5535_v10, %v5523_v57  ;;  %v4826_v57 = vld [vmem:[%s6839_s5 + $0x310] ss:$8 sps:$4 sm:$0xff]  }
 0x2b9   :  { %v1612_v32 = vpack.c.bf16 %v1451_v45, %v1447_v56  ;;  %v1453_v42 = vpop.f32.mrb[163].mxu0  ;;  %3241 = vmatmul.mubr.bf16.gmra.mrb[124].mxu1 %v2091_v35  ;;  %v4825_v45 = vld [vmem:[%s6839_s5 + $0x314] ss:$8 sps:$4 sm:$0xff]  }
 0x2ba   :  { %v1613_v29 = vpack.c.bf16 %v1453_v42, %v1449_v47  ;;  %3283 = vmatprep.mubr.bf16.mxu1 %v1974_v55  ;;  %v1853_v47 = vadd.bf16 %v6243_v4, %v6949_v17  ;;  %v6950_v55 = vpack.c.bf16 %v5569_v0, %v5559_v41  ;;  %v4827_v41 = vld [vmem:[%s6839_s5 + $0x324] ss:$8 sps:$4 sm:$0xff]  }
 0x2bb   :  { %v1847_v31 = vadd.bf16 %v6246_v34, %v1612_v32 }
 0x2bc   :  { %v1848_v50 = vadd.bf16 %v6250_v46, %v1613_v29  ;;  %v1862_v32 = vadd.bf16 %v6233_v39, %v6950_v55  ;;  %v1981_v54 = vmax.bf16 %v6931_v13, %v1853_v47 }
 0x2bd   :  { %v1975_v62 = vmax.bf16 %v6931_v13, %v1847_v31 }
 0x2be   :  { %v1457_v12 = vpop.f32.mrb[164].mxu0  ;;  %v1976_v56 = vmax.bf16 %v6931_v13, %v1848_v50  ;;  %v1990_v23 = vmax.bf16 %v6931_v13, %v1862_v32 }
 0x2bf   :  { %v1459_v53 = vpop.f32.mrb[165].mxu0 }
 0x2c0   :  { %v1461_v43 = vpop.f32.mrb[166].mxu0  ;;  %3476 = vmatprep.mubr.bf16.mxu0 %v1976_v56  ;;  %v4828_v56 = vld [vmem:[%s6839_s5 + $0x320] ss:$8 sps:$4 sm:$0xff]  }
 0x2c1   :  { %v1620_v9 = vpack.c.bf16 %v1461_v43, %v1457_v12  ;;  %v1463_v36 = vpop.f32.mrb[167].mxu0  ;;  %3284 = vmatmul.mubr.bf16.vlgmr.msra.gmra.mrb[64].mxu1 %v1973_v18  ;;  %3477 = vmatmul.mubr.bf16.vlgmr.msra.gmra.mrb[224].mxu0 %v1975_v62  ;;  %v6951_v18 = vpack.c.bf16 %v5565_v51, %v5553_v26  ;;  %v4829_v43 = vld [vmem:[%s6839_s5 + $0x334] ss:$8 sps:$4 sm:$0xff]   ;;  %v4830_v26 = vld [vmem:[%s6839_s5 + $0x330] ss:$8 sps:$4 sm:$0xff]  }
 0x2c2   :  { %v1621_v6 = vpack.c.bf16 %v1463_v36, %v1459_v53  ;;  %4419 = vmatpush1.bf16.msra.mxu1 %v4824_v16  ;;  %3293 = vmatprep.mubr.bf16.mxu1 %v1982_v49  ;;  %v6952_v49 = vpack.c.bf16 %v5599_v44, %v5589_v20  ;;  %v4831_v20 = vld [vmem:[%s6839_s5 + $0x344] ss:$8 sps:$4 sm:$0xff]  }
 0x2c3   :  { %v1855_v35 = vadd.bf16 %v6246_v34, %v1620_v9  ;;  %4404 = vmatprep.subr.bf16.mxu1 %v4825_v45  ;;  %v1861_v62 = vadd.bf16 %v6243_v4, %v6951_v18 }
 0x2c4   :  { %v1856_v42 = vadd.bf16 %v6250_v46, %v1621_v6  ;;  %v1870_v9 = vadd.bf16 %v6233_v39, %v6952_v49 }
 0x2c5   :  { %v1983_v31 = vmax.bf16 %v6931_v13, %v1855_v35  ;;  %v1989_v17 = vmax.bf16 %v6931_v13, %v1861_v62 }
 0x2c6   :  { %v1467_v29 = vpop.f32.mrb[168].mxu0  ;;  %v1984_v14 = vmax.bf16 %v6931_v13, %v1856_v42  ;;  %4420 = vmatpush1.bf16.msra.mxu1 %v4826_v57  ;;  %v1998_v35 = vmax.bf16 %v6931_v13, %v1870_v9  ;;  %v4832_v42 = vld [vmem:[%s6839_s5 + $0x340] ss:$8 sps:$4 sm:$0xff]  }
 0x2c7   :  { %v1469_v10 = vpop.f32.mrb[169].mxu0  ;;  %4405 = vmatprep.subr.bf16.mxu1 %v4827_v41 }
 0x2c8   :  { %v1471_v0 = vpop.f32.mrb[170].mxu0  ;;  %3486 = vmatprep.mubr.bf16.mxu0 %v1984_v14 }
 0x2c9   :  { %v1628_v22 = vpack.c.bf16 %v1471_v0, %v1467_v29  ;;  %v1473_v50 = vpop.f32.mrb[171].mxu0  ;;  %3294 = vmatmul.mubr.bf16.gmra.mrb[68].mxu1 %v1981_v54  ;;  %3487 = vmatmul.mubr.bf16.gmra.mrb[228].mxu0 %v1983_v31  ;;  %v6953_v29 = vpack.c.bf16 %v5595_v30, %v5583_v11  ;;  %v4833_v11 = vld [vmem:[%s6839_s5 + $0x350] ss:$8 sps:$4 sm:$0xff]  }
 0x2ca   :  { %v1629_v12 = vpack.c.bf16 %v1473_v50, %v1469_v10  ;;  %3303 = vmatprep.mubr.bf16.mxu1 %v1990_v23  ;;  %4421 = vmatpush1.bf16.msra.mxu1 %v4828_v56  ;;  %v6954_v10 = vpack.c.bf16 %v5629_v2, %v5619_v19  ;;  %v6955_v56 = vpack.c.bf16 %v5625_v33, %v5613_v7 }
 0x2cb   :  { %v1863_v53 = vadd.bf16 %v6246_v34, %v1628_v22  ;;  %4406 = vmatprep.subr.bf16.mxu1 %v4829_v43  ;;  %v1869_v14 = vadd.bf16 %v6243_v4, %v6953_v29  ;;  %v6961_v29 = vld [vmem:[#allocation40_spill] sm:$0xff] }
 0x2cc   :  { %v1864_v36 = vadd.bf16 %v6250_v46, %v1629_v12  ;;  %v1878_v54 = vadd.bf16 %v6233_v39, %v6954_v10  ;;  %v1877_v18 = vadd.bf16 %v6243_v4, %v6955_v56 }
 0x2cd   :  { %v1991_v47 = vmax.bf16 %v6931_v13, %v1863_v53  ;;  %v1997_v23 = vmax.bf16 %v6931_v13, %v1869_v14  ;;  %v6963_v14 = vld [vmem:[#allocation6_spill] sm:$0xff] }
 0x2ce   :  { %v1477_v6 = vpop.f32.mrb[172].mxu0  ;;  %v1992_v16 = vmax.bf16 %v6931_v13, %v1864_v36  ;;  %4422 = vmatpush1.bf16.msra.mxu1 %v4830_v26  ;;  %v2006_v2 = vmax.bf16 %v6931_v13, %v1878_v54  ;;  %v2005_v7 = vmax.bf16 %v6931_v13, %v1877_v18 }
 0x2cf   :  { %v1479_v51 = vpop.f32.mrb[173].mxu0  ;;  %4407 = vmatprep.subr.bf16.mxu1 %v4831_v20 }
 0x2d0   :  { %v1481_v44 = vpop.f32.mrb[174].mxu0  ;;  %3496 = vmatprep.mubr.bf16.mxu0 %v1992_v16 }
 0x2d1   :  { %v1636_v45 = vpack.c.bf16 %v1481_v44, %v1477_v6  ;;  %v1483_v55 = vpop.f32.mrb[175].mxu0  ;;  %3304 = vmatmul.mubr.bf16.gmra.mrb[72].mxu1 %v1989_v17  ;;  %3497 = vmatmul.mubr.bf16.gmra.mrb[232].mxu0 %v1991_v47 }
 0x2d2   :  { %v1637_v32 = vpack.c.bf16 %v1483_v55, %v1479_v51  ;;  %3313 = vmatprep.mubr.bf16.mxu1 %v1998_v35  ;;  %4423 = vmatpush1.bf16.msra.mxu1 %v4832_v42 }
 0x2d3   :  { %v1871_v57 = vadd.bf16 %v6246_v34, %v1636_v45  ;;  %4408 = vmatprep.subr.bf16.mxu1 %v5838_v63 }
 0x2d4   :  { %v1872_v31 = vadd.bf16 %v6250_v46, %v1637_v32 }
 0x2d5   :  { %v1999_v63 = vmax.bf16 %v6931_v13, %v1871_v57 }
 0x2d6   :  { %v1487_v41 = vpop.f32.mrb[176].mxu0  ;;  %v2000_v0 = vmax.bf16 %v6931_v13, %v1872_v31  ;;  %4424 = vmatpush1.bf16.msra.mxu1 %v4833_v11  ;;  %v6966_v31 = vld [vmem:[#allocation12_spill] sm:$0xff] }
 0x2d7   :  { %v1489_v30 = vpop.f32.mrb[177].mxu0  ;;  %4409 = vmatprep.subr.bf16.mxu1 %v5867_v37  ;;  %v6956_v37 = vpack.c.bf16 %v5659_v58, %v5649_v24 }
 0x2d8   :  { %v1491_v19 = vpop.f32.mrb[178].mxu0  ;;  %3506 = vmatprep.mubr.bf16.mxu0 %v2000_v0 }
 0x2d9   :  { %v1644_v22 = vpack.c.bf16 %v1491_v19, %v1487_v41  ;;  %v1493_v50 = vpop.f32.mrb[179].mxu0  ;;  %3314 = vmatmul.mubr.bf16.gmra.mrb[76].mxu1 %v1997_v23  ;;  %3507 = vmatmul.mubr.bf16.gmra.mrb[236].mxu0 %v1999_v63  ;;  %v1886_v53 = vadd.bf16 %v6233_v39, %v6956_v37  ;;  %v6967_v41 = vld [vmem:[#allocation10_spill] sm:$0xff]  ;;  %v6969_v19 = vld [vmem:[#allocation43_spill] sm:$0xff] }
 0x2da   :  { %v1645_v12 = vpack.c.bf16 %v1493_v50, %v1489_v30  ;;  %3323 = vmatprep.mubr.bf16.mxu1 %v2006_v2  ;;  %4425 = vmatpush1.bf16.msra.mxu1 %v5862_v15  ;;  %v6968_v0 = vpack.c.bf16 %v6966_v31, %v6967_v41  ;;  %v6985_v41 = vld [vmem:[#allocation19_spill] sm:$0xff] }
 0x2db   :  { %v1879_v62 = vadd.bf16 %v6246_v34, %v1644_v22  ;;  %4410 = vmatprep.subr.bf16.mxu1 %v5890_v5  ;;  %v2014_v58 = vmax.bf16 %v6931_v13, %v1886_v53  ;;  %v6970_v53 = vld [vmem:[#allocation11_spill] sm:$0xff] }
 0x2dc   :  { %v1880_v43 = vadd.bf16 %v6250_v46, %v1645_v12  ;;  %v1902_v11 = vadd.bf16 %v6233_v39, %v6968_v0  ;;  %v6986_v0 = vld [vmem:[#allocation17_spill] sm:$0xff] }
 0x2dd   :  { %v2007_v33 = vmax.bf16 %v6931_v13, %v1879_v62 }
 0x2de   :  { %v1497_v49 = vpop.f32.mrb[180].mxu0  ;;  %v2008_v9 = vmax.bf16 %v6931_v13, %v1880_v43  ;;  %4426 = vmatpush1.bf16.msra.mxu1 %v5897_v27  ;;  %v6957_v27 = vld [vmem:[#allocation5_spill] sm:$0xff]  ;;  %v2030_v56 = vmax.bf16 %v6931_v13, %v1902_v11  ;;  %v6987_v11 = vpack.c.bf16 %v6985_v41, %v6986_v0 }
 0x2df   :  { %v1499_v15 = vpop.f32.mrb[181].mxu0  ;;  %4411 = vmatprep.subr.bf16.mxu1 %v5910_v40  ;;  %v6958_v16 = vpack.c.bf16 %v5655_v1, %v6957_v27  ;;  %v6959_v40 = vld [vmem:[#allocation7_spill] sm:$0xff]  ;;  %v6971_v43 = vld [vmem:[#allocation9_spill] sm:$0xff] }
 0x2e0   :  { %v1501_v5 = vpop.f32.mrb[182].mxu0  ;;  %3516 = vmatprep.mubr.bf16.mxu0 %v2008_v9  ;;  %v6960_v17 = vpack.c.bf16 %v5698_v28, %v6959_v40 }
 0x2e1   :  { %v1652_v24 = vpack.c.bf16 %v1501_v5, %v1497_v49  ;;  %v1503_v36 = vpop.f32.mrb[183].mxu0  ;;  %3324 = vmatmul.mubr.bf16.gmra.mrb[80].mxu1 %v2005_v7  ;;  %3517 = vmatmul.mubr.bf16.gmra.mrb[240].mxu0 %v2007_v33  ;;  %v1885_v26 = vadd.bf16 %v6243_v4, %v6958_v16  ;;  %v6972_v49 = vpack.c.bf16 %v6970_v53, %v6971_v43  ;;  %v6974_v7 = vld [vmem:[#allocation14_spill] sm:$0xff] }
 0x2e2   :  { %v1653_v6 = vpack.c.bf16 %v1503_v36, %v1499_v15  ;;  %3333 = vmatprep.mubr.bf16.mxu1 %v2014_v58  ;;  %4427 = vmatpush1.bf16.msra.mxu1 %v5917_v61  ;;  %v1894_v47 = vadd.bf16 %v6233_v39, %v6960_v17  ;;  %v6976_v17 = vld [vmem:[#allocation48_spill] sm:$0xff] }
 0x2e3   :  { %v1887_v51 = vadd.bf16 %v6246_v34, %v1652_v24  ;;  %4412 = vmatprep.subr.bf16.mxu1 %v5932_v25  ;;  %v2013_v1 = vmax.bf16 %v6931_v13, %v1885_v26  ;;  %v1901_v9 = vadd.bf16 %v6243_v4, %v6972_v49 }
 0x2e4   :  { %v1888_v20 = vadd.bf16 %v6250_v46, %v1653_v6  ;;  %v2022_v28 = vmax.bf16 %v6931_v13, %v1894_v47  ;;  %v6978_v47 = vld [vmem:[#allocation13_spill] sm:$0xff] }
 0x2e5   :  { %v2015_v45 = vmax.bf16 %v6931_v13, %v1887_v51  ;;  %v2029_v6 = vmax.bf16 %v6931_v13, %v1901_v9 }
 0x2e6   :  { %v1507_v44 = vpop.f32.mrb[184].mxu0  ;;  %v2016_v35 = vmax.bf16 %v6931_v13, %v1888_v20  ;;  %4428 = vmatpush1.bf16.msra.mxu1 %v5939_v60  ;;  %v6962_v60 = vld [vmem:[#allocation8_spill] sm:$0xff] }
 0x2e7   :  { %v1509_v61 = vpop.f32.mrb[185].mxu0  ;;  %4413 = vmatprep.subr.bf16.mxu1 %v5952_v52  ;;  %v6964_v57 = vpack.c.bf16 %v6962_v60, %v6963_v14  ;;  %v6965_v52 = vld [vmem:[#allocation42_spill] sm:$0xff] }
 0x2e8   :  { %v1511_v25 = vpop.f32.mrb[186].mxu0  ;;  %3526 = vmatprep.mubr.bf16.mxu0 %v2016_v35 }
 0x2e9   :  { %v1660_v55 = vpack.c.bf16 %v1511_v25, %v1507_v44  ;;  %v1513_v32 = vpop.f32.mrb[187].mxu0  ;;  %3334 = vmatmul.mubr.bf16.gmra.mrb[84].mxu1 %v2013_v1  ;;  %3527 = vmatmul.mubr.bf16.gmra.mrb[244].mxu0 %v2015_v45  ;;  %v1893_v10 = vadd.bf16 %v6243_v4, %v6964_v57  ;;  %v6982_v1 = vld [vmem:[#allocation18_spill] sm:$0xff] }
 0x2ea   :  { %v1661_v42 = vpack.c.bf16 %v1513_v32, %v1509_v61  ;;  %3343 = vmatprep.mubr.bf16.mxu1 %v2022_v28  ;;  %4429 = vmatpush1.bf16.msra.mxu1 %v6961_v29  ;;  %v6981_v61 = vld [vmem:[#allocation20_spill] sm:$0xff] }
 0x2eb   :  { %v1895_v54 = vadd.bf16 %v6246_v34, %v1660_v55  ;;  %4414 = vmatprep.subr.bf16.mxu1 %v6965_v52  ;;  %v2021_v22 = vmax.bf16 %v6931_v13, %v1893_v10  ;;  %v6983_v45 = vpack.c.bf16 %v6981_v61, %v6982_v1 }
 0x2ec   :  { %v1896_v30 = vadd.bf16 %v6250_v46, %v1661_v42  ;;  %v6984_v42 = vld [vmem:[#allocation50_spill] sm:$0xff] }
 0x2ed   :  { %v2023_v50 = vmax.bf16 %v6931_v13, %v1895_v54  ;;  %v1918_v25 = vadd.bf16 %v6233_v39, %v6983_v45 }
 0x2ee   :  { %v1517_v23 = vpop.f32.mrb[188].mxu0  ;;  %v2024_v63 = vmax.bf16 %v6931_v13, %v1896_v30  ;;  %4430 = vmatpush1.bf16.msra.mxu1 %v6969_v19  ;;  %v1917_v30 = vadd.bf16 %v6243_v4, %v6987_v11  ;;  %v6989_v19 = vld [vmem:[#allocation22_spill] sm:$0xff]  ;;  %v7003_v11 = vld [vmem:[#allocation31_spill] sm:$0xff] }
 0x2ef   :  { %v1519_v2 = vpop.f32.mrb[189].mxu0  ;;  %4415 = vmatprep.subr.bf16.mxu1 %v5996_v3  ;;  %v6973_v3 = vld [vmem:[#allocation16_spill] sm:$0xff]  ;;  %v2046_v10 = vmax.bf16 %v6931_v13, %v1918_v25 }
 0x2f0   :  { %v1521_v12 = vpop.f32.mrb[190].mxu0  ;;  %3536 = vmatprep.mubr.bf16.mxu0 %v2024_v63  ;;  %v6975_v33 = vpack.c.bf16 %v6973_v3, %v6974_v7  ;;  %v6988_v63 = vld [vmem:[#allocation24_spill] sm:$0xff]  ;;  %v6991_v3 = vld [vmem:[#allocation23_spill] sm:$0xff]  ;;  %v6992_v7 = vld [vmem:[#allocation21_spill] sm:$0xff] }
 0x2f1   :  { %v1668_v18 = vpack.c.bf16 %v1521_v12, %v1517_v23  ;;  %v1523_v62 = vpop.f32.mrb[191].mxu0  ;;  %3344 = vmatmul.mubr.bf16.gmra.mrb[88].mxu1 %v2021_v22  ;;  %3537 = vmatmul.mubr.bf16.gmra.mrb[248].mxu0 %v2023_v50  ;;  %v7000_v25 = vld [vmem:[#allocation32_spill] sm:$0xff] }
 0x2f2   :  { %v1669_v37 = vpack.c.bf16 %v1523_v62, %v1519_v2  ;;  %3353 = vmatprep.mubr.bf16.mxu1 %v2030_v56  ;;  %4431 = vmatpush1.bf16.msra.mxu1 %v6005_v21  ;;  %v1910_v5 = vadd.bf16 %v6233_v39, %v6975_v33  ;;  %v6990_v2 = vpack.c.bf16 %v6988_v63, %v6989_v19 }
 0x2f3   :  { %v1903_v15 = vadd.bf16 %v6246_v34, %v1668_v18  ;;  %4416 = vmatprep.subr.bf16.mxu1 %v6020_v59  ;;  %v6993_v33 = vpack.c.bf16 %v6991_v3, %v6992_v7 }
 0x2f4   :  { %v1904_v58 = vadd.bf16 %v6250_v46, %v1669_v37  ;;  %v2038_v16 = vmax.bf16 %v6931_v13, %v1910_v5  ;;  %v1926_v22 = vadd.bf16 %v6233_v39, %v6990_v2  ;;  %v2045_v37 = vmax.bf16 %v6931_v13, %v1917_v30  ;;  %v7004_v30 = vld [vmem:[#allocation29_spill] sm:$0xff]  ;;  %v7006_v2 = vld [vmem:[#allocation36_spill] sm:$0xff] }
 0x2f5   :  { %v2031_v27 = vmax.bf16 %v6931_v13, %v1903_v15  ;;  %v1925_v5 = vadd.bf16 %v6243_v4, %v6993_v33  ;;  %v7009_v33 = vld [vmem:[#allocation35_spill] sm:$0xff] }
 0x2f6   :  { %v1527_v24 = vpop.f32.mrb[192].mxu0  ;;  %v2032_v36 = vmax.bf16 %v6931_v13, %v1904_v58  ;;  %4432 = vmatpush1.bf16.msra.mxu1 %v6027_v48  ;;  %v6977_v48 = vld [vmem:[#allocation15_spill] sm:$0xff]  ;;  %v2054_v43 = vmax.bf16 %v6931_v13, %v1926_v22  ;;  %v7007_v22 = vld [vmem:[#allocation34_spill] sm:$0xff] }
 0x2f7   :  { %v1529_v21 = vpop.f32.mrb[193].mxu0  ;;  %4417 = vmatprep.subr.bf16.mxu1 %v6039_v8  ;;  %v6979_v20 = vpack.c.bf16 %v6977_v48, %v6978_v47  ;;  %v6980_v8 = vld [vmem:[#allocation49_spill] sm:$0xff] }
 0x2f8   :  { %v1531_v59 = vpop.f32.mrb[194].mxu0  ;;  %3546 = vmatprep.mubr.bf16.mxu0 %v2032_v36  ;;  %v6995_v36 = vld [vmem:[#allocation26_spill] sm:$0xff] }
 0x2f9   :  { %v1676_v26 = vpack.c.bf16 %v1531_v59, %v1527_v24  ;;  %v1533_v51 = vpop.f32.mrb[195].mxu0  ;;  %3354 = vmatmul.mubr.bf16.gmra.mrb[92].mxu1 %v2029_v6  ;;  %3547 = vmatmul.mubr.bf16.gmra.mrb[252].mxu0 %v2031_v27  ;;  %v1909_v44 = vadd.bf16 %v6243_v4, %v6979_v20  ;;  %v6994_v24 = vld [vmem:[#allocation28_spill] sm:$0xff] }
 0x2fa   :  { %v1677_v40 = vpack.c.bf16 %v1533_v51, %v1529_v21  ;;  %3363 = vmatprep.mubr.bf16.mxu1 %v2038_v16  ;;  %4433 = vmatpush1.bf16.msra.mxu1 %v6976_v17  ;;  %v6996_v21 = vpack.c.bf16 %v6994_v24, %v6995_v36  ;;  %v7012_v36 = vld [vmem:[#allocation41_spill] sm:$0xff] }
 0x2fb   :  { %v1911_v35 = vadd.bf16 %v6246_v34, %v1676_v26  ;;  %4418 = vmatprep.subr.bf16.mxu1 %v6980_v8  ;;  %v2037_v14 = vmax.bf16 %v6931_v13, %v1909_v44  ;;  %v6998_v8 = vld [vmem:[#allocation25_spill] sm:$0xff] }
 0x2fc   :  { %v1912_v28 = vadd.bf16 %v6250_v46, %v1677_v40  ;;  %v1934_v6 = vadd.bf16 %v6233_v39, %v6996_v21  ;;  %v2053_v40 = vmax.bf16 %v6931_v13, %v1925_v5  ;;  %v7010_v5 = vld [vmem:[#allocation33_spill] sm:$0xff]  ;;  %v7013_v21 = vld [vmem:[#allocation38_spill] sm:$0xff] }
 0x2fd   :  { %v2039_v29 = vmax.bf16 %v6931_v13, %v1911_v35  ;;  %v6997_v35 = vld [vmem:[#allocation27_spill] sm:$0xff] }
 0x2fe   :  { %v1537_v55 = vpop.f32.mrb[196].mxu0  ;;  %v2040_v32 = vmax.bf16 %v6931_v13, %v1912_v28  ;;  %4434 = vmatpush1.bf16.msra.mxu1 %v6984_v42  ;;  %v2062_v48 = vmax.bf16 %v6931_v13, %v1934_v6  ;;  %v6999_v61 = vpack.c.bf16 %v6997_v35, %v6998_v8  ;;  %v7001_v28 = vld [vmem:[#allocation30_spill] sm:$0xff]  ;;  %v7014_v6 = vpack.c.bf16 %v7012_v36, %v7013_v21 }
 0x2ff   :  { %v1539_v60 = vpop.f32.mrb[197].mxu0 }
 0x300   :  { %v1541_v57 = vpop.f32.mrb[198].mxu0  ;;  %3556 = vmatprep.mubr.bf16.mxu0 %v2040_v32  ;;  %v1933_v1 = vadd.bf16 %v6243_v4, %v6999_v61  ;;  %v7018_v61 = vld [vmem:[#allocation47_spill] sm:$0xff] }
 0x301   :  { %v1684_v54 = vpack.c.bf16 %v1541_v57, %v1537_v55  ;;  %v1543_v52 = vpop.f32.mrb[199].mxu0  ;;  %3364 = vmatmul.mubr.bf16.gmra.mrb[96].mxu1 %v2037_v14  ;;  %3557 = vmatmul.mubr.bf16.gmra.mrb[0].mxu0 %v2039_v29  ;;  %v7002_v55 = vpack.c.bf16 %v7000_v25, %v7001_v28 }
 0x302   :  { %v1685_v31 = vpack.c.bf16 %v1543_v52, %v1539_v60  ;;  %3373 = vmatprep.mubr.bf16.mxu1 %v2046_v10  ;;  %v2061_v10 = vmax.bf16 %v6931_v13, %v1933_v1  ;;  %v7019_v1 = vld [vmem:[#allocation45_spill] sm:$0xff] }
 0x303   :  { %v1919_v23 = vadd.bf16 %v6246_v34, %v1684_v54  ;;  %v1942_v32 = vadd.bf16 %v6233_v39, %v7002_v55 }
 0x304   :  { %v1920_v50 = vadd.bf16 %v6250_v46, %v1685_v31 }
 0x305   :  { %v2047_v18 = vmax.bf16 %v6931_v13, %v1919_v23  ;;  %v2070_v52 = vmax.bf16 %v6931_v13, %v1942_v32  ;;  %v7005_v23 = vpack.c.bf16 %v7003_v11, %v7004_v30 }
 0x306   :  { %v1547_v12 = vpop.f32.mrb[200].mxu0  ;;  %v2048_v56 = vmax.bf16 %v6931_v13, %v1920_v50  ;;  %v7008_v50 = vpack.c.bf16 %v7006_v2, %v7007_v22 }
 0x307   :  { %v1549_v62 = vpop.f32.mrb[201].mxu0  ;;  %v1941_v63 = vadd.bf16 %v6243_v4, %v7005_v23 }
 0x308   :  { %v1551_v53 = vpop.f32.mrb[202].mxu0  ;;  %3566 = vmatprep.mubr.bf16.mxu0 %v2048_v56 }
 0x309   :  { %v1692_v49 = vpack.c.bf16 %v1551_v53, %v1547_v12  ;;  %v1553_v9 = vpop.f32.mrb[203].mxu0  ;;  %3374 = vmatmul.mubr.bf16.gmra.mrb[100].mxu1 %v2045_v37  ;;  %3567 = vmatmul.mubr.bf16.gmra.mrb[4].mxu0 %v2047_v18  ;;  %v1950_v12 = vadd.bf16 %v6233_v39, %v7008_v50 }
 0x30a   :  { %v1693_v15 = vpack.c.bf16 %v1553_v9, %v1549_v62  ;;  %3383 = vmatprep.mubr.bf16.mxu1 %v2054_v43  ;;  %v2069_v43 = vmax.bf16 %v6931_v13, %v1941_v63 }
 0x30b   :  { %v1927_v58 = vadd.bf16 %v6246_v34, %v1692_v49  ;;  %v2078_v9 = vmax.bf16 %v6931_v13, %v1950_v12 }
 0x30c   :  { %v1928_v27 = vadd.bf16 %v6250_v46, %v1693_v15 }
 0x30d   :  { %v2055_v26 = vmax.bf16 %v6931_v13, %v1927_v58  ;;  %v7011_v58 = vpack.c.bf16 %v7009_v33, %v7010_v5 }
 0x30e   :  { %v1557_v59 = vpop.f32.mrb[204].mxu0  ;;  %v2056_v16 = vmax.bf16 %v6931_v13, %v1928_v27  ;;  %v1958_v27 = vadd.bf16 %v6233_v39, %v7014_v6 }
 0x30f   :  { %v1559_v51 = vpop.f32.mrb[205].mxu0  ;;  %v1949_v24 = vadd.bf16 %v6243_v4, %v7011_v58 }
 0x310   :  { %v1561_v17 = vpop.f32.mrb[206].mxu0  ;;  %3576 = vmatprep.mubr.bf16.mxu0 %v2056_v16 }
 0x311   :  { %v1700_v47 = vpack.c.bf16 %v1561_v17, %v1557_v59  ;;  %v1563_v20 = vpop.f32.mrb[207].mxu0  ;;  %3384 = vmatmul.mubr.bf16.gmra.mrb[104].mxu1 %v2053_v40  ;;  %3577 = vmatmul.mubr.bf16.gmra.mrb[8].mxu0 %v2055_v26  ;;  %v2077_v26 = vmax.bf16 %v6931_v13, %v1949_v24  ;;  %v2086_v40 = vmax.bf16 %v6931_v13, %v1958_v27 }
 0x312   :  { %v1701_v44 = vpack.c.bf16 %v1563_v20, %v1559_v51  ;;  %3393 = vmatprep.mubr.bf16.mxu1 %v2062_v48  ;;  %v7015_v20 = vld [vmem:[#allocation39_spill] sm:$0xff] }
 0x313   :  { %v1935_v45 = vadd.bf16 %v6246_v34, %v1700_v47 }
 0x314   :  { %v1936_v42 = vadd.bf16 %v6250_v46, %v1701_v44  ;;  %v7016_v44 = vld [vmem:[#allocation37_spill] sm:$0xff] }
 0x315   :  { %v2063_v14 = vmax.bf16 %v6931_v13, %v1935_v45  ;;  %v7017_v35 = vpack.c.bf16 %v7015_v20, %v7016_v44  ;;  %v7020_v45 = vpack.c.bf16 %v7018_v61, %v7019_v1 }
 0x316   :  { %v1567_v29 = vpop.f32.mrb[208].mxu0  ;;  %v2064_v60 = vmax.bf16 %v6931_v13, %v1936_v42 }
 0x317   :  { %v1569_v57 = vpop.f32.mrb[209].mxu0  ;;  %v1957_v8 = vadd.bf16 %v6243_v4, %v7017_v35  ;;  %v1966_v25 = vadd.bf16 %v6233_v39, %v7020_v45 }
 0x318   :  { %v1571_v54 = vpop.f32.mrb[210].mxu0  ;;  %3586 = vmatprep.mubr.bf16.mxu0 %v2064_v60 }
 0x319   :  { %v1708_v31 = vpack.c.bf16 %v1571_v54, %v1567_v29  ;;  %v1573_v41 = vpop.f32.mrb[211].mxu0  ;;  %3394 = vmatmul.mubr.bf16.gmra.mrb[108].mxu1 %v2061_v10  ;;  %3587 = vmatmul.mubr.bf16.gmra.mrb[12].mxu0 %v2063_v14  ;;  %v2085_v32 = vmax.bf16 %v6931_v13, %v1957_v8  ;;  %v2094_v29 = vmax.bf16 %v6931_v13, %v1966_v25  ;;  %v7021_v10 = vld [vmem:[#allocation46_spill] sm:$0xff]  ;;  %v7022_v54 = vld [vmem:[#allocation44_spill] sm:$0xff] }
 0x31a   :  { %v1709_v0 = vpack.c.bf16 %v1573_v41, %v1569_v57  ;;  %3403 = vmatprep.mubr.bf16.mxu1 %v2070_v52  ;;  %v7023_v52 = vpack.c.bf16 %v7021_v10, %v7022_v54 }
 0x31b   :  { %v1943_v19 = vadd.bf16 %v6246_v34, %v1708_v31 }
 0x31c   :  { %v1944_v56 = vadd.bf16 %v6250_v46, %v1709_v0  ;;  %v1965_v31 = vadd.bf16 %v6243_v4, %v7023_v52 }
 0x31d   :  { %v2071_v37 = vmax.bf16 %v6931_v13, %v1943_v19 }
 0x31e   :  { %v1577_v18 = vpop.f32.mrb[212].mxu0  ;;  %v2072_v62 = vmax.bf16 %v6931_v13, %v1944_v56  ;;  %v2093_v39 = vmax.bf16 %v6931_v13, %v1965_v31  ;;  %v4309_v56 = vld.sshfl [vmem:[%s6842_s6] sm:$0x11 pattern:$0x75316420] }
 0x31f   :  { %v1579_v53 = vpop.f32.mrb[213].mxu0 }
 0x320   :  { %v1581_v49 = vpop.f32.mrb[214].mxu0  ;;  %3596 = vmatprep.mubr.bf16.mxu0 %v2072_v62  ;;  %v7024_v62 = vld [vmem:[#allocation4_spill] sm:$0xff] }
 0x321   :  { %v1716_v15 = vpack.c.bf16 %v1581_v49, %v1577_v18  ;;  %v1583_v3 = vpop.f32.mrb[215].mxu0  ;;  %3404 = vmatmul.mubr.bf16.gmra.mrb[112].mxu1 %v2069_v43  ;;  %3597 = vmatmul.mubr.bf16.gmra.mrb[16].mxu0 %v2071_v37  ;;  %v3678_v18 = vcombine.high %v4309_v56, %v4309_v56  ;;  %v3685_v37 = vrot.slane %v4309_v56, %v7024_v62 }
 0x322   :  { %v1717_v7 = vpack.c.bf16 %v1583_v3, %v1579_v53  ;;  %3413 = vmatprep.mubr.bf16.mxu1 %v2078_v9 }
 0x323   :  { %v1951_v11 = vadd.bf16 %v6246_v34, %v1716_v15  ;;  %v3694_v53 = vpack.i.b16 %v3685_v37, %v3685_v37 }
 0x324   :  { %v1952_v41 = vadd.bf16 %v6250_v46, %v1717_v7 }
 0x325   :  { %v2079_v23 = vmax.bf16 %v6931_v13, %v1951_v11  ;;  %v6529_v24 = vrot.slane %v3694_v53, %v5496_v38 }
 0x326   :  { %v1587_v59 = vpop.f32.mrb[216].mxu0  ;;  %v2080_v0 = vmax.bf16 %v6931_v13, %v1952_v41 }
 0x327   :  { %v1589_v16 = vpop.f32.mrb[217].mxu0 }
 0x328   :  { %v1591_v51 = vpop.f32.mrb[218].mxu0 }
 0x329   :  { %v1724_v17 = vpack.c.bf16 %v1591_v51, %v1587_v59  ;;  %v1593_v48 = vpop.f32.mrb[219].mxu0  ;;  %3414 = vmatmul.mubr.bf16.gmra.mrb[116].mxu1 %v2077_v26  ;;  %v7025_v26 = vld [vmem:[#allocation3_spill] sm:$0xff] }
 0x32a   :  { %v1725_v47 = vpack.c.bf16 %v1593_v48, %v1589_v16  ;;  %3423 = vmatprep.mubr.bf16.mxu1 %v2086_v40  ;;  %v3835_v16 = vld [vmem:[%s6843_s7] sm:$0x3]  ;;  %v3843_v51 = vsub.s32 1, %v7025_v26 }
 0x32b   :  { %v1959_v4 = vadd.bf16 %v6246_v34, %v1724_v17  ;;  %v6542_v1 = vrot.slane %v3835_v16, %v5496_v38 }
 0x32c   :  { %v1960_v30 = vadd.bf16 %v6250_v46, %v1725_v47  ;;  %v6544_v45 = vrot.slane %v3835_v16, %v3843_v51  ;;  %v14_v16 = vstv %s6844_s8 }
 0x32d   :  { %v2087_v2 = vmax.bf16 %v6931_v13, %v1959_v4  ;;  %15 = vst [vmem:[#allocation2] sm:$0x1] %v14_v16 }
 0x32e   :  { %v1597_v28 = vpop.f32.mrb[220].mxu0  ;;  %v2088_v63 = vmax.bf16 %v6931_v13, %v1960_v30 }
 0x32f   :  { %v1599_v55 = vpop.f32.mrb[221].mxu0 }
 0x330   :  { %v1601_v42 = vpop.f32.mrb[222].mxu0 }
 0x331   :  { %v1732_v60 = vpack.c.bf16 %v1601_v42, %v1597_v28  ;;  %v1603_v14 = vpop.f32.mrb[223].mxu0  ;;  %3424 = vmatmul.mubr.bf16.gmra.mrb[120].mxu1 %v2085_v32 }
 0x332   :  { %v1733_v57 = vpack.c.bf16 %v1603_v14, %v1599_v55  ;;  %3433 = vmatprep.mubr.bf16.mxu1 %v2094_v29 }
 0x333   :  { %v1967_v50 = vadd.bf16 %v6246_v34, %v1732_v60 }
 0x334   :  { %v1968_v19 = vadd.bf16 %v6250_v46, %v1733_v57  ;;  %v3692_v46 = vrot.slane %v3678_v18, %v7024_v62 }
 0x335   :  { %v2095_v12 = vmax.bf16 %v6931_v13, %v1967_v50 }
 0x336   :  { %v2096_v22 = vmax.bf16 %v6931_v13, %v1968_v19  ;;  %v3701_v9 = vpack.i.b16 %v3692_v46, %v3692_v46 }
 0x338   :  { %v6532_v27 = vrot.slane %v3701_v9, %v5496_v38 }
 0x339   :  { %3434 = vmatmul.mubr.bf16.gmra.mrb[124].mxu1 %v2093_v39 }
 0x33a   :  { %3606 = vmatprep.mubr.bf16.mxu1 %v2080_v0 }
 0x341   :  { %3607 = vmatmul.mubr.bf16.vlgmr.msra.gmra.mrb[116].mxu1 %v2079_v23 }
 0x342   :  { %3616 = vmatprep.mubr.bf16.mxu1 %v2088_v63 }
 0x349   :  { %3617 = vmatmul.mubr.bf16.gmra.mrb[120].mxu1 %v2087_v2 }
 0x34a   :  { %3626 = vmatprep.mubr.bf16.mxu1 %v2096_v22 }
 0x351   :  { %3627 = vmatmul.mubr.bf16.gmra.mrb[124].mxu1 %v2095_v12 }
 0x394   :  { %v3285_v43 = vpop.f32.mrb[64].mxu1  ;;  %v3478_v49 = vpop.f32.mrb[224].mxu0 }
 0x395   :  { %v4435_v15 = vadd.f32 %v3478_v49, %v3285_v43  ;;  %v3287_v3 = vpop.f32.mrb[65].mxu1  ;;  %v3480_v7 = vpop.f32.mrb[225].mxu0 }
 0x396   :  { %v4436_v34 = vadd.f32 %v3480_v7, %v3287_v3  ;;  %v3289_v33 = vpop.f32.mrb[66].mxu1  ;;  %v3482_v5 = vpop.f32.mrb[226].mxu0 }
 0x397   :  { %v4437_v58 = vadd.f32 %v3482_v5, %v3289_v33  ;;  %v3291_v36 = vpop.f32.mrb[67].mxu1  ;;  %v3484_v21 = vpop.f32.mrb[227].mxu0 }
 0x398   :  { %v4438_v6 = vadd.f32 %v3484_v21, %v3291_v36 }
 0x399   :  { %v3637_v59 = vpack.c.bf16 %v4437_v58, %v4435_v15 }
 0x39a   :  { %v3638_v40 = vpack.c.bf16 %v4438_v6, %v4436_v34 }
 0x39b   :  { %v3707_v17 = vadd.bf16 %v6529_v24, %v3637_v59 }
 0x39c   :  { %v3708_v48 = vadd.bf16 %v6532_v27, %v3638_v40  ;;  %v3295_v47 = vpop.f32.mrb[68].mxu1  ;;  %v3488_v20 = vpop.f32.mrb[228].mxu0 }
 0x39d   :  { %v4439_v44 = vadd.f32 %v3488_v20, %v3295_v47  ;;  %v3297_v35 = vpop.f32.mrb[69].mxu1  ;;  %v3490_v8 = vpop.f32.mrb[229].mxu0  ;;  %v3739_v61 = vmax.bf16 %v6931_v13, %v3707_v17 }
 0x39e   :  { %v4440_v25 = vadd.f32 %v3490_v8, %v3297_v35  ;;  %v3299_v28 = vpop.f32.mrb[70].mxu1  ;;  %v3492_v55 = vpop.f32.mrb[230].mxu0  ;;  %v3740_v32 = vmax.bf16 %v6931_v13, %v3708_v48 }
 0x39f   :  { %v4441_v42 = vadd.f32 %v3492_v55, %v3299_v28  ;;  %v3301_v29 = vpop.f32.mrb[71].mxu1  ;;  %v3494_v60 = vpop.f32.mrb[231].mxu0  ;;  %v3771_v14 = vunpack.c.l.bf16 %v3739_v61  ;;  %v3773_v57 = vunpack.c.h.bf16 %v3739_v61 }
 0x3a0   :  { %v4442_v10 = vadd.f32 %v3494_v60, %v3301_v29  ;;  %v3772_v54 = vunpack.c.l.bf16 %v3740_v32  ;;  %v3774_v52 = vunpack.c.h.bf16 %v3740_v32 }
 0x3a1   :  { %v3639_v31 = vpack.c.bf16 %v4441_v42, %v4439_v44  ;;  %v3847_v41 = vmul.f32 %v6542_v1, %v3771_v14  ;;  %v3849_v38 = vmul.f32 %v6542_v1, %v3773_v57 }
 0x3a2   :  { %v3640_v39 = vpack.c.bf16 %v4442_v10, %v4440_v25  ;;  %v3848_v0 = vmul.f32 %v6544_v45, %v3772_v54  ;;  %v3850_v11 = vmul.f32 %v6544_v45, %v3774_v52 }
 0x3a3   :  { %v3709_v30 = vadd.bf16 %v6529_v24, %v3639_v31 }
 0x3a4   :  { %v3710_v23 = vadd.bf16 %v6532_v27, %v3640_v39  ;;  %v3305_v63 = vpop.f32.mrb[72].mxu1  ;;  %v3498_v4 = vpop.f32.mrb[232].mxu0  ;;  %v3911_v19 = vadd.f32 %v3848_v0, %v3847_v41  ;;  %v3914_v2 = vadd.f32 %v3850_v11, %v3849_v38 }
 0x3a5   :  { %v4443_v22 = vadd.f32 %v3498_v4, %v3305_v63  ;;  %v3307_v50 = vpop.f32.mrb[73].mxu1  ;;  %v3500_v12 = vpop.f32.mrb[233].mxu0  ;;  %v3741_v56 = vmax.bf16 %v6931_v13, %v3709_v30 }
 0x3a6   :  { %v4444_v18 = vadd.f32 %v3500_v12, %v3307_v50  ;;  %v3309_v62 = vpop.f32.mrb[74].mxu1  ;;  %v3502_v37 = vpop.f32.mrb[234].mxu0  ;;  %3912 = vadd.xlane.f32.xlu0 %v3911_v19  ;;  %v3742_v46 = vmax.bf16 %v6931_v13, %v3710_v23 }
 0x3a7   :  { %v4445_v53 = vadd.f32 %v3502_v37, %v3309_v62  ;;  %v3311_v43 = vpop.f32.mrb[75].mxu1  ;;  %v3504_v49 = vpop.f32.mrb[235].mxu0  ;;  %v3775_v9 = vunpack.c.l.bf16 %v3741_v56  ;;  %v3777_v15 = vunpack.c.h.bf16 %v3741_v56 }
 0x3a8   :  { %v4446_v3 = vadd.f32 %v3504_v49, %v3311_v43  ;;  %v3776_v7 = vunpack.c.l.bf16 %v3742_v46  ;;  %v3778_v34 = vunpack.c.h.bf16 %v3742_v46 }
 0x3a9   :  { %v3641_v33 = vpack.c.bf16 %v4445_v53, %v4443_v22  ;;  %v3851_v5 = vmul.f32 %v6542_v1, %v3775_v9  ;;  %v3853_v58 = vmul.f32 %v6542_v1, %v3777_v15 }
 0x3aa   :  { %v3642_v36 = vpack.c.bf16 %v4446_v3, %v4444_v18  ;;  %3915 = vadd.xlane.f32.xlu0 %v3914_v2  ;;  %v3852_v21 = vmul.f32 %v6544_v45, %v3776_v7  ;;  %v3854_v6 = vmul.f32 %v6544_v45, %v3778_v34 }
 0x3ab   :  { %v3711_v59 = vadd.bf16 %v6529_v24, %v3641_v33 }
 0x3ac   :  { %v3712_v26 = vadd.bf16 %v6532_v27, %v3642_v36  ;;  %v3315_v51 = vpop.f32.mrb[76].mxu1  ;;  %v3508_v40 = vpop.f32.mrb[236].mxu0  ;;  %v3917_v17 = vadd.f32 %v3852_v21, %v3851_v5  ;;  %v3920_v48 = vadd.f32 %v3854_v6, %v3853_v58 }
 0x3ad   :  { %v3743_v47 = vmax.bf16 %v6931_v13, %v3711_v59  ;;  %v4447_v20 = vadd.f32 %v3508_v40, %v3315_v51  ;;  %v3317_v44 = vpop.f32.mrb[77].mxu1  ;;  %v3510_v35 = vpop.f32.mrb[237].mxu0 }
 0x3ae   :  { %v3744_v8 = vmax.bf16 %v6931_v13, %v3712_v26  ;;  %v4448_v61 = vadd.f32 %v3510_v35, %v3317_v44  ;;  %v3319_v25 = vpop.f32.mrb[78].mxu1  ;;  %v3512_v28 = vpop.f32.mrb[238].mxu0  ;;  %3918 = vadd.xlane.f32.xlu1 %v3917_v17 }
 0x3af   :  { %v4449_v55 = vadd.f32 %v3512_v28, %v3319_v25  ;;  %v3321_v32 = vpop.f32.mrb[79].mxu1  ;;  %v3514_v42 = vpop.f32.mrb[239].mxu0  ;;  %v3781_v29 = vunpack.c.h.bf16 %v3743_v47  ;;  %v3779_v60 = vunpack.c.l.bf16 %v3743_v47 }
 0x3b0   :  { %v4450_v14 = vadd.f32 %v3514_v42, %v3321_v32  ;;  %v3782_v57 = vunpack.c.h.bf16 %v3744_v8  ;;  %v3780_v10 = vunpack.c.l.bf16 %v3744_v8 }
 0x3b1   :  { %v3643_v54 = vpack.c.bf16 %v4449_v55, %v4447_v20  ;;  %v3857_v52 = vmul.f32 %v6542_v1, %v3781_v29  ;;  %v3855_v31 = vmul.f32 %v6542_v1, %v3779_v60 }
 0x3b2   :  { %v3644_v41 = vpack.c.bf16 %v4450_v14, %v4448_v61  ;;  %3921 = vadd.xlane.f32.xlu1 %v3920_v48  ;;  %v3858_v38 = vmul.f32 %v6544_v45, %v3782_v57  ;;  %v3856_v39 = vmul.f32 %v6544_v45, %v3780_v10 }
 0x3b3   :  { %v3713_v0 = vadd.bf16 %v6529_v24, %v3643_v54 }
 0x3b4   :  { %v3714_v11 = vadd.bf16 %v6532_v27, %v3644_v41  ;;  %v3325_v30 = vpop.f32.mrb[80].mxu1  ;;  %v3518_v23 = vpop.f32.mrb[240].mxu0  ;;  %v3926_v63 = vadd.f32 %v3858_v38, %v3857_v52  ;;  %v3923_v4 = vadd.f32 %v3856_v39, %v3855_v31 }
 0x3b5   :  { %v3745_v19 = vmax.bf16 %v6931_v13, %v3713_v0  ;;  %v4451_v2 = vadd.f32 %v3518_v23, %v3325_v30  ;;  %v3327_v22 = vpop.f32.mrb[81].mxu1  ;;  %v3520_v50 = vpop.f32.mrb[241].mxu0 }
 0x3b6   :  { %v3746_v12 = vmax.bf16 %v6931_v13, %v3714_v11  ;;  %v4452_v56 = vadd.f32 %v3520_v50, %v3327_v22  ;;  %v3329_v18 = vpop.f32.mrb[82].mxu1  ;;  %v3522_v62 = vpop.f32.mrb[242].mxu0  ;;  %3927 = vadd.xlane.f32.xlu1 %v3926_v63  ;;  %3924 = vadd.xlane.f32.xlu0 %v3923_v4 }
 0x3b7   :  { %v4453_v37 = vadd.f32 %v3522_v62, %v3329_v18  ;;  %v3331_v46 = vpop.f32.mrb[83].mxu1  ;;  %v3524_v53 = vpop.f32.mrb[243].mxu0  ;;  %v3785_v43 = vunpack.c.h.bf16 %v3745_v19  ;;  %v3783_v49 = vunpack.c.l.bf16 %v3745_v19 }
 0x3b8   :  { %v4454_v9 = vadd.f32 %v3524_v53, %v3331_v46  ;;  %v3786_v15 = vunpack.c.h.bf16 %v3746_v12  ;;  %v3784_v3 = vunpack.c.l.bf16 %v3746_v12 }
 0x3b9   :  { %v3645_v7 = vpack.c.bf16 %v4453_v37, %v4451_v2  ;;  %v3861_v34 = vmul.f32 %v6542_v1, %v3785_v43  ;;  %v3859_v33 = vmul.f32 %v6542_v1, %v3783_v49 }
 0x3ba   :  { %v3646_v5 = vpack.c.bf16 %v4454_v9, %v4452_v56  ;;  %v3862_v58 = vmul.f32 %v6544_v45, %v3786_v15  ;;  %v3860_v36 = vmul.f32 %v6544_v45, %v3784_v3 }
 0x3bb   :  { %v3715_v21 = vadd.bf16 %v6529_v24, %v3645_v7 }
 0x3bc   :  { %v3716_v6 = vadd.bf16 %v6532_v27, %v3646_v5  ;;  %v3335_v59 = vpop.f32.mrb[84].mxu1  ;;  %v3528_v16 = vpop.f32.mrb[244].mxu0  ;;  %v3932_v26 = vadd.f32 %v3862_v58, %v3861_v34  ;;  %v3929_v51 = vadd.f32 %v3860_v36, %v3859_v33 }
 0x3bd   :  { %v3747_v40 = vmax.bf16 %v6931_v13, %v3715_v21  ;;  %v4455_v17 = vadd.f32 %v3528_v16, %v3335_v59  ;;  %v3337_v48 = vpop.f32.mrb[85].mxu1  ;;  %v3530_v47 = vpop.f32.mrb[245].mxu0 }
 0x3be   :  { %v3748_v20 = vmax.bf16 %v6931_v13, %v3716_v6  ;;  %v4456_v44 = vadd.f32 %v3530_v47, %v3337_v48  ;;  %v3339_v35 = vpop.f32.mrb[86].mxu1  ;;  %v3532_v8 = vpop.f32.mrb[246].mxu0  ;;  %3933 = vadd.xlane.f32.xlu1 %v3932_v26  ;;  %3930 = vadd.xlane.f32.xlu0 %v3929_v51 }
 0x3bf   :  { %v4457_v61 = vadd.f32 %v3532_v8, %v3339_v35  ;;  %v3341_v25 = vpop.f32.mrb[87].mxu1  ;;  %v3534_v28 = vpop.f32.mrb[247].mxu0  ;;  %v3789_v55 = vunpack.c.h.bf16 %v3747_v40  ;;  %v3787_v32 = vunpack.c.l.bf16 %v3747_v40 }
 0x3c0   :  { %v4458_v42 = vadd.f32 %v3534_v28, %v3341_v25  ;;  %v3790_v29 = vunpack.c.h.bf16 %v3748_v20  ;;  %v3788_v60 = vunpack.c.l.bf16 %v3748_v20 }
 0x3c1   :  { %v3647_v14 = vpack.c.bf16 %v4457_v61, %v4455_v17  ;;  %v3865_v57 = vmul.f32 %v6542_v1, %v3789_v55  ;;  %v3863_v10 = vmul.f32 %v6542_v1, %v3787_v32 }
 0x3c2   :  { %v3648_v54 = vpack.c.bf16 %v4458_v42, %v4456_v44  ;;  %v3866_v52 = vmul.f32 %v6544_v45, %v3790_v29  ;;  %v3864_v31 = vmul.f32 %v6544_v45, %v3788_v60 }
 0x3c3   :  { %v3717_v41 = vadd.bf16 %v6529_v24, %v3647_v14 }
 0x3c4   :  { %v3718_v38 = vadd.bf16 %v6532_v27, %v3648_v54  ;;  %v3345_v39 = vpop.f32.mrb[88].mxu1  ;;  %v3538_v0 = vpop.f32.mrb[248].mxu0  ;;  %v3938_v11 = vadd.f32 %v3866_v52, %v3865_v57  ;;  %v3935_v30 = vadd.f32 %v3864_v31, %v3863_v10 }
 0x3c5   :  { %v3749_v23 = vmax.bf16 %v6931_v13, %v3717_v41  ;;  %v4459_v63 = vadd.f32 %v3538_v0, %v3345_v39  ;;  %v3347_v4 = vpop.f32.mrb[89].mxu1  ;;  %v3540_v19 = vpop.f32.mrb[249].mxu0 }
 0x3c6   :  { %v3750_v2 = vmax.bf16 %v6931_v13, %v3718_v38  ;;  %v4460_v22 = vadd.f32 %v3540_v19, %v3347_v4  ;;  %v3349_v50 = vpop.f32.mrb[90].mxu1  ;;  %v3542_v12 = vpop.f32.mrb[250].mxu0  ;;  %3939 = vadd.xlane.f32.xlu1 %v3938_v11  ;;  %3936 = vadd.xlane.f32.xlu0 %v3935_v30 }
 0x3c7   :  { %v4461_v56 = vadd.f32 %v3542_v12, %v3349_v50  ;;  %v3351_v18 = vpop.f32.mrb[91].mxu1  ;;  %v3544_v62 = vpop.f32.mrb[251].mxu0  ;;  %v3793_v37 = vunpack.c.h.bf16 %v3749_v23  ;;  %v3791_v46 = vunpack.c.l.bf16 %v3749_v23 }
 0x3c8   :  { %v4462_v53 = vadd.f32 %v3544_v62, %v3351_v18  ;;  %v3794_v43 = vunpack.c.h.bf16 %v3750_v2  ;;  %v3792_v49 = vunpack.c.l.bf16 %v3750_v2 }
 0x3c9   :  { %v3649_v9 = vpack.c.bf16 %v4461_v56, %v4459_v63  ;;  %v3869_v15 = vmul.f32 %v6542_v1, %v3793_v37  ;;  %v3867_v3 = vmul.f32 %v6542_v1, %v3791_v46 }
 0x3ca   :  { %v3650_v7 = vpack.c.bf16 %v4462_v53, %v4460_v22  ;;  %v3870_v34 = vmul.f32 %v6544_v45, %v3794_v43  ;;  %v3868_v33 = vmul.f32 %v6544_v45, %v3792_v49 }
 0x3cb   :  { %v3719_v5 = vadd.bf16 %v6529_v24, %v3649_v9 }
 0x3cc   :  { %v3720_v58 = vadd.bf16 %v6532_v27, %v3650_v7  ;;  %v3355_v36 = vpop.f32.mrb[92].mxu1  ;;  %v3548_v21 = vpop.f32.mrb[252].mxu0  ;;  %v3944_v6 = vadd.f32 %v3870_v34, %v3869_v15  ;;  %v3941_v59 = vadd.f32 %v3868_v33, %v3867_v3 }
 0x3cd   :  { %v3751_v16 = vmax.bf16 %v6931_v13, %v3719_v5  ;;  %v4463_v26 = vadd.f32 %v3548_v21, %v3355_v36  ;;  %v3357_v51 = vpop.f32.mrb[93].mxu1  ;;  %v3550_v40 = vpop.f32.mrb[253].mxu0 }
 0x3ce   :  { %v3752_v17 = vmax.bf16 %v6931_v13, %v3720_v58  ;;  %v4464_v48 = vadd.f32 %v3550_v40, %v3357_v51  ;;  %v3359_v47 = vpop.f32.mrb[94].mxu1  ;;  %v3552_v20 = vpop.f32.mrb[254].mxu0  ;;  %3945 = vadd.xlane.f32.xlu1 %v3944_v6  ;;  %3942 = vadd.xlane.f32.xlu0 %v3941_v59 }
 0x3cf   :  { %v4465_v44 = vadd.f32 %v3552_v20, %v3359_v47  ;;  %v3361_v35 = vpop.f32.mrb[95].mxu1  ;;  %v3554_v8 = vpop.f32.mrb[255].mxu0  ;;  %v3797_v61 = vunpack.c.h.bf16 %v3751_v16  ;;  %v3795_v25 = vunpack.c.l.bf16 %v3751_v16 }
 0x3d0   :  { %v4466_v28 = vadd.f32 %v3554_v8, %v3361_v35  ;;  %v3798_v55 = vunpack.c.h.bf16 %v3752_v17  ;;  %v3796_v32 = vunpack.c.l.bf16 %v3752_v17 }
 0x3d1   :  { %v3651_v42 = vpack.c.bf16 %v4465_v44, %v4463_v26  ;;  %v3873_v29 = vmul.f32 %v6542_v1, %v3797_v61  ;;  %v3871_v60 = vmul.f32 %v6542_v1, %v3795_v25 }
 0x3d2   :  { %v3652_v14 = vpack.c.bf16 %v4466_v28, %v4464_v48  ;;  %v3874_v57 = vmul.f32 %v6544_v45, %v3798_v55  ;;  %v3872_v10 = vmul.f32 %v6544_v45, %v3796_v32 }
 0x3d3   :  { %v3721_v54 = vadd.bf16 %v6529_v24, %v3651_v42 }
 0x3d4   :  { %v3722_v52 = vadd.bf16 %v6532_v27, %v3652_v14  ;;  %v3365_v31 = vpop.f32.mrb[96].mxu1  ;;  %v3558_v41 = vpop.f32.mrb[0].mxu0  ;;  %v3950_v38 = vadd.f32 %v3874_v57, %v3873_v29  ;;  %v3947_v39 = vadd.f32 %v3872_v10, %v3871_v60 }
 0x3d5   :  { %v3753_v0 = vmax.bf16 %v6931_v13, %v3721_v54  ;;  %v4467_v11 = vadd.f32 %v3558_v41, %v3365_v31  ;;  %v3367_v30 = vpop.f32.mrb[97].mxu1  ;;  %v3560_v23 = vpop.f32.mrb[1].mxu0 }
 0x3d6   :  { %v3754_v63 = vmax.bf16 %v6931_v13, %v3722_v52  ;;  %v4468_v4 = vadd.f32 %v3560_v23, %v3367_v30  ;;  %v3369_v19 = vpop.f32.mrb[98].mxu1  ;;  %v3562_v2 = vpop.f32.mrb[2].mxu0  ;;  %3951 = vadd.xlane.f32.xlu1 %v3950_v38  ;;  %3948 = vadd.xlane.f32.xlu0 %v3947_v39 }
 0x3d7   :  { %v4469_v22 = vadd.f32 %v3562_v2, %v3369_v19  ;;  %v3371_v50 = vpop.f32.mrb[99].mxu1  ;;  %v3564_v12 = vpop.f32.mrb[3].mxu0  ;;  %v3801_v56 = vunpack.c.h.bf16 %v3753_v0  ;;  %v3799_v18 = vunpack.c.l.bf16 %v3753_v0 }
 0x3d8   :  { %v4470_v62 = vadd.f32 %v3564_v12, %v3371_v50  ;;  %v3802_v37 = vunpack.c.h.bf16 %v3754_v63  ;;  %v3800_v46 = vunpack.c.l.bf16 %v3754_v63 }
 0x3d9   :  { %v3653_v53 = vpack.c.bf16 %v4469_v22, %v4467_v11  ;;  %v3877_v43 = vmul.f32 %v6542_v1, %v3801_v56  ;;  %v3875_v49 = vmul.f32 %v6542_v1, %v3799_v18 }
 0x3da   :  { %v3654_v9 = vpack.c.bf16 %v4470_v62, %v4468_v4  ;;  %v3878_v15 = vmul.f32 %v6544_v45, %v3802_v37  ;;  %v3876_v3 = vmul.f32 %v6544_v45, %v3800_v46 }
 0x3db   :  { %v3723_v7 = vadd.bf16 %v6529_v24, %v3653_v53 }
 0x3dc   :  { %v3724_v34 = vadd.bf16 %v6532_v27, %v3654_v9  ;;  %v3375_v33 = vpop.f32.mrb[100].mxu1  ;;  %v3568_v5 = vpop.f32.mrb[4].mxu0  ;;  %v3956_v58 = vadd.f32 %v3878_v15, %v3877_v43  ;;  %v3953_v36 = vadd.f32 %v3876_v3, %v3875_v49 }
 0x3dd   :  { %v3755_v21 = vmax.bf16 %v6931_v13, %v3723_v7  ;;  %v4471_v6 = vadd.f32 %v3568_v5, %v3375_v33  ;;  %v3377_v59 = vpop.f32.mrb[101].mxu1  ;;  %v3570_v16 = vpop.f32.mrb[5].mxu0 }
 0x3de   :  { %v3756_v26 = vmax.bf16 %v6931_v13, %v3724_v34  ;;  %v4472_v51 = vadd.f32 %v3570_v16, %v3377_v59  ;;  %v3379_v40 = vpop.f32.mrb[102].mxu1  ;;  %v3572_v17 = vpop.f32.mrb[6].mxu0  ;;  %3957 = vadd.xlane.f32.xlu1 %v3956_v58  ;;  %3954 = vadd.xlane.f32.xlu0 %v3953_v36 }
 0x3df   :  { %v4473_v48 = vadd.f32 %v3572_v17, %v3379_v40  ;;  %v3381_v47 = vpop.f32.mrb[103].mxu1  ;;  %v3574_v20 = vpop.f32.mrb[7].mxu0  ;;  %v3805_v44 = vunpack.c.h.bf16 %v3755_v21  ;;  %v3803_v35 = vunpack.c.l.bf16 %v3755_v21 }
 0x3e0   :  { %v4474_v8 = vadd.f32 %v3574_v20, %v3381_v47  ;;  %v3806_v61 = vunpack.c.h.bf16 %v3756_v26  ;;  %v3804_v25 = vunpack.c.l.bf16 %v3756_v26 }
 0x3e1   :  { %v3655_v28 = vpack.c.bf16 %v4473_v48, %v4471_v6  ;;  %v3881_v55 = vmul.f32 %v6542_v1, %v3805_v44  ;;  %v3879_v32 = vmul.f32 %v6542_v1, %v3803_v35 }
 0x3e2   :  { %v3656_v42 = vpack.c.bf16 %v4474_v8, %v4472_v51  ;;  %v3882_v29 = vmul.f32 %v6544_v45, %v3806_v61  ;;  %v3880_v60 = vmul.f32 %v6544_v45, %v3804_v25 }
 0x3e3   :  { %v3725_v14 = vadd.bf16 %v6529_v24, %v3655_v28 }
 0x3e4   :  { %v3726_v57 = vadd.bf16 %v6532_v27, %v3656_v42  ;;  %v3385_v10 = vpop.f32.mrb[104].mxu1  ;;  %v3578_v54 = vpop.f32.mrb[8].mxu0  ;;  %v3962_v52 = vadd.f32 %v3882_v29, %v3881_v55  ;;  %v3959_v31 = vadd.f32 %v3880_v60, %v3879_v32 }
 0x3e5   :  { %v3757_v41 = vmax.bf16 %v6931_v13, %v3725_v14  ;;  %v4475_v38 = vadd.f32 %v3578_v54, %v3385_v10  ;;  %v3387_v39 = vpop.f32.mrb[105].mxu1  ;;  %v3580_v0 = vpop.f32.mrb[9].mxu0 }
 0x3e6   :  { %v3758_v11 = vmax.bf16 %v6931_v13, %v3726_v57  ;;  %v4476_v30 = vadd.f32 %v3580_v0, %v3387_v39  ;;  %v3389_v23 = vpop.f32.mrb[106].mxu1  ;;  %v3582_v63 = vpop.f32.mrb[10].mxu0  ;;  %3963 = vadd.xlane.f32.xlu1 %v3962_v52  ;;  %3960 = vadd.xlane.f32.xlu0 %v3959_v31 }
 0x3e7   :  { %v4477_v4 = vadd.f32 %v3582_v63, %v3389_v23  ;;  %v3391_v19 = vpop.f32.mrb[107].mxu1  ;;  %v3584_v2 = vpop.f32.mrb[11].mxu0  ;;  %v3809_v22 = vunpack.c.h.bf16 %v3757_v41  ;;  %v3807_v50 = vunpack.c.l.bf16 %v3757_v41 }
 0x3e8   :  { %v4478_v12 = vadd.f32 %v3584_v2, %v3391_v19  ;;  %v3810_v56 = vunpack.c.h.bf16 %v3758_v11  ;;  %v3808_v18 = vunpack.c.l.bf16 %v3758_v11 }
 0x3e9   :  { %v3657_v62 = vpack.c.bf16 %v4477_v4, %v4475_v38  ;;  %v3885_v37 = vmul.f32 %v6542_v1, %v3809_v22  ;;  %v3883_v46 = vmul.f32 %v6542_v1, %v3807_v50 }
 0x3ea   :  { %v3658_v53 = vpack.c.bf16 %v4478_v12, %v4476_v30  ;;  %v3886_v43 = vmul.f32 %v6544_v45, %v3810_v56  ;;  %v3884_v49 = vmul.f32 %v6544_v45, %v3808_v18 }
 0x3eb   :  { %v3727_v9 = vadd.bf16 %v6529_v24, %v3657_v62 }
 0x3ec   :  { %v3728_v15 = vadd.bf16 %v6532_v27, %v3658_v53  ;;  %v3395_v3 = vpop.f32.mrb[108].mxu1  ;;  %v3588_v7 = vpop.f32.mrb[12].mxu0  ;;  %v3968_v34 = vadd.f32 %v3886_v43, %v3885_v37  ;;  %v3965_v33 = vadd.f32 %v3884_v49, %v3883_v46 }
 0x3ed   :  { %v3759_v5 = vmax.bf16 %v6931_v13, %v3727_v9  ;;  %v4479_v58 = vadd.f32 %v3588_v7, %v3395_v3  ;;  %v3397_v36 = vpop.f32.mrb[109].mxu1  ;;  %v3590_v21 = vpop.f32.mrb[13].mxu0 }
 0x3ee   :  { %v3760_v6 = vmax.bf16 %v6931_v13, %v3728_v15  ;;  %v4480_v59 = vadd.f32 %v3590_v21, %v3397_v36  ;;  %v3399_v16 = vpop.f32.mrb[110].mxu1  ;;  %v3592_v26 = vpop.f32.mrb[14].mxu0  ;;  %3969 = vadd.xlane.f32.xlu1 %v3968_v34  ;;  %3966 = vadd.xlane.f32.xlu0 %v3965_v33 }
 0x3ef   :  { %v4481_v51 = vadd.f32 %v3592_v26, %v3399_v16  ;;  %v3401_v40 = vpop.f32.mrb[111].mxu1  ;;  %v3594_v17 = vpop.f32.mrb[15].mxu0  ;;  %v3813_v48 = vunpack.c.h.bf16 %v3759_v5  ;;  %v3811_v47 = vunpack.c.l.bf16 %v3759_v5 }
 0x3f0   :  { %v4482_v20 = vadd.f32 %v3594_v17, %v3401_v40  ;;  %v3814_v44 = vunpack.c.h.bf16 %v3760_v6  ;;  %v3812_v35 = vunpack.c.l.bf16 %v3760_v6 }
 0x3f1   :  { %v3659_v8 = vpack.c.bf16 %v4481_v51, %v4479_v58  ;;  %v3889_v61 = vmul.f32 %v6542_v1, %v3813_v48  ;;  %v3887_v25 = vmul.f32 %v6542_v1, %v3811_v47 }
 0x3f2   :  { %v3660_v28 = vpack.c.bf16 %v4482_v20, %v4480_v59  ;;  %v3890_v55 = vmul.f32 %v6544_v45, %v3814_v44  ;;  %v3888_v32 = vmul.f32 %v6544_v45, %v3812_v35 }
 0x3f3   :  { %v3729_v42 = vadd.bf16 %v6529_v24, %v3659_v8 }
 0x3f4   :  { %v3730_v29 = vadd.bf16 %v6532_v27, %v3660_v28  ;;  %v3405_v60 = vpop.f32.mrb[112].mxu1  ;;  %v3598_v14 = vpop.f32.mrb[16].mxu0  ;;  %v3974_v57 = vadd.f32 %v3890_v55, %v3889_v61  ;;  %v3971_v10 = vadd.f32 %v3888_v32, %v3887_v25 }
 0x3f5   :  { %v3761_v54 = vmax.bf16 %v6931_v13, %v3729_v42  ;;  %v4483_v52 = vadd.f32 %v3598_v14, %v3405_v60  ;;  %v3407_v31 = vpop.f32.mrb[113].mxu1  ;;  %v3600_v41 = vpop.f32.mrb[17].mxu0 }
 0x3f6   :  { %v3762_v38 = vmax.bf16 %v6931_v13, %v3730_v29  ;;  %v4484_v39 = vadd.f32 %v3600_v41, %v3407_v31  ;;  %v3409_v0 = vpop.f32.mrb[114].mxu1  ;;  %v3602_v11 = vpop.f32.mrb[18].mxu0  ;;  %3975 = vadd.xlane.f32.xlu1 %v3974_v57  ;;  %3972 = vadd.xlane.f32.xlu0 %v3971_v10 }
 0x3f7   :  { %v4485_v30 = vadd.f32 %v3602_v11, %v3409_v0  ;;  %v3411_v23 = vpop.f32.mrb[115].mxu1  ;;  %v3604_v63 = vpop.f32.mrb[19].mxu0  ;;  %v3817_v4 = vunpack.c.h.bf16 %v3761_v54  ;;  %v3815_v19 = vunpack.c.l.bf16 %v3761_v54 }
 0x3f8   :  { %v4486_v2 = vadd.f32 %v3604_v63, %v3411_v23  ;;  %v3818_v22 = vunpack.c.h.bf16 %v3762_v38  ;;  %v3816_v50 = vunpack.c.l.bf16 %v3762_v38 }
 0x3f9   :  { %v3661_v12 = vpack.c.bf16 %v4485_v30, %v4483_v52  ;;  %v3893_v56 = vmul.f32 %v6542_v1, %v3817_v4  ;;  %v3891_v18 = vmul.f32 %v6542_v1, %v3815_v19 }
 0x3fa   :  { %v3662_v62 = vpack.c.bf16 %v4486_v2, %v4484_v39  ;;  %v3894_v37 = vmul.f32 %v6544_v45, %v3818_v22  ;;  %v3892_v46 = vmul.f32 %v6544_v45, %v3816_v50 }
 0x3fb   :  { %v3731_v53 = vadd.bf16 %v6529_v24, %v3661_v12 }
 0x3fc   :  { %v3732_v43 = vadd.bf16 %v6532_v27, %v3662_v62  ;;  %v3980_v49 = vadd.f32 %v3894_v37, %v3893_v56  ;;  %v3977_v9 = vadd.f32 %v3892_v46, %v3891_v18 }
 0x3fd   :  { %v3763_v15 = vmax.bf16 %v6931_v13, %v3731_v53 }
 0x3fe   :  { %v3764_v3 = vmax.bf16 %v6931_v13, %v3732_v43  ;;  %3981 = vadd.xlane.f32.xlu1 %v3980_v49  ;;  %3978 = vadd.xlane.f32.xlu0 %v3977_v9 }
 0x3ff   :  { %v3821_v7 = vunpack.c.h.bf16 %v3763_v15  ;;  %v3819_v34 = vunpack.c.l.bf16 %v3763_v15 }
 0x400   :  { %v3822_v33 = vunpack.c.h.bf16 %v3764_v3  ;;  %v3820_v5 = vunpack.c.l.bf16 %v3764_v3 }
 0x401   :  { %v3897_v58 = vmul.f32 %v6542_v1, %v3821_v7  ;;  %v3895_v36 = vmul.f32 %v6542_v1, %v3819_v34 }
 0x402   :  { %v3898_v21 = vmul.f32 %v6544_v45, %v3822_v33  ;;  %v3896_v6 = vmul.f32 %v6544_v45, %v3820_v5 }
 0x404   :  { %v3986_v59 = vadd.f32 %v3898_v21, %v3897_v58  ;;  %v3983_v16 = vadd.f32 %v3896_v6, %v3895_v36  ;;  %v6674_v6 = vld [vmem:[#allocation2] ss:$0 sm:$0xff] }
 0x406   :  { %3987 = vadd.xlane.f32.xlu1 %v3986_v59  ;;  %3984 = vadd.xlane.f32.xlu0 %v3983_v16 }
 0x414   :  { %v3608_v26 = vpop.f32.mrb[116].mxu1 }
 0x415   :  { %v3610_v51 = vpop.f32.mrb[117].mxu1 }
 0x416   :  { %v3612_v40 = vpop.f32.mrb[118].mxu1 }
 0x417   :  { %v3663_v17 = vpack.c.bf16 %v3612_v40, %v3608_v26  ;;  %v3614_v48 = vpop.f32.mrb[119].mxu1 }
 0x418   :  { %v3664_v47 = vpack.c.bf16 %v3614_v48, %v3610_v51 }
 0x419   :  { %v3733_v20 = vadd.bf16 %v6529_v24, %v3663_v17 }
 0x41a   :  { %v3734_v44 = vadd.bf16 %v6532_v27, %v3664_v47 }
 0x41b   :  { %v3765_v35 = vmax.bf16 %v6931_v13, %v3733_v20 }
 0x41c   :  { %v3766_v8 = vmax.bf16 %v6931_v13, %v3734_v44  ;;  %v3618_v61 = vpop.f32.mrb[120].mxu1 }
 0x41d   :  { %v3620_v25 = vpop.f32.mrb[121].mxu1  ;;  %v3825_v28 = vunpack.c.h.bf16 %v3765_v35  ;;  %v3823_v55 = vunpack.c.l.bf16 %v3765_v35 }
 0x41e   :  { %v3622_v32 = vpop.f32.mrb[122].mxu1  ;;  %v3826_v42 = vunpack.c.h.bf16 %v3766_v8  ;;  %v3824_v29 = vunpack.c.l.bf16 %v3766_v8 }
 0x41f   :  { %v3665_v60 = vpack.c.bf16 %v3622_v32, %v3618_v61  ;;  %v3624_v14 = vpop.f32.mrb[123].mxu1  ;;  %v3901_v57 = vmul.f32 %v6542_v1, %v3825_v28  ;;  %v3899_v10 = vmul.f32 %v6542_v1, %v3823_v55 }
 0x420   :  { %v3666_v54 = vpack.c.bf16 %v3624_v14, %v3620_v25  ;;  %v3902_v52 = vmul.f32 %v6544_v45, %v3826_v42  ;;  %v3900_v31 = vmul.f32 %v6544_v45, %v3824_v29 }
 0x421   :  { %v3735_v41 = vadd.bf16 %v6529_v24, %v3665_v60 }
 0x422   :  { %v3736_v38 = vadd.bf16 %v6532_v27, %v3666_v54  ;;  %v3992_v39 = vadd.f32 %v3902_v52, %v3901_v57  ;;  %v3989_v0 = vadd.f32 %v3900_v31, %v3899_v10 }
 0x423   :  { %v3767_v11 = vmax.bf16 %v6931_v13, %v3735_v41 }
 0x424   :  { %v3768_v30 = vmax.bf16 %v6931_v13, %v3736_v38  ;;  %3993 = vadd.xlane.f32.xlu1 %v3992_v39  ;;  %3990 = vadd.xlane.f32.xlu0 %v3989_v0  ;;  %v3628_v23 = vpop.f32.mrb[124].mxu1 }
 0x425   :  { %v3630_v63 = vpop.f32.mrb[125].mxu1  ;;  %v3829_v4 = vunpack.c.h.bf16 %v3767_v11  ;;  %v3827_v19 = vunpack.c.l.bf16 %v3767_v11 }
 0x426   :  { %v3632_v2 = vpop.f32.mrb[126].mxu1  ;;  %v3830_v22 = vunpack.c.h.bf16 %v3768_v30  ;;  %v3828_v50 = vunpack.c.l.bf16 %v3768_v30 }
 0x427   :  { %v3667_v12 = vpack.c.bf16 %v3632_v2, %v3628_v23  ;;  %v3634_v56 = vpop.f32.mrb[127].mxu1  ;;  %v3905_v18 = vmul.f32 %v6542_v1, %v3829_v4  ;;  %v3903_v62 = vmul.f32 %v6542_v1, %v3827_v19 }
 0x428   :  { %v3668_v37 = vpack.c.bf16 %v3634_v56, %v3630_v63  ;;  %v3906_v46 = vmul.f32 %v6544_v45, %v3830_v22  ;;  %v3904_v53 = vmul.f32 %v6544_v45, %v3828_v50 }
 0x429   :  { %v3737_v43 = vadd.bf16 %v6529_v24, %v3667_v12 }
 0x42a   :  { %v3738_v49 = vadd.bf16 %v6532_v27, %v3668_v37  ;;  %v3998_v9 = vadd.f32 %v3906_v46, %v3905_v18  ;;  %v3995_v15 = vadd.f32 %v3904_v53, %v3903_v62 }
 0x42b   :  { %v3769_v3 = vmax.bf16 %v6931_v13, %v3737_v43 }
 0x42c   :  { %v3770_v7 = vmax.bf16 %v6931_v13, %v3738_v49  ;;  %3999 = vadd.xlane.f32.xlu1 %v3998_v9  ;;  %3996 = vadd.xlane.f32.xlu0 %v3995_v15 }
 0x42d   :  { %v3833_v34 = vunpack.c.h.bf16 %v3769_v3  ;;  %v3831_v33 = vunpack.c.l.bf16 %v3769_v3 }
 0x42e   :  { %v3834_v5 = vunpack.c.h.bf16 %v3770_v7  ;;  %v3832_v58 = vunpack.c.l.bf16 %v3770_v7 }
 0x42f   :  { %v3909_v36 = vmul.f32 %v6542_v1, %v3833_v34  ;;  %v3907_v21 = vmul.f32 %v6542_v1, %v3831_v33 }
 0x430   :  { %v3910_v24 = vmul.f32 %v6544_v45, %v3834_v5  ;;  %v3908_v27 = vmul.f32 %v6544_v45, %v3832_v58 }
 0x432   :  { %v4004_v59 = vadd.f32 %v3910_v24, %v3909_v36  ;;  %v4001_v16 = vadd.f32 %v3908_v27, %v3907_v21 }
 0x433   :  { %v3913_v13 = vpop.xlane.xlu0 %3912 }
 0x434   :  { %v4014_v26 = vadd.f32 %v6674_v6, %v3913_v13  ;;  %4005 = vadd.xlane.f32.xlu1 %v4004_v59  ;;  %4002 = vadd.xlane.f32.xlu0 %v4001_v16 }
 0x436   :  { %4047 = vst.msk [vmem:[%s6845_s9] sm:$0xff] %vm4046_vm4, %v4014_v26 }
 0x437   :  { %v3916_v1 = vpop.xlane.xlu0 %3915 }
 0x438   :  { %v4015_v51 = vadd.f32 %v6674_v6, %v3916_v1 }
 0x43a   :  { %4048 = vst.msk [vmem:[%s6845_s9 + $0x8] sm:$0xff] %vm4046_vm4, %v4015_v51 }
 0x43b   :  { %v3919_v45 = vpop.xlane.xlu1 %3918 }
 0x43c   :  { %v4016_v40 = vadd.f32 %v6674_v6, %v3919_v45 }
 0x43e   :  { %4049 = vst.msk [vmem:[%s6845_s9 + $0x10] sm:$0xff] %vm4046_vm4, %v4016_v40 }
 0x43f   :  { %v3922_v17 = vpop.xlane.xlu1 %3921 }
 0x440   :  { %v4017_v48 = vadd.f32 %v6674_v6, %v3922_v17 }
 0x442   :  { %4050 = vst.msk [vmem:[%s6845_s9 + $0x18] sm:$0xff] %vm4046_vm4, %v4017_v48 }
 0x443   :  { %v3928_v47 = vpop.xlane.xlu1 %3927  ;;  %v3925_v20 = vpop.xlane.xlu0 %3924 }
 0x444   :  { %v4019_v44 = vadd.f32 %v6674_v6, %v3928_v47  ;;  %v4018_v35 = vadd.f32 %v6674_v6, %v3925_v20 }
 0x446   :  { %4052 = vst.msk [vmem:[%s6845_s9 + $0x28] sm:$0xff] %vm4046_vm4, %v4019_v44  ;;  %4051 = vst.msk [vmem:[%s6845_s9 + $0x20] sm:$0xff] %vm4046_vm4, %v4018_v35 }
 0x44b   :  { %v3934_v8 = vpop.xlane.xlu1 %3933  ;;  %v3931_v61 = vpop.xlane.xlu0 %3930 }
 0x44c   :  { %v4021_v25 = vadd.f32 %v6674_v6, %v3934_v8  ;;  %v4020_v28 = vadd.f32 %v6674_v6, %v3931_v61 }
 0x44e   :  { %4054 = vst.msk [vmem:[%s6845_s9 + $0x38] sm:$0xff] %vm4046_vm4, %v4021_v25  ;;  %4053 = vst.msk [vmem:[%s6845_s9 + $0x30] sm:$0xff] %vm4046_vm4, %v4020_v28 }
 0x453   :  { %v3940_v55 = vpop.xlane.xlu1 %3939  ;;  %v3937_v32 = vpop.xlane.xlu0 %3936 }
 0x454   :  { %v4023_v42 = vadd.f32 %v6674_v6, %v3940_v55  ;;  %v4022_v29 = vadd.f32 %v6674_v6, %v3937_v32 }
 0x456   :  { %4056 = vst.msk [vmem:[%s6845_s9 + $0x48] sm:$0xff] %vm4046_vm4, %v4023_v42  ;;  %4055 = vst.msk [vmem:[%s6845_s9 + $0x40] sm:$0xff] %vm4046_vm4, %v4022_v29 }
 0x45b   :  { %v3946_v60 = vpop.xlane.xlu1 %3945  ;;  %v3943_v14 = vpop.xlane.xlu0 %3942 }
 0x45c   :  { %v4025_v57 = vadd.f32 %v6674_v6, %v3946_v60  ;;  %v4024_v10 = vadd.f32 %v6674_v6, %v3943_v14 }
 0x45e   :  { %4058 = vst.msk [vmem:[%s6845_s9 + $0x58] sm:$0xff] %vm4046_vm4, %v4025_v57  ;;  %4057 = vst.msk [vmem:[%s6845_s9 + $0x50] sm:$0xff] %vm4046_vm4, %v4024_v10 }
 0x463   :  { %v3952_v54 = vpop.xlane.xlu1 %3951  ;;  %v3949_v52 = vpop.xlane.xlu0 %3948 }
 0x464   :  { %v4027_v31 = vadd.f32 %v6674_v6, %v3952_v54  ;;  %v4026_v41 = vadd.f32 %v6674_v6, %v3949_v52 }
 0x466   :  { %4060 = vst.msk [vmem:[%s6845_s9 + $0x68] sm:$0xff] %vm4046_vm4, %v4027_v31  ;;  %4059 = vst.msk [vmem:[%s6845_s9 + $0x60] sm:$0xff] %vm4046_vm4, %v4026_v41 }
 0x46b   :  { %v3958_v38 = vpop.xlane.xlu1 %3957  ;;  %v3955_v39 = vpop.xlane.xlu0 %3954 }
 0x46c   :  { %v4029_v0 = vadd.f32 %v6674_v6, %v3958_v38  ;;  %v4028_v11 = vadd.f32 %v6674_v6, %v3955_v39 }
 0x46e   :  { %4062 = vst.msk [vmem:[%s6845_s9 + $0x78] sm:$0xff] %vm4046_vm4, %v4029_v0  ;;  %4061 = vst.msk [vmem:[%s6845_s9 + $0x70] sm:$0xff] %vm4046_vm4, %v4028_v11 }
 0x473   :  { %v3964_v30 = vpop.xlane.xlu1 %3963  ;;  %v3961_v23 = vpop.xlane.xlu0 %3960 }
 0x474   :  { %v4031_v63 = vadd.f32 %v6674_v6, %v3964_v30  ;;  %v4030_v4 = vadd.f32 %v6674_v6, %v3961_v23 }
 0x476   :  { %4064 = vst.msk [vmem:[%s6845_s9 + $0x88] sm:$0xff] %vm4046_vm4, %v4031_v63  ;;  %4063 = vst.msk [vmem:[%s6845_s9 + $0x80] sm:$0xff] %vm4046_vm4, %v4030_v4 }
 0x47b   :  { %v3970_v19 = vpop.xlane.xlu1 %3969  ;;  %v3967_v2 = vpop.xlane.xlu0 %3966 }
 0x47c   :  { %v4033_v22 = vadd.f32 %v6674_v6, %v3970_v19  ;;  %v4032_v50 = vadd.f32 %v6674_v6, %v3967_v2 }
 0x47e   :  { %4066 = vst.msk [vmem:[%s6845_s9 + $0x98] sm:$0xff] %vm4046_vm4, %v4033_v22  ;;  %4065 = vst.msk [vmem:[%s6845_s9 + $0x90] sm:$0xff] %vm4046_vm4, %v4032_v50 }
 0x483   :  { %v3976_v12 = vpop.xlane.xlu1 %3975  ;;  %v3973_v56 = vpop.xlane.xlu0 %3972 }
 0x484   :  { %v4035_v18 = vadd.f32 %v6674_v6, %v3976_v12  ;;  %v4034_v62 = vadd.f32 %v6674_v6, %v3973_v56 }
 0x486   :  { %4068 = vst.msk [vmem:[%s6845_s9 + $0xa8] sm:$0xff] %vm4046_vm4, %v4035_v18  ;;  %4067 = vst.msk [vmem:[%s6845_s9 + $0xa0] sm:$0xff] %vm4046_vm4, %v4034_v62 }
 0x48b   :  { %v3982_v37 = vpop.xlane.xlu1 %3981  ;;  %v3979_v46 = vpop.xlane.xlu0 %3978 }
 0x48c   :  { %v4037_v53 = vadd.f32 %v6674_v6, %v3982_v37  ;;  %v4036_v43 = vadd.f32 %v6674_v6, %v3979_v46 }
 0x48e   :  { %4070 = vst.msk [vmem:[%s6845_s9 + $0xb8] sm:$0xff] %vm4046_vm4, %v4037_v53  ;;  %4069 = vst.msk [vmem:[%s6845_s9 + $0xb0] sm:$0xff] %vm4046_vm4, %v4036_v43 }
 0x493   :  { %v3988_v49 = vpop.xlane.xlu1 %3987  ;;  %v3985_v9 = vpop.xlane.xlu0 %3984 }
 0x494   :  { %v4039_v15 = vadd.f32 %v6674_v6, %v3988_v49  ;;  %v4038_v3 = vadd.f32 %v6674_v6, %v3985_v9 }
 0x496   :  { %4072 = vst.msk [vmem:[%s6845_s9 + $0xc8] sm:$0xff] %vm4046_vm4, %v4039_v15  ;;  %4071 = vst.msk [vmem:[%s6845_s9 + $0xc0] sm:$0xff] %vm4046_vm4, %v4038_v3 }
 0x4b1   :  { %v3994_v7 = vpop.xlane.xlu1 %3993  ;;  %v3991_v34 = vpop.xlane.xlu0 %3990 }
 0x4b2   :  { %v4041_v33 = vadd.f32 %v6674_v6, %v3994_v7  ;;  %v4040_v5 = vadd.f32 %v6674_v6, %v3991_v34 }
 0x4b4   :  { %4074 = vst.msk [vmem:[%s6845_s9 + $0xd8] sm:$0xff] %vm4046_vm4, %v4041_v33  ;;  %4073 = vst.msk [vmem:[%s6845_s9 + $0xd0] sm:$0xff] %vm4046_vm4, %v4040_v5 }
 0x4b9   :  { %v4000_v58 = vpop.xlane.xlu1 %3999  ;;  %v3997_v36 = vpop.xlane.xlu0 %3996 }
 0x4ba   :  { %v4043_v21 = vadd.f32 %v6674_v6, %v4000_v58  ;;  %v4042_v24 = vadd.f32 %v6674_v6, %v3997_v36 }
 0x4bc   :  { %4076 = vst.msk [vmem:[%s6845_s9 + $0xe8] sm:$0xff] %vm4046_vm4, %v4043_v21  ;;  %4075 = vst.msk [vmem:[%s6845_s9 + $0xe0] sm:$0xff] %vm4046_vm4, %v4042_v24 }
 0x4c1   :  { %v4006_v27 = vpop.xlane.xlu1 %4005  ;;  %v4003_v59 = vpop.xlane.xlu0 %4002 }
 0x4c2   :  { %v4045_v16 = vadd.f32 %v6674_v6, %v4006_v27  ;;  %v4044_v13 = vadd.f32 %v6674_v6, %v4003_v59 }
 0x4c4   :  { %4078 = vst.msk [vmem:[%s6845_s9 + $0xf8] sm:$0xff] %vm4046_vm4, %v4045_v16  ;;  %4077 = vst.msk [vmem:[%s6845_s9 + $0xf0] sm:$0xff] %vm4046_vm4, %v4044_v13 }

</bundles_post_ra>
